<compile_context>
chip_gen: v7x
topology: tpu7x:2x2x1
jax: 0.10.0
libtpu: 0.0.40
codegen_flags: <defaults>
</compile_context>

<pallas_src>
import functools

import jax
import jax.numpy as jnp
from jax.experimental import pallas as pl
from jax.experimental.pallas import tpu as pltpu

# ---------------- small ViT config (synthetic, deterministic weights) --------
IMG = 16
PATCH = 8
IN_CHANS = 3
EMBED_DIM = 32
DEPTH = 2
NUM_HEADS = 4
HEAD_DIM = EMBED_DIM // NUM_HEADS
MLP_HIDDEN = EMBED_DIM * 4
NUM_CLASSES = 2
NUM_PATCHES = (IMG // PATCH) ** 2
SEQ = NUM_PATCHES + 1
PATCH_DIM = IN_CHANS * PATCH * PATCH
HEAD_HIDDEN = 512
LN_EPS = 1e-6  # timm ViT uses LayerNorm(eps=1e-6)
VMEM_LIMIT = 32 * 1024 * 1024  # fits v7x's 64 MiB VMEM with headroom


# ----------------------------- in-kernel helpers ------------------------------
def _gelu(x):
    # TODO(synk): timm nn.GELU defaults to the exact erf form; tanh approximation used here.
    c = 0.7978845608028654  # sqrt(2/pi)
    return 0.5 * x * (1.0 + jnp.tanh(c * (x + 0.044715 * x * x * x)))


def _ln(x, g, b):
    mu = jnp.mean(x, axis=-1, keepdims=True)
    var = jnp.mean(jnp.square(x - mu), axis=-1, keepdims=True)
    return (x - mu) * jax.lax.rsqrt(var + LN_EPS) * g + b


# --------------------- fused stream + head kernel (single launch) -------------
def _stream_head_kernel(patches_ref, pw_ref, pb_ref, cls_ref, pos_ref,
                        ln1g_ref, ln1b_ref, qkvw_ref, qkvb_ref,
                        projw_ref, projb_ref, ln2g_ref, ln2b_ref,
                        fc1w_ref, fc1b_ref, fc2w_ref, fc2b_ref,
                        ng_ref, nb_ref,
                        hw1_ref, hb1_ref, hw2_ref, hb2_ref,
                        o_ref,
                        cls_prev_ref,
                        *, batch, fusion):
    f32 = jnp.float32
    scale = HEAD_DIM ** -0.5

    # ---- patch embedding: ONE matmul over all batches, assemble tokens in vregs ----
    pe_all = jnp.dot(patches_ref[...], pw_ref[...],
                     preferred_element_type=f32) + pb_ref[...]
    cls_row = cls_ref[...] + pos_ref[0:1, :]          # (1, D)
    pos_rest = pos_ref[1:SEQ, :]                      # (NUM_PATCHES, D)
    rows = []
    for b in range(batch):
        rows.append(cls_row)
        rows.append(pe_all[b * NUM_PATCHES:(b + 1) * NUM_PATCHES, :] + pos_rest)
    x = jnp.concatenate(rows, axis=0)                 # (batch*SEQ, D), lives in vregs

    # ---- transformer blocks (fully unrolled; all intermediates in vregs) ----
    for d in range(DEPTH):
        # LN1 -> fused QKV projection (one MXU push, kept as a register value)
        xn = _ln(x, ln1g_ref[d], ln1b_ref[d])
        qkv = jnp.dot(xn, qkvw_ref[d], preferred_element_type=f32) + qkvb_ref[d]

        attn_rows = []
        for b in range(batch):
            # one full-width value per batch; per-head q/k/v are vreg lane selects
            qkv_b = qkv[b * SEQ:(b + 1) * SEQ, :]     # (SEQ, 3D)
            head_outs = []
            for h in range(NUM_HEADS):
                c0 = h * HEAD_DIM
                qh = qkv_b[:, c0:c0 + HEAD_DIM]
                kh = qkv_b[:, EMBED_DIM + c0:EMBED_DIM + c0 + HEAD_DIM]
                vh = qkv_b[:, 2 * EMBED_DIM + c0:2 * EMBED_DIM + c0 + HEAD_DIM]
                # contract last (head_dim) axes directly — no explicit k.T
                s = jax.lax.dot_general(qh, kh, (((1,), (1,)), ((), ())),
                                        preferred_element_type=f32) * scale
                s = s - jnp.max(s, axis=-1, keepdims=True)
                p = jnp.exp(s)
                p = p * pl.reciprocal(jnp.sum(p, axis=-1, keepdims=True), approx=True)
                head_outs.append(jnp.dot(p, vh, preferred_element_type=f32))
            # lane-dense head concat per batch, built in registers
            attn_rows.append(jnp.concatenate(head_outs, axis=-1))     # (SEQ, D)
        attn = jnp.concatenate(attn_rows, axis=0)                     # (batch*SEQ, D)

        x = x + jnp.dot(attn, projw_ref[d], preferred_element_type=f32) + projb_ref[d]

        # LN2 -> MLP (fc1 output is lane-dense: rows x 128)
        xn = _ln(x, ln2g_ref[d], ln2b_ref[d])
        hmid = _gelu(jnp.dot(xn, fc1w_ref[d], preferred_element_type=f32) + fc1b_ref[d])
        x = x + jnp.dot(hmid, fc2w_ref[d], preferred_element_type=f32) + fc2b_ref[d]

    # ---- final LayerNorm on the CLS rows only, as one (batch, D) tile ----
    cls = jnp.concatenate([x[b * SEQ:b * SEQ + 1, :] for b in range(batch)], axis=0)
    cls_n = _ln(cls, ng_ref[...], nb_ref[...])        # (batch, D)

    s_idx = pl.program_id(0)

    # Stream 0 (RGB): stash normalized CLS rows in persistent VMEM scratch.
    @pl.when(s_idx == 0)
    def _():
        cls_prev_ref[...] = cls_n

    # Stream 1 (thermal): fusion + classifier head, write logits.
    @pl.when(s_idx == pl.num_programs(0) - 1)
    def _():
        cls_rgb = cls_prev_ref[...]
        cls_th = cls_n
        if fusion == "concat":
            # concat along features == sum of two half-weight matmuls (no concat op)
            hid = (jnp.dot(cls_rgb, hw1_ref[0:EMBED_DIM, :],
                           preferred_element_type=f32)
                   + jnp.dot(cls_th, hw1_ref[EMBED_DIM:2 * EMBED_DIM, :],
                             preferred_element_type=f32))
        else:  # "add"
            hid = jnp.dot(cls_rgb + cls_th, hw1_ref[...], preferred_element_type=f32)
        hid = jnp.maximum(hid + hb1_ref[...], 0.0)    # ReLU
        logits = jnp.dot(hid, hw2_ref[...], preferred_element_type=f32) + hb2_ref[...]
        o_ref[...] = logits.astype(o_ref.dtype)


def _stream_spec(arr):
    rest = tuple(arr.shape[1:])
    n = len(rest)
    # squeeze the leading stream dim; grid index s picks the stream's weights
    return pl.BlockSpec((None,) + rest, lambda s, _n=n: (s,) + (0,) * _n)


def _full_spec(arr):
    n = arr.ndim
    return pl.BlockSpec(arr.shape, lambda s, _n=n: (0,) * _n)


def dual_vit_pallas(patches, sp, hp, fusion):
    """patches: (2, B*NUM_PATCHES, PATCH_DIM) -> logits (B, NUM_CLASSES)."""
    n_streams = patches.shape[0]
    batch = patches.shape[1] // NUM_PATCHES
    stream_ops = [patches, sp["patch_w"], sp["patch_b"], sp["cls"], sp["pos"],
                  sp["ln1_g"], sp["ln1_b"], sp["qkv_w"], sp["qkv_b"],
                  sp["proj_w"], sp["proj_b"], sp["ln2_g"], sp["ln2_b"],
                  sp["fc1_w"], sp["fc1_b"], sp["fc2_w"], sp["fc2_b"],
                  sp["norm_g"], sp["norm_b"]]
    head_ops = [hp["w1"], hp["b1"].reshape(1, -1), hp["w2"], hp["b2"].reshape(1, -1)]
    return pl.pallas_call(
        functools.partial(_stream_head_kernel, batch=batch, fusion=fusion),
        out_shape=jax.ShapeDtypeStruct((batch, NUM_CLASSES), jnp.float32),
        grid=(n_streams,),
        in_specs=[_stream_spec(a) for a in stream_ops] + [_full_spec(a) for a in head_ops],
        out_specs=pl.BlockSpec((batch, NUM_CLASSES), lambda s: (0, 0)),
        scratch_shapes=[
            pltpu.VMEM((batch, EMBED_DIM), jnp.float32),   # stream-0 CLS, carried to step 1
        ],
        compiler_params=pltpu.CompilerParams(
            # output + scratch carry state across the stream axis -> must be sequential
            dimension_semantics=("arbitrary",),
            vmem_limit_bytes=VMEM_LIMIT),
    )(*stream_ops, *head_ops)


# ----------------------------- forward (glue only) ----------------------------
def extract_patches(img):
    """NCHW image -> (B*NUM_PATCHES, C*PATCH*PATCH), feature order (c, ph, pw)."""
    b = img.shape[0]
    gh = gw = IMG // PATCH
    p = img.reshape(b, IN_CHANS, gh, PATCH, gw, PATCH)
    p = p.transpose(0, 2, 4, 1, 3, 5)
    return p.reshape(b * NUM_PATCHES, PATCH_DIM)


def dual_stream_vit(rgb, thermal, params, fusion="concat"):
    if fusion not in ("concat", "add"):
        raise ValueError("Fusion type not supported")
    patches = jnp.stack([extract_patches(rgb), extract_patches(thermal)], axis=0)
    return dual_vit_pallas(patches, params["streams"], params["head"], fusion)


# ----------------------------- deterministic params ---------------------------
def _w(key, shape, scale=0.02):
    return scale * jax.random.normal(key, shape, jnp.float32)


def init_vit_params(key):
    keys = jax.random.split(key, 3 + DEPTH)
    params = {
        "patch_w": _w(keys[0], (PATCH_DIM, EMBED_DIM)),
        "patch_b": jnp.zeros((EMBED_DIM,), jnp.float32),
        "cls_token": _w(keys[1], (1, 1, EMBED_DIM)),
        "pos_embed": _w(keys[2], (1, SEQ, EMBED_DIM)),
        "norm_g": jnp.ones((EMBED_DIM,), jnp.float32),
        "norm_b": jnp.zeros((EMBED_DIM,), jnp.float32),
        "blocks": [],
    }
    for i in range(DEPTH):
        bk = jax.random.split(keys[3 + i], 4)
        params["blocks"].append({
            "ln1_g": jnp.ones((EMBED_DIM,), jnp.float32),
            "ln1_b": jnp.zeros((EMBED_DIM,), jnp.float32),
            "qkv_w": _w(bk[0], (EMBED_DIM, 3 * EMBED_DIM)),
            "qkv_b": jnp.zeros((3 * EMBED_DIM,), jnp.float32),
            "proj_w": _w(bk[1], (EMBED_DIM, EMBED_DIM)),
            "proj_b": jnp.zeros((EMBED_DIM,), jnp.float32),
            "ln2_g": jnp.ones((EMBED_DIM,), jnp.float32),
            "ln2_b": jnp.zeros((EMBED_DIM,), jnp.float32),
            "fc1_w": _w(bk[2], (EMBED_DIM, MLP_HIDDEN)),
            "fc1_b": jnp.zeros((MLP_HIDDEN,), jnp.float32),
            "fc2_w": _w(bk[3], (MLP_HIDDEN, EMBED_DIM)),
            "fc2_b": jnp.zeros((EMBED_DIM,), jnp.float32),
        })
    return params


def stack_stream_params(p_rgb, p_th):
    """Stack the two (independently initialized) ViTs along a leading stream axis."""
    streams = (p_rgb, p_th)

    def stk(fn):
        return jnp.stack([fn(p) for p in streams], axis=0)

    def stk_blocks(name, as_row):
        def per_stream(p):
            leaves = [p["blocks"][d][name] for d in range(DEPTH)]
            if as_row:
                leaves = [l.reshape(1, -1) for l in leaves]
            return jnp.stack(leaves, axis=0)
        return jnp.stack([per_stream(p) for p in streams], axis=0)

    return {
        "patch_w": stk(lambda p: p["patch_w"]),                           # (2, 192, 32)
        "patch_b": stk(lambda p: p["patch_b"].reshape(1, -1)),            # (2, 1, 32)
        "cls": stk(lambda p: p["cls_token"].reshape(1, EMBED_DIM)),       # (2, 1, 32)
        "pos": stk(lambda p: p["pos_embed"].reshape(SEQ, EMBED_DIM)),     # (2, SEQ, 32)
        "norm_g": stk(lambda p: p["norm_g"].reshape(1, -1)),
        "norm_b": stk(lambda p: p["norm_b"].reshape(1, -1)),
        "ln1_g": stk_blocks("ln1_g", True),    # (2, DEPTH, 1, 32)
        "ln1_b": stk_blocks("ln1_b", True),
        "qkv_w": stk_blocks("qkv_w", False),   # (2, DEPTH, 32, 96)
        "qkv_b": stk_blocks("qkv_b", True),
        "proj_w": stk_blocks("proj_w", False),
        "proj_b": stk_blocks("proj_b", True),
        "ln2_g": stk_blocks("ln2_g", True),
        "ln2_b": stk_blocks("ln2_b", True),
        "fc1_w": stk_blocks("fc1_w", False),
        "fc1_b": stk_blocks("fc1_b", True),
        "fc2_w": stk_blocks("fc2_w", False),
        "fc2_b": stk_blocks("fc2_b", True),
    }


def init_params(key):
    k_rgb, k_th, k_h1, k_h2 = jax.random.split(key, 4)
    fusion_dim = 2 * EMBED_DIM  # concat fusion
    return {
        "streams": stack_stream_params(init_vit_params(k_rgb), init_vit_params(k_th)),
        "head": {
            "w1": _w(k_h1, (fusion_dim, HEAD_HIDDEN)),
            "b1": jnp.zeros((HEAD_HIDDEN,), jnp.float32),
            "w2": _w(k_h2, (HEAD_HIDDEN, NUM_CLASSES)),
            "b2": jnp.zeros((NUM_CLASSES,), jnp.float32),
        },
    }


# ----------------------------------- main --------------------------------------
if __name__ == "__main__":
    key = jax.random.PRNGKey(0)
    k_rgb, k_th = jax.random.split(key)
    rgb = jax.random.normal(k_rgb, (2, IN_CHANS, IMG, IMG), jnp.float32)
    thermal = jax.random.normal(k_th, (2, IN_CHANS, IMG, IMG), jnp.float32)

    params = init_params(jax.random.PRNGKey(42))

    fwd = jax.jit(lambda r, t, p: dual_stream_vit(r, t, p, fusion="concat"))
    out = jax.block_until_ready(fwd(rgb, thermal, params))
    assert out.shape == (2, NUM_CLASSES), out.shape
    print("KERNEL_OK")
</pallas_src>

<mosaic_0001>
module attributes {stable_mosaic.version = 11 : i64} {
  func.func @_stream_head_kernel(%arg0: i32, %arg1: memref<1x8x192xf32, #tpu.memory_space<vmem>>, %arg2: memref<1x192x32xf32, #tpu.memory_space<vmem>>, %arg3: memref<1x1x32xf32, #tpu.memory_space<vmem>>, %arg4: memref<1x1x32xf32, #tpu.memory_space<vmem>>, %arg5: memref<1x5x32xf32, #tpu.memory_space<vmem>>, %arg6: memref<1x2x1x32xf32, #tpu.memory_space<vmem>>, %arg7: memref<1x2x1x32xf32, #tpu.memory_space<vmem>>, %arg8: memref<1x2x32x96xf32, #tpu.memory_space<vmem>>, %arg9: memref<1x2x1x96xf32, #tpu.memory_space<vmem>>, %arg10: memref<1x2x32x32xf32, #tpu.memory_space<vmem>>, %arg11: memref<1x2x1x32xf32, #tpu.memory_space<vmem>>, %arg12: memref<1x2x1x32xf32, #tpu.memory_space<vmem>>, %arg13: memref<1x2x1x32xf32, #tpu.memory_space<vmem>>, %arg14: memref<1x2x32x128xf32, #tpu.memory_space<vmem>>, %arg15: memref<1x2x1x128xf32, #tpu.memory_space<vmem>>, %arg16: memref<1x2x128x32xf32, #tpu.memory_space<vmem>>, %arg17: memref<1x2x1x32xf32, #tpu.memory_space<vmem>>, %arg18: memref<1x1x32xf32, #tpu.memory_space<vmem>>, %arg19: memref<1x1x32xf32, #tpu.memory_space<vmem>>, %arg20: memref<64x512xf32, #tpu.memory_space<vmem>>, %arg21: memref<1x512xf32, #tpu.memory_space<vmem>>, %arg22: memref<512x2xf32, #tpu.memory_space<vmem>>, %arg23: memref<1x2xf32, #tpu.memory_space<vmem>>, %arg24: memref<2x2xf32, #tpu.memory_space<vmem>>, %arg25: memref<2x32xf32, #tpu.memory_space<vmem>>) attributes {dimension_semantics = [#tpu.dimension_semantics<arbitrary>], iteration_bounds = array<i64: 2>, scalar_prefetch = 0 : i64, scratch_operands = 1 : i64, tpu.core_type = #tpu.core_type<tc>, window_params = [{transform_indices = @transform_0, window_bounds = array<i64: 1, 8, 192>}, {transform_indices = @transform_1, window_bounds = array<i64: 1, 192, 32>}, {transform_indices = @transform_2, window_bounds = array<i64: 1, 1, 32>}, {transform_indices = @transform_3, window_bounds = array<i64: 1, 1, 32>}, {transform_indices = @transform_4, window_bounds = array<i64: 1, 5, 32>}, {transform_indices = @transform_5, window_bounds = array<i64: 1, 2, 1, 32>}, {transform_indices = @transform_6, window_bounds = array<i64: 1, 2, 1, 32>}, {transform_indices = @transform_7, window_bounds = array<i64: 1, 2, 32, 96>}, {transform_indices = @transform_8, window_bounds = array<i64: 1, 2, 1, 96>}, {transform_indices = @transform_9, window_bounds = array<i64: 1, 2, 32, 32>}, {transform_indices = @transform_10, window_bounds = array<i64: 1, 2, 1, 32>}, {transform_indices = @transform_11, window_bounds = array<i64: 1, 2, 1, 32>}, {transform_indices = @transform_12, window_bounds = array<i64: 1, 2, 1, 32>}, {transform_indices = @transform_13, window_bounds = array<i64: 1, 2, 32, 128>}, {transform_indices = @transform_14, window_bounds = array<i64: 1, 2, 1, 128>}, {transform_indices = @transform_15, window_bounds = array<i64: 1, 2, 128, 32>}, {transform_indices = @transform_16, window_bounds = array<i64: 1, 2, 1, 32>}, {transform_indices = @transform_17, window_bounds = array<i64: 1, 1, 32>}, {transform_indices = @transform_18, window_bounds = array<i64: 1, 1, 32>}, {pipeline_mode = #tpu.pipeline_mode<synchronous>, transform_indices = @transform_19, window_bounds = array<i64: 64, 512>}, {pipeline_mode = #tpu.pipeline_mode<synchronous>, transform_indices = @transform_20, window_bounds = array<i64: 1, 512>}, {pipeline_mode = #tpu.pipeline_mode<synchronous>, transform_indices = @transform_21, window_bounds = array<i64: 512, 2>}, {pipeline_mode = #tpu.pipeline_mode<synchronous>, transform_indices = @transform_22, window_bounds = array<i64: 1, 2>}, {pipeline_mode = #tpu.pipeline_mode<synchronous>, transform_indices = @transform_23, window_bounds = array<i64: 2, 2>}]} {
    %c0 = arith.constant 0 : index
    %c0_0 = arith.constant 0 : index
    %c0_1 = arith.constant 0 : index
    %0 = vector.load %arg1[%c0, %c0_0, %c0_1] : memref<1x8x192xf32, #tpu.memory_space<vmem>>, vector<1x8x192xf32>
    %1 = vector.shape_cast %0 : vector<1x8x192xf32> to vector<8x192xf32>
    %c0_2 = arith.constant 0 : index
    %c0_3 = arith.constant 0 : index
    %c0_4 = arith.constant 0 : index
    %2 = vector.load %arg2[%c0_2, %c0_3, %c0_4] : memref<1x192x32xf32, #tpu.memory_space<vmem>>, vector<1x192x32xf32>
    %3 = vector.shape_cast %2 : vector<1x192x32xf32> to vector<192x32xf32>
    %cst = arith.constant dense<0.000000e+00> : vector<8x32xf32>
    %4 = tpu.matmul %1, %3, %cst {dimension_numbers = #tpu.dot_dimension_numbers<[1], [0], [0], [1], [0, 0, 1, 1], [], []>} : vector<8x192xf32>, vector<192x32xf32>, vector<8x32xf32> -> vector<8x32xf32>
    %c0_5 = arith.constant 0 : index
    %c0_6 = arith.constant 0 : index
    %c0_7 = arith.constant 0 : index
    %5 = vector.load %arg3[%c0_5, %c0_6, %c0_7] : memref<1x1x32xf32, #tpu.memory_space<vmem>>, vector<1x1x32xf32>
    %6 = vector.shape_cast %5 : vector<1x1x32xf32> to vector<1x32xf32>
    %7 = vector.broadcast %6 : vector<1x32xf32> to vector<8x32xf32>
    %8 = arith.addf %4, %7 : vector<8x32xf32>
    %c0_8 = arith.constant 0 : index
    %c0_9 = arith.constant 0 : index
    %c0_10 = arith.constant 0 : index
    %9 = vector.load %arg4[%c0_8, %c0_9, %c0_10] : memref<1x1x32xf32, #tpu.memory_space<vmem>>, vector<1x1x32xf32>
    %10 = vector.shape_cast %9 : vector<1x1x32xf32> to vector<1x32xf32>
    %c0_11 = arith.constant 0 : index
    %c0_12 = arith.constant 0 : index
    %c0_13 = arith.constant 0 : index
    %11 = vector.load %arg5[%c0_11, %c0_12, %c0_13] : memref<1x5x32xf32, #tpu.memory_space<vmem>>, vector<1x1x32xf32>
    %12 = vector.shape_cast %11 : vector<1x1x32xf32> to vector<1x32xf32>
    %13 = arith.addf %10, %12 : vector<1x32xf32>
    %c0_14 = arith.constant 0 : index
    %c1 = arith.constant 1 : index
    %c0_15 = arith.constant 0 : index
    %14 = vector.load %arg5[%c0_14, %c1, %c0_15] : memref<1x5x32xf32, #tpu.memory_space<vmem>>, vector<1x4x32xf32>
    %15 = vector.shape_cast %14 : vector<1x4x32xf32> to vector<4x32xf32>
    %16 = vector.extract_strided_slice %8 {offsets = [0, 0], sizes = [4, 32], strides = [1, 1]} : vector<8x32xf32> to vector<4x32xf32>
    %17 = arith.addf %16, %15 : vector<4x32xf32>
    %18 = vector.extract_strided_slice %8 {offsets = [4, 0], sizes = [4, 32], strides = [1, 1]} : vector<8x32xf32> to vector<4x32xf32>
    %19 = arith.addf %18, %15 : vector<4x32xf32>
    %20 = tpu.concatenate %13, %17, %13, %19 in 0 : vector<1x32xf32>, vector<4x32xf32>, vector<1x32xf32>, vector<4x32xf32> -> vector<10x32xf32>
    %c0_16 = arith.constant 0 : index
    %c0_17 = arith.constant 0 : index
    %c0_18 = arith.constant 0 : index
    %c0_19 = arith.constant 0 : index
    %21 = vector.load %arg6[%c0_16, %c0_17, %c0_18, %c0_19] : memref<1x2x1x32xf32, #tpu.memory_space<vmem>>, vector<1x1x1x32xf32>
    %22 = vector.shape_cast %21 : vector<1x1x1x32xf32> to vector<1x32xf32>
    %c0_20 = arith.constant 0 : index
    %c0_21 = arith.constant 0 : index
    %c0_22 = arith.constant 0 : index
    %c0_23 = arith.constant 0 : index
    %23 = vector.load %arg7[%c0_20, %c0_21, %c0_22, %c0_23] : memref<1x2x1x32xf32, #tpu.memory_space<vmem>>, vector<1x1x1x32xf32>
    %24 = vector.shape_cast %23 : vector<1x1x1x32xf32> to vector<1x32xf32>
    %cst_24 = arith.constant dense<0.000000e+00> : vector<10xf32>
    %25 = vector.multi_reduction <add>, %20, %cst_24 [1] : vector<10x32xf32> to vector<10xf32>
    %26 = vector.shape_cast %25 : vector<10xf32> to vector<10x1xf32>
    %cst_25 = arith.constant 3.200000e+01 : f32
    %27 = vector.broadcast %cst_25 : f32 to vector<10x1xf32>
    %28 = arith.divf %26, %27 : vector<10x1xf32>
    %29 = vector.broadcast %28 : vector<10x1xf32> to vector<10x32xf32>
    %30 = arith.subf %20, %29 : vector<10x32xf32>
    %31 = arith.mulf %30, %30 : vector<10x32xf32>
    %cst_26 = arith.constant dense<0.000000e+00> : vector<10xf32>
    %32 = vector.multi_reduction <add>, %31, %cst_26 [1] : vector<10x32xf32> to vector<10xf32>
    %33 = vector.shape_cast %32 : vector<10xf32> to vector<10x1xf32>
    %cst_27 = arith.constant 3.200000e+01 : f32
    %34 = vector.broadcast %cst_27 : f32 to vector<10x1xf32>
    %35 = arith.divf %33, %34 : vector<10x1xf32>
    %36 = vector.broadcast %28 : vector<10x1xf32> to vector<10x32xf32>
    %37 = arith.subf %20, %36 : vector<10x32xf32>
    %cst_28 = arith.constant 9.99999997E-7 : f32
    %38 = vector.broadcast %cst_28 : f32 to vector<10x1xf32>
    %39 = arith.addf %35, %38 : vector<10x1xf32>
    %40 = math.rsqrt %39 : vector<10x1xf32>
    %41 = vector.broadcast %40 : vector<10x1xf32> to vector<10x32xf32>
    %42 = arith.mulf %37, %41 : vector<10x32xf32>
    %43 = vector.broadcast %22 : vector<1x32xf32> to vector<10x32xf32>
    %44 = arith.mulf %42, %43 : vector<10x32xf32>
    %45 = vector.broadcast %24 : vector<1x32xf32> to vector<10x32xf32>
    %46 = arith.addf %44, %45 : vector<10x32xf32>
    %c0_29 = arith.constant 0 : index
    %c0_30 = arith.constant 0 : index
    %c0_31 = arith.constant 0 : index
    %c0_32 = arith.constant 0 : index
    %47 = vector.load %arg8[%c0_29, %c0_30, %c0_31, %c0_32] : memref<1x2x32x96xf32, #tpu.memory_space<vmem>>, vector<1x1x32x96xf32>
    %48 = vector.shape_cast %47 : vector<1x1x32x96xf32> to vector<32x96xf32>
    %cst_33 = arith.constant dense<0.000000e+00> : vector<10x96xf32>
    %49 = tpu.matmul %46, %48, %cst_33 {dimension_numbers = #tpu.dot_dimension_numbers<[1], [0], [0], [1], [0, 0, 1, 1], [], []>} : vector<10x32xf32>, vector<32x96xf32>, vector<10x96xf32> -> vector<10x96xf32>
    %c0_34 = arith.constant 0 : index
    %c0_35 = arith.constant 0 : index
    %c0_36 = arith.constant 0 : index
    %c0_37 = arith.constant 0 : index
    %50 = vector.load %arg9[%c0_34, %c0_35, %c0_36, %c0_37] : memref<1x2x1x96xf32, #tpu.memory_space<vmem>>, vector<1x1x1x96xf32>
    %51 = vector.shape_cast %50 : vector<1x1x1x96xf32> to vector<1x96xf32>
    %52 = vector.broadcast %51 : vector<1x96xf32> to vector<10x96xf32>
    %53 = arith.addf %49, %52 : vector<10x96xf32>
    %54 = vector.extract_strided_slice %53 {offsets = [0, 0], sizes = [5, 96], strides = [1, 1]} : vector<10x96xf32> to vector<5x96xf32>
    %55 = vector.extract_strided_slice %54 {offsets = [0, 0], sizes = [5, 8], strides = [1, 1]} : vector<5x96xf32> to vector<5x8xf32>
    %56 = vector.extract_strided_slice %54 {offsets = [0, 32], sizes = [5, 8], strides = [1, 1]} : vector<5x96xf32> to vector<5x8xf32>
    %57 = vector.extract_strided_slice %54 {offsets = [0, 64], sizes = [5, 8], strides = [1, 1]} : vector<5x96xf32> to vector<5x8xf32>
    %cst_38 = arith.constant dense<0.000000e+00> : vector<5x5xf32>
    %58 = tpu.matmul %55, %56, %cst_38 {dimension_numbers = #tpu.dot_dimension_numbers<[1], [1], [0], [0], [0, 0, 1, 0], [], []>} : vector<5x8xf32>, vector<5x8xf32>, vector<5x5xf32> -> vector<5x5xf32>
    %cst_39 = arith.constant 0.353553385 : f32
    %59 = vector.broadcast %cst_39 : f32 to vector<5x5xf32>
    %60 = arith.mulf %58, %59 : vector<5x5xf32>
    %cst_40 = arith.constant dense<0xFF800000> : vector<5xf32>
    %61 = vector.multi_reduction <maximumf>, %60, %cst_40 [1] : vector<5x5xf32> to vector<5xf32>
    %62 = vector.shape_cast %61 : vector<5xf32> to vector<5x1xf32>
    %63 = vector.broadcast %62 : vector<5x1xf32> to vector<5x5xf32>
    %64 = arith.subf %60, %63 : vector<5x5xf32>
    %65 = math.exp %64 : vector<5x5xf32>
    %cst_41 = arith.constant dense<0.000000e+00> : vector<5xf32>
    %66 = vector.multi_reduction <add>, %65, %cst_41 [1] : vector<5x5xf32> to vector<5xf32>
    %67 = vector.shape_cast %66 : vector<5xf32> to vector<5x1xf32>
    %68 = tpu.reciprocal %67 {approx = true} : vector<5x1xf32> -> vector<5x1xf32>
    %69 = vector.broadcast %68 : vector<5x1xf32> to vector<5x5xf32>
    %70 = arith.mulf %65, %69 : vector<5x5xf32>
    %cst_42 = arith.constant dense<0.000000e+00> : vector<5x8xf32>
    %71 = tpu.matmul %70, %57, %cst_42 {dimension_numbers = #tpu.dot_dimension_numbers<[1], [0], [0], [1], [0, 0, 1, 1], [], []>} : vector<5x5xf32>, vector<5x8xf32>, vector<5x8xf32> -> vector<5x8xf32>
    %72 = vector.extract_strided_slice %54 {offsets = [0, 8], sizes = [5, 8], strides = [1, 1]} : vector<5x96xf32> to vector<5x8xf32>
    %73 = vector.extract_strided_slice %54 {offsets = [0, 40], sizes = [5, 8], strides = [1, 1]} : vector<5x96xf32> to vector<5x8xf32>
    %74 = vector.extract_strided_slice %54 {offsets = [0, 72], sizes = [5, 8], strides = [1, 1]} : vector<5x96xf32> to vector<5x8xf32>
    %cst_43 = arith.constant dense<0.000000e+00> : vector<5x5xf32>
    %75 = tpu.matmul %72, %73, %cst_43 {dimension_numbers = #tpu.dot_dimension_numbers<[1], [1], [0], [0], [0, 0, 1, 0], [], []>} : vector<5x8xf32>, vector<5x8xf32>, vector<5x5xf32> -> vector<5x5xf32>
    %cst_44 = arith.constant 0.353553385 : f32
    %76 = vector.broadcast %cst_44 : f32 to vector<5x5xf32>
    %77 = arith.mulf %75, %76 : vector<5x5xf32>
    %cst_45 = arith.constant dense<0xFF800000> : vector<5xf32>
    %78 = vector.multi_reduction <maximumf>, %77, %cst_45 [1] : vector<5x5xf32> to vector<5xf32>
    %79 = vector.shape_cast %78 : vector<5xf32> to vector<5x1xf32>
    %80 = vector.broadcast %79 : vector<5x1xf32> to vector<5x5xf32>
    %81 = arith.subf %77, %80 : vector<5x5xf32>
    %82 = math.exp %81 : vector<5x5xf32>
    %cst_46 = arith.constant dense<0.000000e+00> : vector<5xf32>
    %83 = vector.multi_reduction <add>, %82, %cst_46 [1] : vector<5x5xf32> to vector<5xf32>
    %84 = vector.shape_cast %83 : vector<5xf32> to vector<5x1xf32>
    %85 = tpu.reciprocal %84 {approx = true} : vector<5x1xf32> -> vector<5x1xf32>
    %86 = vector.broadcast %85 : vector<5x1xf32> to vector<5x5xf32>
    %87 = arith.mulf %82, %86 : vector<5x5xf32>
    %cst_47 = arith.constant dense<0.000000e+00> : vector<5x8xf32>
    %88 = tpu.matmul %87, %74, %cst_47 {dimension_numbers = #tpu.dot_dimension_numbers<[1], [0], [0], [1], [0, 0, 1, 1], [], []>} : vector<5x5xf32>, vector<5x8xf32>, vector<5x8xf32> -> vector<5x8xf32>
    %89 = vector.extract_strided_slice %54 {offsets = [0, 16], sizes = [5, 8], strides = [1, 1]} : vector<5x96xf32> to vector<5x8xf32>
    %90 = vector.extract_strided_slice %54 {offsets = [0, 48], sizes = [5, 8], strides = [1, 1]} : vector<5x96xf32> to vector<5x8xf32>
    %91 = vector.extract_strided_slice %54 {offsets = [0, 80], sizes = [5, 8], strides = [1, 1]} : vector<5x96xf32> to vector<5x8xf32>
    %cst_48 = arith.constant dense<0.000000e+00> : vector<5x5xf32>
    %92 = tpu.matmul %89, %90, %cst_48 {dimension_numbers = #tpu.dot_dimension_numbers<[1], [1], [0], [0], [0, 0, 1, 0], [], []>} : vector<5x8xf32>, vector<5x8xf32>, vector<5x5xf32> -> vector<5x5xf32>
    %cst_49 = arith.constant 0.353553385 : f32
    %93 = vector.broadcast %cst_49 : f32 to vector<5x5xf32>
    %94 = arith.mulf %92, %93 : vector<5x5xf32>
    %cst_50 = arith.constant dense<0xFF800000> : vector<5xf32>
    %95 = vector.multi_reduction <maximumf>, %94, %cst_50 [1] : vector<5x5xf32> to vector<5xf32>
    %96 = vector.shape_cast %95 : vector<5xf32> to vector<5x1xf32>
    %97 = vector.broadcast %96 : vector<5x1xf32> to vector<5x5xf32>
    %98 = arith.subf %94, %97 : vector<5x5xf32>
    %99 = math.exp %98 : vector<5x5xf32>
    %cst_51 = arith.constant dense<0.000000e+00> : vector<5xf32>
    %100 = vector.multi_reduction <add>, %99, %cst_51 [1] : vector<5x5xf32> to vector<5xf32>
    %101 = vector.shape_cast %100 : vector<5xf32> to vector<5x1xf32>
    %102 = tpu.reciprocal %101 {approx = true} : vector<5x1xf32> -> vector<5x1xf32>
    %103 = vector.broadcast %102 : vector<5x1xf32> to vector<5x5xf32>
    %104 = arith.mulf %99, %103 : vector<5x5xf32>
    %cst_52 = arith.constant dense<0.000000e+00> : vector<5x8xf32>
    %105 = tpu.matmul %104, %91, %cst_52 {dimension_numbers = #tpu.dot_dimension_numbers<[1], [0], [0], [1], [0, 0, 1, 1], [], []>} : vector<5x5xf32>, vector<5x8xf32>, vector<5x8xf32> -> vector<5x8xf32>
    %106 = vector.extract_strided_slice %54 {offsets = [0, 24], sizes = [5, 8], strides = [1, 1]} : vector<5x96xf32> to vector<5x8xf32>
    %107 = vector.extract_strided_slice %54 {offsets = [0, 56], sizes = [5, 8], strides = [1, 1]} : vector<5x96xf32> to vector<5x8xf32>
    %108 = vector.extract_strided_slice %54 {offsets = [0, 88], sizes = [5, 8], strides = [1, 1]} : vector<5x96xf32> to vector<5x8xf32>
    %cst_53 = arith.constant dense<0.000000e+00> : vector<5x5xf32>
    %109 = tpu.matmul %106, %107, %cst_53 {dimension_numbers = #tpu.dot_dimension_numbers<[1], [1], [0], [0], [0, 0, 1, 0], [], []>} : vector<5x8xf32>, vector<5x8xf32>, vector<5x5xf32> -> vector<5x5xf32>
    %cst_54 = arith.constant 0.353553385 : f32
    %110 = vector.broadcast %cst_54 : f32 to vector<5x5xf32>
    %111 = arith.mulf %109, %110 : vector<5x5xf32>
    %cst_55 = arith.constant dense<0xFF800000> : vector<5xf32>
    %112 = vector.multi_reduction <maximumf>, %111, %cst_55 [1] : vector<5x5xf32> to vector<5xf32>
    %113 = vector.shape_cast %112 : vector<5xf32> to vector<5x1xf32>
    %114 = vector.broadcast %113 : vector<5x1xf32> to vector<5x5xf32>
    %115 = arith.subf %111, %114 : vector<5x5xf32>
    %116 = math.exp %115 : vector<5x5xf32>
    %cst_56 = arith.constant dense<0.000000e+00> : vector<5xf32>
    %117 = vector.multi_reduction <add>, %116, %cst_56 [1] : vector<5x5xf32> to vector<5xf32>
    %118 = vector.shape_cast %117 : vector<5xf32> to vector<5x1xf32>
    %119 = tpu.reciprocal %118 {approx = true} : vector<5x1xf32> -> vector<5x1xf32>
    %120 = vector.broadcast %119 : vector<5x1xf32> to vector<5x5xf32>
    %121 = arith.mulf %116, %120 : vector<5x5xf32>
    %cst_57 = arith.constant dense<0.000000e+00> : vector<5x8xf32>
    %122 = tpu.matmul %121, %108, %cst_57 {dimension_numbers = #tpu.dot_dimension_numbers<[1], [0], [0], [1], [0, 0, 1, 1], [], []>} : vector<5x5xf32>, vector<5x8xf32>, vector<5x8xf32> -> vector<5x8xf32>
    %123 = tpu.concatenate %71, %88, %105, %122 in 1 : vector<5x8xf32>, vector<5x8xf32>, vector<5x8xf32>, vector<5x8xf32> -> vector<5x32xf32>
    %124 = vector.extract_strided_slice %53 {offsets = [5, 0], sizes = [5, 96], strides = [1, 1]} : vector<10x96xf32> to vector<5x96xf32>
    %125 = vector.extract_strided_slice %124 {offsets = [0, 0], sizes = [5, 8], strides = [1, 1]} : vector<5x96xf32> to vector<5x8xf32>
    %126 = vector.extract_strided_slice %124 {offsets = [0, 32], sizes = [5, 8], strides = [1, 1]} : vector<5x96xf32> to vector<5x8xf32>
    %127 = vector.extract_strided_slice %124 {offsets = [0, 64], sizes = [5, 8], strides = [1, 1]} : vector<5x96xf32> to vector<5x8xf32>
    %cst_58 = arith.constant dense<0.000000e+00> : vector<5x5xf32>
    %128 = tpu.matmul %125, %126, %cst_58 {dimension_numbers = #tpu.dot_dimension_numbers<[1], [1], [0], [0], [0, 0, 1, 0], [], []>} : vector<5x8xf32>, vector<5x8xf32>, vector<5x5xf32> -> vector<5x5xf32>
    %cst_59 = arith.constant 0.353553385 : f32
    %129 = vector.broadcast %cst_59 : f32 to vector<5x5xf32>
    %130 = arith.mulf %128, %129 : vector<5x5xf32>
    %cst_60 = arith.constant dense<0xFF800000> : vector<5xf32>
    %131 = vector.multi_reduction <maximumf>, %130, %cst_60 [1] : vector<5x5xf32> to vector<5xf32>
    %132 = vector.shape_cast %131 : vector<5xf32> to vector<5x1xf32>
    %133 = vector.broadcast %132 : vector<5x1xf32> to vector<5x5xf32>
    %134 = arith.subf %130, %133 : vector<5x5xf32>
    %135 = math.exp %134 : vector<5x5xf32>
    %cst_61 = arith.constant dense<0.000000e+00> : vector<5xf32>
    %136 = vector.multi_reduction <add>, %135, %cst_61 [1] : vector<5x5xf32> to vector<5xf32>
    %137 = vector.shape_cast %136 : vector<5xf32> to vector<5x1xf32>
    %138 = tpu.reciprocal %137 {approx = true} : vector<5x1xf32> -> vector<5x1xf32>
    %139 = vector.broadcast %138 : vector<5x1xf32> to vector<5x5xf32>
    %140 = arith.mulf %135, %139 : vector<5x5xf32>
    %cst_62 = arith.constant dense<0.000000e+00> : vector<5x8xf32>
    %141 = tpu.matmul %140, %127, %cst_62 {dimension_numbers = #tpu.dot_dimension_numbers<[1], [0], [0], [1], [0, 0, 1, 1], [], []>} : vector<5x5xf32>, vector<5x8xf32>, vector<5x8xf32> -> vector<5x8xf32>
    %142 = vector.extract_strided_slice %124 {offsets = [0, 8], sizes = [5, 8], strides = [1, 1]} : vector<5x96xf32> to vector<5x8xf32>
    %143 = vector.extract_strided_slice %124 {offsets = [0, 40], sizes = [5, 8], strides = [1, 1]} : vector<5x96xf32> to vector<5x8xf32>
    %144 = vector.extract_strided_slice %124 {offsets = [0, 72], sizes = [5, 8], strides = [1, 1]} : vector<5x96xf32> to vector<5x8xf32>
    %cst_63 = arith.constant dense<0.000000e+00> : vector<5x5xf32>
    %145 = tpu.matmul %142, %143, %cst_63 {dimension_numbers = #tpu.dot_dimension_numbers<[1], [1], [0], [0], [0, 0, 1, 0], [], []>} : vector<5x8xf32>, vector<5x8xf32>, vector<5x5xf32> -> vector<5x5xf32>
    %cst_64 = arith.constant 0.353553385 : f32
    %146 = vector.broadcast %cst_64 : f32 to vector<5x5xf32>
    %147 = arith.mulf %145, %146 : vector<5x5xf32>
    %cst_65 = arith.constant dense<0xFF800000> : vector<5xf32>
    %148 = vector.multi_reduction <maximumf>, %147, %cst_65 [1] : vector<5x5xf32> to vector<5xf32>
    %149 = vector.shape_cast %148 : vector<5xf32> to vector<5x1xf32>
    %150 = vector.broadcast %149 : vector<5x1xf32> to vector<5x5xf32>
    %151 = arith.subf %147, %150 : vector<5x5xf32>
    %152 = math.exp %151 : vector<5x5xf32>
    %cst_66 = arith.constant dense<0.000000e+00> : vector<5xf32>
    %153 = vector.multi_reduction <add>, %152, %cst_66 [1] : vector<5x5xf32> to vector<5xf32>
    %154 = vector.shape_cast %153 : vector<5xf32> to vector<5x1xf32>
    %155 = tpu.reciprocal %154 {approx = true} : vector<5x1xf32> -> vector<5x1xf32>
    %156 = vector.broadcast %155 : vector<5x1xf32> to vector<5x5xf32>
    %157 = arith.mulf %152, %156 : vector<5x5xf32>
    %cst_67 = arith.constant dense<0.000000e+00> : vector<5x8xf32>
    %158 = tpu.matmul %157, %144, %cst_67 {dimension_numbers = #tpu.dot_dimension_numbers<[1], [0], [0], [1], [0, 0, 1, 1], [], []>} : vector<5x5xf32>, vector<5x8xf32>, vector<5x8xf32> -> vector<5x8xf32>
    %159 = vector.extract_strided_slice %124 {offsets = [0, 16], sizes = [5, 8], strides = [1, 1]} : vector<5x96xf32> to vector<5x8xf32>
    %160 = vector.extract_strided_slice %124 {offsets = [0, 48], sizes = [5, 8], strides = [1, 1]} : vector<5x96xf32> to vector<5x8xf32>
    %161 = vector.extract_strided_slice %124 {offsets = [0, 80], sizes = [5, 8], strides = [1, 1]} : vector<5x96xf32> to vector<5x8xf32>
    %cst_68 = arith.constant dense<0.000000e+00> : vector<5x5xf32>
    %162 = tpu.matmul %159, %160, %cst_68 {dimension_numbers = #tpu.dot_dimension_numbers<[1], [1], [0], [0], [0, 0, 1, 0], [], []>} : vector<5x8xf32>, vector<5x8xf32>, vector<5x5xf32> -> vector<5x5xf32>
    %cst_69 = arith.constant 0.353553385 : f32
    %163 = vector.broadcast %cst_69 : f32 to vector<5x5xf32>
    %164 = arith.mulf %162, %163 : vector<5x5xf32>
    %cst_70 = arith.constant dense<0xFF800000> : vector<5xf32>
    %165 = vector.multi_reduction <maximumf>, %164, %cst_70 [1] : vector<5x5xf32> to vector<5xf32>
    %166 = vector.shape_cast %165 : vector<5xf32> to vector<5x1xf32>
    %167 = vector.broadcast %166 : vector<5x1xf32> to vector<5x5xf32>
    %168 = arith.subf %164, %167 : vector<5x5xf32>
    %169 = math.exp %168 : vector<5x5xf32>
    %cst_71 = arith.constant dense<0.000000e+00> : vector<5xf32>
    %170 = vector.multi_reduction <add>, %169, %cst_71 [1] : vector<5x5xf32> to vector<5xf32>
    %171 = vector.shape_cast %170 : vector<5xf32> to vector<5x1xf32>
    %172 = tpu.reciprocal %171 {approx = true} : vector<5x1xf32> -> vector<5x1xf32>
    %173 = vector.broadcast %172 : vector<5x1xf32> to vector<5x5xf32>
    %174 = arith.mulf %169, %173 : vector<5x5xf32>
    %cst_72 = arith.constant dense<0.000000e+00> : vector<5x8xf32>
    %175 = tpu.matmul %174, %161, %cst_72 {dimension_numbers = #tpu.dot_dimension_numbers<[1], [0], [0], [1], [0, 0, 1, 1], [], []>} : vector<5x5xf32>, vector<5x8xf32>, vector<5x8xf32> -> vector<5x8xf32>
    %176 = vector.extract_strided_slice %124 {offsets = [0, 24], sizes = [5, 8], strides = [1, 1]} : vector<5x96xf32> to vector<5x8xf32>
    %177 = vector.extract_strided_slice %124 {offsets = [0, 56], sizes = [5, 8], strides = [1, 1]} : vector<5x96xf32> to vector<5x8xf32>
    %178 = vector.extract_strided_slice %124 {offsets = [0, 88], sizes = [5, 8], strides = [1, 1]} : vector<5x96xf32> to vector<5x8xf32>
    %cst_73 = arith.constant dense<0.000000e+00> : vector<5x5xf32>
    %179 = tpu.matmul %176, %177, %cst_73 {dimension_numbers = #tpu.dot_dimension_numbers<[1], [1], [0], [0], [0, 0, 1, 0], [], []>} : vector<5x8xf32>, vector<5x8xf32>, vector<5x5xf32> -> vector<5x5xf32>
    %cst_74 = arith.constant 0.353553385 : f32
    %180 = vector.broadcast %cst_74 : f32 to vector<5x5xf32>
    %181 = arith.mulf %179, %180 : vector<5x5xf32>
    %cst_75 = arith.constant dense<0xFF800000> : vector<5xf32>
    %182 = vector.multi_reduction <maximumf>, %181, %cst_75 [1] : vector<5x5xf32> to vector<5xf32>
    %183 = vector.shape_cast %182 : vector<5xf32> to vector<5x1xf32>
    %184 = vector.broadcast %183 : vector<5x1xf32> to vector<5x5xf32>
    %185 = arith.subf %181, %184 : vector<5x5xf32>
    %186 = math.exp %185 : vector<5x5xf32>
    %cst_76 = arith.constant dense<0.000000e+00> : vector<5xf32>
    %187 = vector.multi_reduction <add>, %186, %cst_76 [1] : vector<5x5xf32> to vector<5xf32>
    %188 = vector.shape_cast %187 : vector<5xf32> to vector<5x1xf32>
    %189 = tpu.reciprocal %188 {approx = true} : vector<5x1xf32> -> vector<5x1xf32>
    %190 = vector.broadcast %189 : vector<5x1xf32> to vector<5x5xf32>
    %191 = arith.mulf %186, %190 : vector<5x5xf32>
    %cst_77 = arith.constant dense<0.000000e+00> : vector<5x8xf32>
    %192 = tpu.matmul %191, %178, %cst_77 {dimension_numbers = #tpu.dot_dimension_numbers<[1], [0], [0], [1], [0, 0, 1, 1], [], []>} : vector<5x5xf32>, vector<5x8xf32>, vector<5x8xf32> -> vector<5x8xf32>
    %193 = tpu.concatenate %141, %158, %175, %192 in 1 : vector<5x8xf32>, vector<5x8xf32>, vector<5x8xf32>, vector<5x8xf32> -> vector<5x32xf32>
    %194 = tpu.concatenate %123, %193 in 0 : vector<5x32xf32>, vector<5x32xf32> -> vector<10x32xf32>
    %c0_78 = arith.constant 0 : index
    %c0_79 = arith.constant 0 : index
    %c0_80 = arith.constant 0 : index
    %c0_81 = arith.constant 0 : index
    %195 = vector.load %arg10[%c0_78, %c0_79, %c0_80, %c0_81] : memref<1x2x32x32xf32, #tpu.memory_space<vmem>>, vector<1x1x32x32xf32>
    %196 = vector.shape_cast %195 : vector<1x1x32x32xf32> to vector<32x32xf32>
    %cst_82 = arith.constant dense<0.000000e+00> : vector<10x32xf32>
    %197 = tpu.matmul %194, %196, %cst_82 {dimension_numbers = #tpu.dot_dimension_numbers<[1], [0], [0], [1], [0, 0, 1, 1], [], []>} : vector<10x32xf32>, vector<32x32xf32>, vector<10x32xf32> -> vector<10x32xf32>
    %198 = arith.addf %20, %197 : vector<10x32xf32>
    %c0_83 = arith.constant 0 : index
    %c0_84 = arith.constant 0 : index
    %c0_85 = arith.constant 0 : index
    %c0_86 = arith.constant 0 : index
    %199 = vector.load %arg11[%c0_83, %c0_84, %c0_85, %c0_86] : memref<1x2x1x32xf32, #tpu.memory_space<vmem>>, vector<1x1x1x32xf32>
    %200 = vector.shape_cast %199 : vector<1x1x1x32xf32> to vector<1x32xf32>
    %201 = vector.broadcast %200 : vector<1x32xf32> to vector<10x32xf32>
    %202 = arith.addf %198, %201 : vector<10x32xf32>
    %c0_87 = arith.constant 0 : index
    %c0_88 = arith.constant 0 : index
    %c0_89 = arith.constant 0 : index
    %c0_90 = arith.constant 0 : index
    %203 = vector.load %arg12[%c0_87, %c0_88, %c0_89, %c0_90] : memref<1x2x1x32xf32, #tpu.memory_space<vmem>>, vector<1x1x1x32xf32>
    %204 = vector.shape_cast %203 : vector<1x1x1x32xf32> to vector<1x32xf32>
    %c0_91 = arith.constant 0 : index
    %c0_92 = arith.constant 0 : index
    %c0_93 = arith.constant 0 : index
    %c0_94 = arith.constant 0 : index
    %205 = vector.load %arg13[%c0_91, %c0_92, %c0_93, %c0_94] : memref<1x2x1x32xf32, #tpu.memory_space<vmem>>, vector<1x1x1x32xf32>
    %206 = vector.shape_cast %205 : vector<1x1x1x32xf32> to vector<1x32xf32>
    %cst_95 = arith.constant dense<0.000000e+00> : vector<10xf32>
    %207 = vector.multi_reduction <add>, %202, %cst_95 [1] : vector<10x32xf32> to vector<10xf32>
    %208 = vector.shape_cast %207 : vector<10xf32> to vector<10x1xf32>
    %cst_96 = arith.constant 3.200000e+01 : f32
    %209 = vector.broadcast %cst_96 : f32 to vector<10x1xf32>
    %210 = arith.divf %208, %209 : vector<10x1xf32>
    %211 = vector.broadcast %210 : vector<10x1xf32> to vector<10x32xf32>
    %212 = arith.subf %202, %211 : vector<10x32xf32>
    %213 = arith.mulf %212, %212 : vector<10x32xf32>
    %cst_97 = arith.constant dense<0.000000e+00> : vector<10xf32>
    %214 = vector.multi_reduction <add>, %213, %cst_97 [1] : vector<10x32xf32> to vector<10xf32>
    %215 = vector.shape_cast %214 : vector<10xf32> to vector<10x1xf32>
    %cst_98 = arith.constant 3.200000e+01 : f32
    %216 = vector.broadcast %cst_98 : f32 to vector<10x1xf32>
    %217 = arith.divf %215, %216 : vector<10x1xf32>
    %218 = vector.broadcast %210 : vector<10x1xf32> to vector<10x32xf32>
    %219 = arith.subf %202, %218 : vector<10x32xf32>
    %cst_99 = arith.constant 9.99999997E-7 : f32
    %220 = vector.broadcast %cst_99 : f32 to vector<10x1xf32>
    %221 = arith.addf %217, %220 : vector<10x1xf32>
    %222 = math.rsqrt %221 : vector<10x1xf32>
    %223 = vector.broadcast %222 : vector<10x1xf32> to vector<10x32xf32>
    %224 = arith.mulf %219, %223 : vector<10x32xf32>
    %225 = vector.broadcast %204 : vector<1x32xf32> to vector<10x32xf32>
    %226 = arith.mulf %224, %225 : vector<10x32xf32>
    %227 = vector.broadcast %206 : vector<1x32xf32> to vector<10x32xf32>
    %228 = arith.addf %226, %227 : vector<10x32xf32>
    %c0_100 = arith.constant 0 : index
    %c0_101 = arith.constant 0 : index
    %c0_102 = arith.constant 0 : index
    %c0_103 = arith.constant 0 : index
    %229 = vector.load %arg14[%c0_100, %c0_101, %c0_102, %c0_103] : memref<1x2x32x128xf32, #tpu.memory_space<vmem>>, vector<1x1x32x128xf32>
    %230 = vector.shape_cast %229 : vector<1x1x32x128xf32> to vector<32x128xf32>
    %cst_104 = arith.constant dense<0.000000e+00> : vector<10x128xf32>
    %231 = tpu.matmul %228, %230, %cst_104 {dimension_numbers = #tpu.dot_dimension_numbers<[1], [0], [0], [1], [0, 0, 1, 1], [], []>} : vector<10x32xf32>, vector<32x128xf32>, vector<10x128xf32> -> vector<10x128xf32>
    %c0_105 = arith.constant 0 : index
    %c0_106 = arith.constant 0 : index
    %c0_107 = arith.constant 0 : index
    %c0_108 = arith.constant 0 : index
    %232 = vector.load %arg15[%c0_105, %c0_106, %c0_107, %c0_108] : memref<1x2x1x128xf32, #tpu.memory_space<vmem>>, vector<1x1x1x128xf32>
    %233 = vector.shape_cast %232 : vector<1x1x1x128xf32> to vector<1x128xf32>
    %234 = vector.broadcast %233 : vector<1x128xf32> to vector<10x128xf32>
    %235 = arith.addf %231, %234 : vector<10x128xf32>
    %cst_109 = arith.constant 5.000000e-01 : f32
    %236 = vector.broadcast %cst_109 : f32 to vector<10x128xf32>
    %237 = arith.mulf %236, %235 : vector<10x128xf32>
    %cst_110 = arith.constant 4.471500e-02 : f32
    %238 = vector.broadcast %cst_110 : f32 to vector<10x128xf32>
    %239 = arith.mulf %238, %235 : vector<10x128xf32>
    %240 = arith.mulf %239, %235 : vector<10x128xf32>
    %241 = arith.mulf %240, %235 : vector<10x128xf32>
    %242 = arith.addf %235, %241 : vector<10x128xf32>
    %cst_111 = arith.constant 0.797884583 : f32
    %243 = vector.broadcast %cst_111 : f32 to vector<10x128xf32>
    %244 = arith.mulf %243, %242 : vector<10x128xf32>
    %245 = math.tanh %244 : vector<10x128xf32>
    %cst_112 = arith.constant 1.000000e+00 : f32
    %246 = vector.broadcast %cst_112 : f32 to vector<10x128xf32>
    %247 = arith.addf %246, %245 : vector<10x128xf32>
    %248 = arith.mulf %237, %247 : vector<10x128xf32>
    %c0_113 = arith.constant 0 : index
    %c0_114 = arith.constant 0 : index
    %c0_115 = arith.constant 0 : index
    %c0_116 = arith.constant 0 : index
    %249 = vector.load %arg16[%c0_113, %c0_114, %c0_115, %c0_116] : memref<1x2x128x32xf32, #tpu.memory_space<vmem>>, vector<1x1x128x32xf32>
    %250 = vector.shape_cast %249 : vector<1x1x128x32xf32> to vector<128x32xf32>
    %cst_117 = arith.constant dense<0.000000e+00> : vector<10x32xf32>
    %251 = tpu.matmul %248, %250, %cst_117 {dimension_numbers = #tpu.dot_dimension_numbers<[1], [0], [0], [1], [0, 0, 1, 1], [], []>} : vector<10x128xf32>, vector<128x32xf32>, vector<10x32xf32> -> vector<10x32xf32>
    %252 = arith.addf %202, %251 : vector<10x32xf32>
    %c0_118 = arith.constant 0 : index
    %c0_119 = arith.constant 0 : index
    %c0_120 = arith.constant 0 : index
    %c0_121 = arith.constant 0 : index
    %253 = vector.load %arg17[%c0_118, %c0_119, %c0_120, %c0_121] : memref<1x2x1x32xf32, #tpu.memory_space<vmem>>, vector<1x1x1x32xf32>
    %254 = vector.shape_cast %253 : vector<1x1x1x32xf32> to vector<1x32xf32>
    %255 = vector.broadcast %254 : vector<1x32xf32> to vector<10x32xf32>
    %256 = arith.addf %252, %255 : vector<10x32xf32>
    %c0_122 = arith.constant 0 : index
    %c1_123 = arith.constant 1 : index
    %c0_124 = arith.constant 0 : index
    %c0_125 = arith.constant 0 : index
    %257 = vector.load %arg6[%c0_122, %c1_123, %c0_124, %c0_125] : memref<1x2x1x32xf32, #tpu.memory_space<vmem>>, vector<1x1x1x32xf32>
    %258 = vector.shape_cast %257 : vector<1x1x1x32xf32> to vector<1x32xf32>
    %c0_126 = arith.constant 0 : index
    %c1_127 = arith.constant 1 : index
    %c0_128 = arith.constant 0 : index
    %c0_129 = arith.constant 0 : index
    %259 = vector.load %arg7[%c0_126, %c1_127, %c0_128, %c0_129] : memref<1x2x1x32xf32, #tpu.memory_space<vmem>>, vector<1x1x1x32xf32>
    %260 = vector.shape_cast %259 : vector<1x1x1x32xf32> to vector<1x32xf32>
    %cst_130 = arith.constant dense<0.000000e+00> : vector<10xf32>
    %261 = vector.multi_reduction <add>, %256, %cst_130 [1] : vector<10x32xf32> to vector<10xf32>
    %262 = vector.shape_cast %261 : vector<10xf32> to vector<10x1xf32>
    %cst_131 = arith.constant 3.200000e+01 : f32
    %263 = vector.broadcast %cst_131 : f32 to vector<10x1xf32>
    %264 = arith.divf %262, %263 : vector<10x1xf32>
    %265 = vector.broadcast %264 : vector<10x1xf32> to vector<10x32xf32>
    %266 = arith.subf %256, %265 : vector<10x32xf32>
    %267 = arith.mulf %266, %266 : vector<10x32xf32>
    %cst_132 = arith.constant dense<0.000000e+00> : vector<10xf32>
    %268 = vector.multi_reduction <add>, %267, %cst_132 [1] : vector<10x32xf32> to vector<10xf32>
    %269 = vector.shape_cast %268 : vector<10xf32> to vector<10x1xf32>
    %cst_133 = arith.constant 3.200000e+01 : f32
    %270 = vector.broadcast %cst_133 : f32 to vector<10x1xf32>
    %271 = arith.divf %269, %270 : vector<10x1xf32>
    %272 = vector.broadcast %264 : vector<10x1xf32> to vector<10x32xf32>
    %273 = arith.subf %256, %272 : vector<10x32xf32>
    %cst_134 = arith.constant 9.99999997E-7 : f32
    %274 = vector.broadcast %cst_134 : f32 to vector<10x1xf32>
    %275 = arith.addf %271, %274 : vector<10x1xf32>
    %276 = math.rsqrt %275 : vector<10x1xf32>
    %277 = vector.broadcast %276 : vector<10x1xf32> to vector<10x32xf32>
    %278 = arith.mulf %273, %277 : vector<10x32xf32>
    %279 = vector.broadcast %258 : vector<1x32xf32> to vector<10x32xf32>
    %280 = arith.mulf %278, %279 : vector<10x32xf32>
    %281 = vector.broadcast %260 : vector<1x32xf32> to vector<10x32xf32>
    %282 = arith.addf %280, %281 : vector<10x32xf32>
    %c0_135 = arith.constant 0 : index
    %c1_136 = arith.constant 1 : index
    %c0_137 = arith.constant 0 : index
    %c0_138 = arith.constant 0 : index
    %283 = vector.load %arg8[%c0_135, %c1_136, %c0_137, %c0_138] : memref<1x2x32x96xf32, #tpu.memory_space<vmem>>, vector<1x1x32x96xf32>
    %284 = vector.shape_cast %283 : vector<1x1x32x96xf32> to vector<32x96xf32>
    %cst_139 = arith.constant dense<0.000000e+00> : vector<10x96xf32>
    %285 = tpu.matmul %282, %284, %cst_139 {dimension_numbers = #tpu.dot_dimension_numbers<[1], [0], [0], [1], [0, 0, 1, 1], [], []>} : vector<10x32xf32>, vector<32x96xf32>, vector<10x96xf32> -> vector<10x96xf32>
    %c0_140 = arith.constant 0 : index
    %c1_141 = arith.constant 1 : index
    %c0_142 = arith.constant 0 : index
    %c0_143 = arith.constant 0 : index
    %286 = vector.load %arg9[%c0_140, %c1_141, %c0_142, %c0_143] : memref<1x2x1x96xf32, #tpu.memory_space<vmem>>, vector<1x1x1x96xf32>
    %287 = vector.shape_cast %286 : vector<1x1x1x96xf32> to vector<1x96xf32>
    %288 = vector.broadcast %287 : vector<1x96xf32> to vector<10x96xf32>
    %289 = arith.addf %285, %288 : vector<10x96xf32>
    %290 = vector.extract_strided_slice %289 {offsets = [0, 0], sizes = [5, 96], strides = [1, 1]} : vector<10x96xf32> to vector<5x96xf32>
    %291 = vector.extract_strided_slice %290 {offsets = [0, 0], sizes = [5, 8], strides = [1, 1]} : vector<5x96xf32> to vector<5x8xf32>
    %292 = vector.extract_strided_slice %290 {offsets = [0, 32], sizes = [5, 8], strides = [1, 1]} : vector<5x96xf32> to vector<5x8xf32>
    %293 = vector.extract_strided_slice %290 {offsets = [0, 64], sizes = [5, 8], strides = [1, 1]} : vector<5x96xf32> to vector<5x8xf32>
    %cst_144 = arith.constant dense<0.000000e+00> : vector<5x5xf32>
    %294 = tpu.matmul %291, %292, %cst_144 {dimension_numbers = #tpu.dot_dimension_numbers<[1], [1], [0], [0], [0, 0, 1, 0], [], []>} : vector<5x8xf32>, vector<5x8xf32>, vector<5x5xf32> -> vector<5x5xf32>
    %cst_145 = arith.constant 0.353553385 : f32
    %295 = vector.broadcast %cst_145 : f32 to vector<5x5xf32>
    %296 = arith.mulf %294, %295 : vector<5x5xf32>
    %cst_146 = arith.constant dense<0xFF800000> : vector<5xf32>
    %297 = vector.multi_reduction <maximumf>, %296, %cst_146 [1] : vector<5x5xf32> to vector<5xf32>
    %298 = vector.shape_cast %297 : vector<5xf32> to vector<5x1xf32>
    %299 = vector.broadcast %298 : vector<5x1xf32> to vector<5x5xf32>
    %300 = arith.subf %296, %299 : vector<5x5xf32>
    %301 = math.exp %300 : vector<5x5xf32>
    %cst_147 = arith.constant dense<0.000000e+00> : vector<5xf32>
    %302 = vector.multi_reduction <add>, %301, %cst_147 [1] : vector<5x5xf32> to vector<5xf32>
    %303 = vector.shape_cast %302 : vector<5xf32> to vector<5x1xf32>
    %304 = tpu.reciprocal %303 {approx = true} : vector<5x1xf32> -> vector<5x1xf32>
    %305 = vector.broadcast %304 : vector<5x1xf32> to vector<5x5xf32>
    %306 = arith.mulf %301, %305 : vector<5x5xf32>
    %cst_148 = arith.constant dense<0.000000e+00> : vector<5x8xf32>
    %307 = tpu.matmul %306, %293, %cst_148 {dimension_numbers = #tpu.dot_dimension_numbers<[1], [0], [0], [1], [0, 0, 1, 1], [], []>} : vector<5x5xf32>, vector<5x8xf32>, vector<5x8xf32> -> vector<5x8xf32>
    %308 = vector.extract_strided_slice %290 {offsets = [0, 8], sizes = [5, 8], strides = [1, 1]} : vector<5x96xf32> to vector<5x8xf32>
    %309 = vector.extract_strided_slice %290 {offsets = [0, 40], sizes = [5, 8], strides = [1, 1]} : vector<5x96xf32> to vector<5x8xf32>
    %310 = vector.extract_strided_slice %290 {offsets = [0, 72], sizes = [5, 8], strides = [1, 1]} : vector<5x96xf32> to vector<5x8xf32>
    %cst_149 = arith.constant dense<0.000000e+00> : vector<5x5xf32>
    %311 = tpu.matmul %308, %309, %cst_149 {dimension_numbers = #tpu.dot_dimension_numbers<[1], [1], [0], [0], [0, 0, 1, 0], [], []>} : vector<5x8xf32>, vector<5x8xf32>, vector<5x5xf32> -> vector<5x5xf32>
    %cst_150 = arith.constant 0.353553385 : f32
    %312 = vector.broadcast %cst_150 : f32 to vector<5x5xf32>
    %313 = arith.mulf %311, %312 : vector<5x5xf32>
    %cst_151 = arith.constant dense<0xFF800000> : vector<5xf32>
    %314 = vector.multi_reduction <maximumf>, %313, %cst_151 [1] : vector<5x5xf32> to vector<5xf32>
    %315 = vector.shape_cast %314 : vector<5xf32> to vector<5x1xf32>
    %316 = vector.broadcast %315 : vector<5x1xf32> to vector<5x5xf32>
    %317 = arith.subf %313, %316 : vector<5x5xf32>
    %318 = math.exp %317 : vector<5x5xf32>
    %cst_152 = arith.constant dense<0.000000e+00> : vector<5xf32>
    %319 = vector.multi_reduction <add>, %318, %cst_152 [1] : vector<5x5xf32> to vector<5xf32>
    %320 = vector.shape_cast %319 : vector<5xf32> to vector<5x1xf32>
    %321 = tpu.reciprocal %320 {approx = true} : vector<5x1xf32> -> vector<5x1xf32>
    %322 = vector.broadcast %321 : vector<5x1xf32> to vector<5x5xf32>
    %323 = arith.mulf %318, %322 : vector<5x5xf32>
    %cst_153 = arith.constant dense<0.000000e+00> : vector<5x8xf32>
    %324 = tpu.matmul %323, %310, %cst_153 {dimension_numbers = #tpu.dot_dimension_numbers<[1], [0], [0], [1], [0, 0, 1, 1], [], []>} : vector<5x5xf32>, vector<5x8xf32>, vector<5x8xf32> -> vector<5x8xf32>
    %325 = vector.extract_strided_slice %290 {offsets = [0, 16], sizes = [5, 8], strides = [1, 1]} : vector<5x96xf32> to vector<5x8xf32>
    %326 = vector.extract_strided_slice %290 {offsets = [0, 48], sizes = [5, 8], strides = [1, 1]} : vector<5x96xf32> to vector<5x8xf32>
    %327 = vector.extract_strided_slice %290 {offsets = [0, 80], sizes = [5, 8], strides = [1, 1]} : vector<5x96xf32> to vector<5x8xf32>
    %cst_154 = arith.constant dense<0.000000e+00> : vector<5x5xf32>
    %328 = tpu.matmul %325, %326, %cst_154 {dimension_numbers = #tpu.dot_dimension_numbers<[1], [1], [0], [0], [0, 0, 1, 0], [], []>} : vector<5x8xf32>, vector<5x8xf32>, vector<5x5xf32> -> vector<5x5xf32>
    %cst_155 = arith.constant 0.353553385 : f32
    %329 = vector.broadcast %cst_155 : f32 to vector<5x5xf32>
    %330 = arith.mulf %328, %329 : vector<5x5xf32>
    %cst_156 = arith.constant dense<0xFF800000> : vector<5xf32>
    %331 = vector.multi_reduction <maximumf>, %330, %cst_156 [1] : vector<5x5xf32> to vector<5xf32>
    %332 = vector.shape_cast %331 : vector<5xf32> to vector<5x1xf32>
    %333 = vector.broadcast %332 : vector<5x1xf32> to vector<5x5xf32>
    %334 = arith.subf %330, %333 : vector<5x5xf32>
    %335 = math.exp %334 : vector<5x5xf32>
    %cst_157 = arith.constant dense<0.000000e+00> : vector<5xf32>
    %336 = vector.multi_reduction <add>, %335, %cst_157 [1] : vector<5x5xf32> to vector<5xf32>
    %337 = vector.shape_cast %336 : vector<5xf32> to vector<5x1xf32>
    %338 = tpu.reciprocal %337 {approx = true} : vector<5x1xf32> -> vector<5x1xf32>
    %339 = vector.broadcast %338 : vector<5x1xf32> to vector<5x5xf32>
    %340 = arith.mulf %335, %339 : vector<5x5xf32>
    %cst_158 = arith.constant dense<0.000000e+00> : vector<5x8xf32>
    %341 = tpu.matmul %340, %327, %cst_158 {dimension_numbers = #tpu.dot_dimension_numbers<[1], [0], [0], [1], [0, 0, 1, 1], [], []>} : vector<5x5xf32>, vector<5x8xf32>, vector<5x8xf32> -> vector<5x8xf32>
    %342 = vector.extract_strided_slice %290 {offsets = [0, 24], sizes = [5, 8], strides = [1, 1]} : vector<5x96xf32> to vector<5x8xf32>
    %343 = vector.extract_strided_slice %290 {offsets = [0, 56], sizes = [5, 8], strides = [1, 1]} : vector<5x96xf32> to vector<5x8xf32>
    %344 = vector.extract_strided_slice %290 {offsets = [0, 88], sizes = [5, 8], strides = [1, 1]} : vector<5x96xf32> to vector<5x8xf32>
    %cst_159 = arith.constant dense<0.000000e+00> : vector<5x5xf32>
    %345 = tpu.matmul %342, %343, %cst_159 {dimension_numbers = #tpu.dot_dimension_numbers<[1], [1], [0], [0], [0, 0, 1, 0], [], []>} : vector<5x8xf32>, vector<5x8xf32>, vector<5x5xf32> -> vector<5x5xf32>
    %cst_160 = arith.constant 0.353553385 : f32
    %346 = vector.broadcast %cst_160 : f32 to vector<5x5xf32>
    %347 = arith.mulf %345, %346 : vector<5x5xf32>
    %cst_161 = arith.constant dense<0xFF800000> : vector<5xf32>
    %348 = vector.multi_reduction <maximumf>, %347, %cst_161 [1] : vector<5x5xf32> to vector<5xf32>
    %349 = vector.shape_cast %348 : vector<5xf32> to vector<5x1xf32>
    %350 = vector.broadcast %349 : vector<5x1xf32> to vector<5x5xf32>
    %351 = arith.subf %347, %350 : vector<5x5xf32>
    %352 = math.exp %351 : vector<5x5xf32>
    %cst_162 = arith.constant dense<0.000000e+00> : vector<5xf32>
    %353 = vector.multi_reduction <add>, %352, %cst_162 [1] : vector<5x5xf32> to vector<5xf32>
    %354 = vector.shape_cast %353 : vector<5xf32> to vector<5x1xf32>
    %355 = tpu.reciprocal %354 {approx = true} : vector<5x1xf32> -> vector<5x1xf32>
    %356 = vector.broadcast %355 : vector<5x1xf32> to vector<5x5xf32>
    %357 = arith.mulf %352, %356 : vector<5x5xf32>
    %cst_163 = arith.constant dense<0.000000e+00> : vector<5x8xf32>
    %358 = tpu.matmul %357, %344, %cst_163 {dimension_numbers = #tpu.dot_dimension_numbers<[1], [0], [0], [1], [0, 0, 1, 1], [], []>} : vector<5x5xf32>, vector<5x8xf32>, vector<5x8xf32> -> vector<5x8xf32>
    %359 = tpu.concatenate %307, %324, %341, %358 in 1 : vector<5x8xf32>, vector<5x8xf32>, vector<5x8xf32>, vector<5x8xf32> -> vector<5x32xf32>
    %360 = vector.extract_strided_slice %289 {offsets = [5, 0], sizes = [5, 96], strides = [1, 1]} : vector<10x96xf32> to vector<5x96xf32>
    %361 = vector.extract_strided_slice %360 {offsets = [0, 0], sizes = [5, 8], strides = [1, 1]} : vector<5x96xf32> to vector<5x8xf32>
    %362 = vector.extract_strided_slice %360 {offsets = [0, 32], sizes = [5, 8], strides = [1, 1]} : vector<5x96xf32> to vector<5x8xf32>
    %363 = vector.extract_strided_slice %360 {offsets = [0, 64], sizes = [5, 8], strides = [1, 1]} : vector<5x96xf32> to vector<5x8xf32>
    %cst_164 = arith.constant dense<0.000000e+00> : vector<5x5xf32>
    %364 = tpu.matmul %361, %362, %cst_164 {dimension_numbers = #tpu.dot_dimension_numbers<[1], [1], [0], [0], [0, 0, 1, 0], [], []>} : vector<5x8xf32>, vector<5x8xf32>, vector<5x5xf32> -> vector<5x5xf32>
    %cst_165 = arith.constant 0.353553385 : f32
    %365 = vector.broadcast %cst_165 : f32 to vector<5x5xf32>
    %366 = arith.mulf %364, %365 : vector<5x5xf32>
    %cst_166 = arith.constant dense<0xFF800000> : vector<5xf32>
    %367 = vector.multi_reduction <maximumf>, %366, %cst_166 [1] : vector<5x5xf32> to vector<5xf32>
    %368 = vector.shape_cast %367 : vector<5xf32> to vector<5x1xf32>
    %369 = vector.broadcast %368 : vector<5x1xf32> to vector<5x5xf32>
    %370 = arith.subf %366, %369 : vector<5x5xf32>
    %371 = math.exp %370 : vector<5x5xf32>
    %cst_167 = arith.constant dense<0.000000e+00> : vector<5xf32>
    %372 = vector.multi_reduction <add>, %371, %cst_167 [1] : vector<5x5xf32> to vector<5xf32>
    %373 = vector.shape_cast %372 : vector<5xf32> to vector<5x1xf32>
    %374 = tpu.reciprocal %373 {approx = true} : vector<5x1xf32> -> vector<5x1xf32>
    %375 = vector.broadcast %374 : vector<5x1xf32> to vector<5x5xf32>
    %376 = arith.mulf %371, %375 : vector<5x5xf32>
    %cst_168 = arith.constant dense<0.000000e+00> : vector<5x8xf32>
    %377 = tpu.matmul %376, %363, %cst_168 {dimension_numbers = #tpu.dot_dimension_numbers<[1], [0], [0], [1], [0, 0, 1, 1], [], []>} : vector<5x5xf32>, vector<5x8xf32>, vector<5x8xf32> -> vector<5x8xf32>
    %378 = vector.extract_strided_slice %360 {offsets = [0, 8], sizes = [5, 8], strides = [1, 1]} : vector<5x96xf32> to vector<5x8xf32>
    %379 = vector.extract_strided_slice %360 {offsets = [0, 40], sizes = [5, 8], strides = [1, 1]} : vector<5x96xf32> to vector<5x8xf32>
    %380 = vector.extract_strided_slice %360 {offsets = [0, 72], sizes = [5, 8], strides = [1, 1]} : vector<5x96xf32> to vector<5x8xf32>
    %cst_169 = arith.constant dense<0.000000e+00> : vector<5x5xf32>
    %381 = tpu.matmul %378, %379, %cst_169 {dimension_numbers = #tpu.dot_dimension_numbers<[1], [1], [0], [0], [0, 0, 1, 0], [], []>} : vector<5x8xf32>, vector<5x8xf32>, vector<5x5xf32> -> vector<5x5xf32>
    %cst_170 = arith.constant 0.353553385 : f32
    %382 = vector.broadcast %cst_170 : f32 to vector<5x5xf32>
    %383 = arith.mulf %381, %382 : vector<5x5xf32>
    %cst_171 = arith.constant dense<0xFF800000> : vector<5xf32>
    %384 = vector.multi_reduction <maximumf>, %383, %cst_171 [1] : vector<5x5xf32> to vector<5xf32>
    %385 = vector.shape_cast %384 : vector<5xf32> to vector<5x1xf32>
    %386 = vector.broadcast %385 : vector<5x1xf32> to vector<5x5xf32>
    %387 = arith.subf %383, %386 : vector<5x5xf32>
    %388 = math.exp %387 : vector<5x5xf32>
    %cst_172 = arith.constant dense<0.000000e+00> : vector<5xf32>
    %389 = vector.multi_reduction <add>, %388, %cst_172 [1] : vector<5x5xf32> to vector<5xf32>
    %390 = vector.shape_cast %389 : vector<5xf32> to vector<5x1xf32>
    %391 = tpu.reciprocal %390 {approx = true} : vector<5x1xf32> -> vector<5x1xf32>
    %392 = vector.broadcast %391 : vector<5x1xf32> to vector<5x5xf32>
    %393 = arith.mulf %388, %392 : vector<5x5xf32>
    %cst_173 = arith.constant dense<0.000000e+00> : vector<5x8xf32>
    %394 = tpu.matmul %393, %380, %cst_173 {dimension_numbers = #tpu.dot_dimension_numbers<[1], [0], [0], [1], [0, 0, 1, 1], [], []>} : vector<5x5xf32>, vector<5x8xf32>, vector<5x8xf32> -> vector<5x8xf32>
    %395 = vector.extract_strided_slice %360 {offsets = [0, 16], sizes = [5, 8], strides = [1, 1]} : vector<5x96xf32> to vector<5x8xf32>
    %396 = vector.extract_strided_slice %360 {offsets = [0, 48], sizes = [5, 8], strides = [1, 1]} : vector<5x96xf32> to vector<5x8xf32>
    %397 = vector.extract_strided_slice %360 {offsets = [0, 80], sizes = [5, 8], strides = [1, 1]} : vector<5x96xf32> to vector<5x8xf32>
    %cst_174 = arith.constant dense<0.000000e+00> : vector<5x5xf32>
    %398 = tpu.matmul %395, %396, %cst_174 {dimension_numbers = #tpu.dot_dimension_numbers<[1], [1], [0], [0], [0, 0, 1, 0], [], []>} : vector<5x8xf32>, vector<5x8xf32>, vector<5x5xf32> -> vector<5x5xf32>
    %cst_175 = arith.constant 0.353553385 : f32
    %399 = vector.broadcast %cst_175 : f32 to vector<5x5xf32>
    %400 = arith.mulf %398, %399 : vector<5x5xf32>
    %cst_176 = arith.constant dense<0xFF800000> : vector<5xf32>
    %401 = vector.multi_reduction <maximumf>, %400, %cst_176 [1] : vector<5x5xf32> to vector<5xf32>
    %402 = vector.shape_cast %401 : vector<5xf32> to vector<5x1xf32>
    %403 = vector.broadcast %402 : vector<5x1xf32> to vector<5x5xf32>
    %404 = arith.subf %400, %403 : vector<5x5xf32>
    %405 = math.exp %404 : vector<5x5xf32>
    %cst_177 = arith.constant dense<0.000000e+00> : vector<5xf32>
    %406 = vector.multi_reduction <add>, %405, %cst_177 [1] : vector<5x5xf32> to vector<5xf32>
    %407 = vector.shape_cast %406 : vector<5xf32> to vector<5x1xf32>
    %408 = tpu.reciprocal %407 {approx = true} : vector<5x1xf32> -> vector<5x1xf32>
    %409 = vector.broadcast %408 : vector<5x1xf32> to vector<5x5xf32>
    %410 = arith.mulf %405, %409 : vector<5x5xf32>
    %cst_178 = arith.constant dense<0.000000e+00> : vector<5x8xf32>
    %411 = tpu.matmul %410, %397, %cst_178 {dimension_numbers = #tpu.dot_dimension_numbers<[1], [0], [0], [1], [0, 0, 1, 1], [], []>} : vector<5x5xf32>, vector<5x8xf32>, vector<5x8xf32> -> vector<5x8xf32>
    %412 = vector.extract_strided_slice %360 {offsets = [0, 24], sizes = [5, 8], strides = [1, 1]} : vector<5x96xf32> to vector<5x8xf32>
    %413 = vector.extract_strided_slice %360 {offsets = [0, 56], sizes = [5, 8], strides = [1, 1]} : vector<5x96xf32> to vector<5x8xf32>
    %414 = vector.extract_strided_slice %360 {offsets = [0, 88], sizes = [5, 8], strides = [1, 1]} : vector<5x96xf32> to vector<5x8xf32>
    %cst_179 = arith.constant dense<0.000000e+00> : vector<5x5xf32>
    %415 = tpu.matmul %412, %413, %cst_179 {dimension_numbers = #tpu.dot_dimension_numbers<[1], [1], [0], [0], [0, 0, 1, 0], [], []>} : vector<5x8xf32>, vector<5x8xf32>, vector<5x5xf32> -> vector<5x5xf32>
    %cst_180 = arith.constant 0.353553385 : f32
    %416 = vector.broadcast %cst_180 : f32 to vector<5x5xf32>
    %417 = arith.mulf %415, %416 : vector<5x5xf32>
    %cst_181 = arith.constant dense<0xFF800000> : vector<5xf32>
    %418 = vector.multi_reduction <maximumf>, %417, %cst_181 [1] : vector<5x5xf32> to vector<5xf32>
    %419 = vector.shape_cast %418 : vector<5xf32> to vector<5x1xf32>
    %420 = vector.broadcast %419 : vector<5x1xf32> to vector<5x5xf32>
    %421 = arith.subf %417, %420 : vector<5x5xf32>
    %422 = math.exp %421 : vector<5x5xf32>
    %cst_182 = arith.constant dense<0.000000e+00> : vector<5xf32>
    %423 = vector.multi_reduction <add>, %422, %cst_182 [1] : vector<5x5xf32> to vector<5xf32>
    %424 = vector.shape_cast %423 : vector<5xf32> to vector<5x1xf32>
    %425 = tpu.reciprocal %424 {approx = true} : vector<5x1xf32> -> vector<5x1xf32>
    %426 = vector.broadcast %425 : vector<5x1xf32> to vector<5x5xf32>
    %427 = arith.mulf %422, %426 : vector<5x5xf32>
    %cst_183 = arith.constant dense<0.000000e+00> : vector<5x8xf32>
    %428 = tpu.matmul %427, %414, %cst_183 {dimension_numbers = #tpu.dot_dimension_numbers<[1], [0], [0], [1], [0, 0, 1, 1], [], []>} : vector<5x5xf32>, vector<5x8xf32>, vector<5x8xf32> -> vector<5x8xf32>
    %429 = tpu.concatenate %377, %394, %411, %428 in 1 : vector<5x8xf32>, vector<5x8xf32>, vector<5x8xf32>, vector<5x8xf32> -> vector<5x32xf32>
    %430 = tpu.concatenate %359, %429 in 0 : vector<5x32xf32>, vector<5x32xf32> -> vector<10x32xf32>
    %c0_184 = arith.constant 0 : index
    %c1_185 = arith.constant 1 : index
    %c0_186 = arith.constant 0 : index
    %c0_187 = arith.constant 0 : index
    %431 = vector.load %arg10[%c0_184, %c1_185, %c0_186, %c0_187] : memref<1x2x32x32xf32, #tpu.memory_space<vmem>>, vector<1x1x32x32xf32>
    %432 = vector.shape_cast %431 : vector<1x1x32x32xf32> to vector<32x32xf32>
    %cst_188 = arith.constant dense<0.000000e+00> : vector<10x32xf32>
    %433 = tpu.matmul %430, %432, %cst_188 {dimension_numbers = #tpu.dot_dimension_numbers<[1], [0], [0], [1], [0, 0, 1, 1], [], []>} : vector<10x32xf32>, vector<32x32xf32>, vector<10x32xf32> -> vector<10x32xf32>
    %434 = arith.addf %256, %433 : vector<10x32xf32>
    %c0_189 = arith.constant 0 : index
    %c1_190 = arith.constant 1 : index
    %c0_191 = arith.constant 0 : index
    %c0_192 = arith.constant 0 : index
    %435 = vector.load %arg11[%c0_189, %c1_190, %c0_191, %c0_192] : memref<1x2x1x32xf32, #tpu.memory_space<vmem>>, vector<1x1x1x32xf32>
    %436 = vector.shape_cast %435 : vector<1x1x1x32xf32> to vector<1x32xf32>
    %437 = vector.broadcast %436 : vector<1x32xf32> to vector<10x32xf32>
    %438 = arith.addf %434, %437 : vector<10x32xf32>
    %c0_193 = arith.constant 0 : index
    %c1_194 = arith.constant 1 : index
    %c0_195 = arith.constant 0 : index
    %c0_196 = arith.constant 0 : index
    %439 = vector.load %arg12[%c0_193, %c1_194, %c0_195, %c0_196] : memref<1x2x1x32xf32, #tpu.memory_space<vmem>>, vector<1x1x1x32xf32>
    %440 = vector.shape_cast %439 : vector<1x1x1x32xf32> to vector<1x32xf32>
    %c0_197 = arith.constant 0 : index
    %c1_198 = arith.constant 1 : index
    %c0_199 = arith.constant 0 : index
    %c0_200 = arith.constant 0 : index
    %441 = vector.load %arg13[%c0_197, %c1_198, %c0_199, %c0_200] : memref<1x2x1x32xf32, #tpu.memory_space<vmem>>, vector<1x1x1x32xf32>
    %442 = vector.shape_cast %441 : vector<1x1x1x32xf32> to vector<1x32xf32>
    %cst_201 = arith.constant dense<0.000000e+00> : vector<10xf32>
    %443 = vector.multi_reduction <add>, %438, %cst_201 [1] : vector<10x32xf32> to vector<10xf32>
    %444 = vector.shape_cast %443 : vector<10xf32> to vector<10x1xf32>
    %cst_202 = arith.constant 3.200000e+01 : f32
    %445 = vector.broadcast %cst_202 : f32 to vector<10x1xf32>
    %446 = arith.divf %444, %445 : vector<10x1xf32>
    %447 = vector.broadcast %446 : vector<10x1xf32> to vector<10x32xf32>
    %448 = arith.subf %438, %447 : vector<10x32xf32>
    %449 = arith.mulf %448, %448 : vector<10x32xf32>
    %cst_203 = arith.constant dense<0.000000e+00> : vector<10xf32>
    %450 = vector.multi_reduction <add>, %449, %cst_203 [1] : vector<10x32xf32> to vector<10xf32>
    %451 = vector.shape_cast %450 : vector<10xf32> to vector<10x1xf32>
    %cst_204 = arith.constant 3.200000e+01 : f32
    %452 = vector.broadcast %cst_204 : f32 to vector<10x1xf32>
    %453 = arith.divf %451, %452 : vector<10x1xf32>
    %454 = vector.broadcast %446 : vector<10x1xf32> to vector<10x32xf32>
    %455 = arith.subf %438, %454 : vector<10x32xf32>
    %cst_205 = arith.constant 9.99999997E-7 : f32
    %456 = vector.broadcast %cst_205 : f32 to vector<10x1xf32>
    %457 = arith.addf %453, %456 : vector<10x1xf32>
    %458 = math.rsqrt %457 : vector<10x1xf32>
    %459 = vector.broadcast %458 : vector<10x1xf32> to vector<10x32xf32>
    %460 = arith.mulf %455, %459 : vector<10x32xf32>
    %461 = vector.broadcast %440 : vector<1x32xf32> to vector<10x32xf32>
    %462 = arith.mulf %460, %461 : vector<10x32xf32>
    %463 = vector.broadcast %442 : vector<1x32xf32> to vector<10x32xf32>
    %464 = arith.addf %462, %463 : vector<10x32xf32>
    %c0_206 = arith.constant 0 : index
    %c1_207 = arith.constant 1 : index
    %c0_208 = arith.constant 0 : index
    %c0_209 = arith.constant 0 : index
    %465 = vector.load %arg14[%c0_206, %c1_207, %c0_208, %c0_209] : memref<1x2x32x128xf32, #tpu.memory_space<vmem>>, vector<1x1x32x128xf32>
    %466 = vector.shape_cast %465 : vector<1x1x32x128xf32> to vector<32x128xf32>
    %cst_210 = arith.constant dense<0.000000e+00> : vector<10x128xf32>
    %467 = tpu.matmul %464, %466, %cst_210 {dimension_numbers = #tpu.dot_dimension_numbers<[1], [0], [0], [1], [0, 0, 1, 1], [], []>} : vector<10x32xf32>, vector<32x128xf32>, vector<10x128xf32> -> vector<10x128xf32>
    %c0_211 = arith.constant 0 : index
    %c1_212 = arith.constant 1 : index
    %c0_213 = arith.constant 0 : index
    %c0_214 = arith.constant 0 : index
    %468 = vector.load %arg15[%c0_211, %c1_212, %c0_213, %c0_214] : memref<1x2x1x128xf32, #tpu.memory_space<vmem>>, vector<1x1x1x128xf32>
    %469 = vector.shape_cast %468 : vector<1x1x1x128xf32> to vector<1x128xf32>
    %470 = vector.broadcast %469 : vector<1x128xf32> to vector<10x128xf32>
    %471 = arith.addf %467, %470 : vector<10x128xf32>
    %cst_215 = arith.constant 5.000000e-01 : f32
    %472 = vector.broadcast %cst_215 : f32 to vector<10x128xf32>
    %473 = arith.mulf %472, %471 : vector<10x128xf32>
    %cst_216 = arith.constant 4.471500e-02 : f32
    %474 = vector.broadcast %cst_216 : f32 to vector<10x128xf32>
    %475 = arith.mulf %474, %471 : vector<10x128xf32>
    %476 = arith.mulf %475, %471 : vector<10x128xf32>
    %477 = arith.mulf %476, %471 : vector<10x128xf32>
    %478 = arith.addf %471, %477 : vector<10x128xf32>
    %cst_217 = arith.constant 0.797884583 : f32
    %479 = vector.broadcast %cst_217 : f32 to vector<10x128xf32>
    %480 = arith.mulf %479, %478 : vector<10x128xf32>
    %481 = math.tanh %480 : vector<10x128xf32>
    %cst_218 = arith.constant 1.000000e+00 : f32
    %482 = vector.broadcast %cst_218 : f32 to vector<10x128xf32>
    %483 = arith.addf %482, %481 : vector<10x128xf32>
    %484 = arith.mulf %473, %483 : vector<10x128xf32>
    %c0_219 = arith.constant 0 : index
    %c1_220 = arith.constant 1 : index
    %c0_221 = arith.constant 0 : index
    %c0_222 = arith.constant 0 : index
    %485 = vector.load %arg16[%c0_219, %c1_220, %c0_221, %c0_222] : memref<1x2x128x32xf32, #tpu.memory_space<vmem>>, vector<1x1x128x32xf32>
    %486 = vector.shape_cast %485 : vector<1x1x128x32xf32> to vector<128x32xf32>
    %cst_223 = arith.constant dense<0.000000e+00> : vector<10x32xf32>
    %487 = tpu.matmul %484, %486, %cst_223 {dimension_numbers = #tpu.dot_dimension_numbers<[1], [0], [0], [1], [0, 0, 1, 1], [], []>} : vector<10x128xf32>, vector<128x32xf32>, vector<10x32xf32> -> vector<10x32xf32>
    %488 = arith.addf %438, %487 : vector<10x32xf32>
    %c0_224 = arith.constant 0 : index
    %c1_225 = arith.constant 1 : index
    %c0_226 = arith.constant 0 : index
    %c0_227 = arith.constant 0 : index
    %489 = vector.load %arg17[%c0_224, %c1_225, %c0_226, %c0_227] : memref<1x2x1x32xf32, #tpu.memory_space<vmem>>, vector<1x1x1x32xf32>
    %490 = vector.shape_cast %489 : vector<1x1x1x32xf32> to vector<1x32xf32>
    %491 = vector.broadcast %490 : vector<1x32xf32> to vector<10x32xf32>
    %492 = arith.addf %488, %491 : vector<10x32xf32>
    %493 = vector.extract_strided_slice %492 {offsets = [0, 0], sizes = [1, 32], strides = [1, 1]} : vector<10x32xf32> to vector<1x32xf32>
    %494 = vector.extract_strided_slice %492 {offsets = [5, 0], sizes = [1, 32], strides = [1, 1]} : vector<10x32xf32> to vector<1x32xf32>
    %495 = tpu.concatenate %493, %494 in 0 : vector<1x32xf32>, vector<1x32xf32> -> vector<2x32xf32>
    %c0_228 = arith.constant 0 : index
    %c0_229 = arith.constant 0 : index
    %c0_230 = arith.constant 0 : index
    %496 = vector.load %arg18[%c0_228, %c0_229, %c0_230] : memref<1x1x32xf32, #tpu.memory_space<vmem>>, vector<1x1x32xf32>
    %497 = vector.shape_cast %496 : vector<1x1x32xf32> to vector<1x32xf32>
    %c0_231 = arith.constant 0 : index
    %c0_232 = arith.constant 0 : index
    %c0_233 = arith.constant 0 : index
    %498 = vector.load %arg19[%c0_231, %c0_232, %c0_233] : memref<1x1x32xf32, #tpu.memory_space<vmem>>, vector<1x1x32xf32>
    %499 = vector.shape_cast %498 : vector<1x1x32xf32> to vector<1x32xf32>
    %cst_234 = arith.constant dense<0.000000e+00> : vector<2xf32>
    %500 = vector.multi_reduction <add>, %495, %cst_234 [1] : vector<2x32xf32> to vector<2xf32>
    %501 = vector.shape_cast %500 : vector<2xf32> to vector<2x1xf32>
    %cst_235 = arith.constant 3.200000e+01 : f32
    %502 = vector.broadcast %cst_235 : f32 to vector<2x1xf32>
    %503 = arith.divf %501, %502 : vector<2x1xf32>
    %504 = vector.broadcast %503 : vector<2x1xf32> to vector<2x32xf32>
    %505 = arith.subf %495, %504 : vector<2x32xf32>
    %506 = arith.mulf %505, %505 : vector<2x32xf32>
    %cst_236 = arith.constant dense<0.000000e+00> : vector<2xf32>
    %507 = vector.multi_reduction <add>, %506, %cst_236 [1] : vector<2x32xf32> to vector<2xf32>
    %508 = vector.shape_cast %507 : vector<2xf32> to vector<2x1xf32>
    %cst_237 = arith.constant 3.200000e+01 : f32
    %509 = vector.broadcast %cst_237 : f32 to vector<2x1xf32>
    %510 = arith.divf %508, %509 : vector<2x1xf32>
    %511 = vector.broadcast %503 : vector<2x1xf32> to vector<2x32xf32>
    %512 = arith.subf %495, %511 : vector<2x32xf32>
    %cst_238 = arith.constant 9.99999997E-7 : f32
    %513 = vector.broadcast %cst_238 : f32 to vector<2x1xf32>
    %514 = arith.addf %510, %513 : vector<2x1xf32>
    %515 = math.rsqrt %514 : vector<2x1xf32>
    %516 = vector.broadcast %515 : vector<2x1xf32> to vector<2x32xf32>
    %517 = arith.mulf %512, %516 : vector<2x32xf32>
    %518 = vector.broadcast %497 : vector<1x32xf32> to vector<2x32xf32>
    %519 = arith.mulf %517, %518 : vector<2x32xf32>
    %520 = vector.broadcast %499 : vector<1x32xf32> to vector<2x32xf32>
    %521 = arith.addf %519, %520 : vector<2x32xf32>
    %c0_i32 = arith.constant 0 : i32
    %522 = arith.cmpi eq, %arg0, %c0_i32 : i32
    %523 = arith.extui %522 : i1 to i32
    %c0_i32_239 = arith.constant 0 : i32
    %524 = arith.cmpi ne, %523, %c0_i32_239 : i32
    scf.if %524 {
      %c0_241 = arith.constant 0 : index
      %c0_242 = arith.constant 0 : index
      %528 = vector.load %arg25[%c0_241, %c0_242] : memref<2x32xf32, #tpu.memory_space<vmem>>, vector<2x32xf32>
      tpu.vector_store %arg25[%c0_241, %c0_242], %521 {strides = array<i32>} : memref<2x32xf32, #tpu.memory_space<vmem>>, vector<2x32xf32>,
    } else {
    }
    %c1_i32 = arith.constant 1 : i32
    %525 = arith.cmpi eq, %arg0, %c1_i32 : i32
    %526 = arith.extui %525 : i1 to i32
    %c0_i32_240 = arith.constant 0 : i32
    %527 = arith.cmpi ne, %526, %c0_i32_240 : i32
    scf.if %527 {
      %c0_241 = arith.constant 0 : index
      %c0_242 = arith.constant 0 : index
      %528 = vector.load %arg25[%c0_241, %c0_242] : memref<2x32xf32, #tpu.memory_space<vmem>>, vector<2x32xf32>
      %c0_243 = arith.constant 0 : index
      %c0_244 = arith.constant 0 : index
      %529 = vector.load %arg20[%c0_243, %c0_244] : memref<64x512xf32, #tpu.memory_space<vmem>>, vector<32x512xf32>
      %cst_245 = arith.constant dense<0.000000e+00> : vector<2x512xf32>
      %530 = tpu.matmul %528, %529, %cst_245 {dimension_numbers = #tpu.dot_dimension_numbers<[1], [0], [0], [1], [0, 0, 1, 1], [], []>} : vector<2x32xf32>, vector<32x512xf32>, vector<2x512xf32> -> vector<2x512xf32>
      %c32 = arith.constant 32 : index
      %c0_246 = arith.constant 0 : index
      %531 = vector.load %arg20[%c32, %c0_246] : memref<64x512xf32, #tpu.memory_space<vmem>>, vector<32x512xf32>
      %cst_247 = arith.constant dense<0.000000e+00> : vector<2x512xf32>
      %532 = tpu.matmul %521, %531, %cst_247 {dimension_numbers = #tpu.dot_dimension_numbers<[1], [0], [0], [1], [0, 0, 1, 1], [], []>} : vector<2x32xf32>, vector<32x512xf32>, vector<2x512xf32> -> vector<2x512xf32>
      %533 = arith.addf %530, %532 : vector<2x512xf32>
      %c0_248 = arith.constant 0 : index
      %c0_249 = arith.constant 0 : index
      %534 = vector.load %arg21[%c0_248, %c0_249] : memref<1x512xf32, #tpu.memory_space<vmem>>, vector<1x512xf32>
      %535 = vector.broadcast %534 : vector<1x512xf32> to vector<2x512xf32>
      %536 = arith.addf %533, %535 : vector<2x512xf32>
      %cst_250 = arith.constant 0.000000e+00 : f32
      %537 = vector.broadcast %cst_250 : f32 to vector<2x512xf32>
      %538 = arith.maximumf %536, %537 : vector<2x512xf32>
      %c0_251 = arith.constant 0 : index
      %c0_252 = arith.constant 0 : index
      %539 = vector.load %arg22[%c0_251, %c0_252] : memref<512x2xf32, #tpu.memory_space<vmem>>, vector<512x2xf32>
      %cst_253 = arith.constant dense<0.000000e+00> : vector<2x2xf32>
      %540 = tpu.matmul %538, %539, %cst_253 {dimension_numbers = #tpu.dot_dimension_numbers<[1], [0], [0], [1], [0, 0, 1, 1], [], []>} : vector<2x512xf32>, vector<512x2xf32>, vector<2x2xf32> -> vector<2x2xf32>
      %c0_254 = arith.constant 0 : index
      %c0_255 = arith.constant 0 : index
      %541 = vector.load %arg23[%c0_254, %c0_255] : memref<1x2xf32, #tpu.memory_space<vmem>>, vector<1x2xf32>
      %542 = vector.broadcast %541 : vector<1x2xf32> to vector<2x2xf32>
      %543 = arith.addf %540, %542 : vector<2x2xf32>
      %c0_256 = arith.constant 0 : index
      %c0_257 = arith.constant 0 : index
      %544 = vector.load %arg24[%c0_256, %c0_257] : memref<2x2xf32, #tpu.memory_space<vmem>>, vector<2x2xf32>
      tpu.vector_store %arg24[%c0_256, %c0_257], %543 {strides = array<i32>} : memref<2x2xf32, #tpu.memory_space<vmem>>, vector<2x2xf32>,
    } else {
    }
    return
  }
  func.func @transform_0(%arg0: i32) -> (i32, i32, i32) {
    %c0_i32 = arith.constant 0 : i32
    %c0_i32_0 = arith.constant 0 : i32
    %c0_i32_1 = arith.constant 0 : i32
    return %arg0, %c0_i32, %c0_i32_0 : i32, i32, i32
  }
  func.func @transform_1(%arg0: i32) -> (i32, i32, i32) {
    %c0_i32 = arith.constant 0 : i32
    %c0_i32_0 = arith.constant 0 : i32
    %c0_i32_1 = arith.constant 0 : i32
    return %arg0, %c0_i32, %c0_i32_0 : i32, i32, i32
  }
  func.func @transform_2(%arg0: i32) -> (i32, i32, i32) {
    %c0_i32 = arith.constant 0 : i32
    %c0_i32_0 = arith.constant 0 : i32
    %c0_i32_1 = arith.constant 0 : i32
    return %arg0, %c0_i32, %c0_i32_0 : i32, i32, i32
  }
  func.func @transform_3(%arg0: i32) -> (i32, i32, i32) {
    %c0_i32 = arith.constant 0 : i32
    %c0_i32_0 = arith.constant 0 : i32
    %c0_i32_1 = arith.constant 0 : i32
    return %arg0, %c0_i32, %c0_i32_0 : i32, i32, i32
  }
  func.func @transform_4(%arg0: i32) -> (i32, i32, i32) {
    %c0_i32 = arith.constant 0 : i32
    %c0_i32_0 = arith.constant 0 : i32
    %c0_i32_1 = arith.constant 0 : i32
    return %arg0, %c0_i32, %c0_i32_0 : i32, i32, i32
  }
  func.func @transform_5(%arg0: i32) -> (i32, i32, i32, i32) {
    %c0_i32 = arith.constant 0 : i32
    %c0_i32_0 = arith.constant 0 : i32
    %c0_i32_1 = arith.constant 0 : i32
    %c0_i32_2 = arith.constant 0 : i32
    return %arg0, %c0_i32, %c0_i32_0, %c0_i32_1 : i32, i32, i32, i32
  }
  func.func @transform_6(%arg0: i32) -> (i32, i32, i32, i32) {
    %c0_i32 = arith.constant 0 : i32
    %c0_i32_0 = arith.constant 0 : i32
    %c0_i32_1 = arith.constant 0 : i32
    %c0_i32_2 = arith.constant 0 : i32
    return %arg0, %c0_i32, %c0_i32_0, %c0_i32_1 : i32, i32, i32, i32
  }
  func.func @transform_7(%arg0: i32) -> (i32, i32, i32, i32) {
    %c0_i32 = arith.constant 0 : i32
    %c0_i32_0 = arith.constant 0 : i32
    %c0_i32_1 = arith.constant 0 : i32
    %c0_i32_2 = arith.constant 0 : i32
    return %arg0, %c0_i32, %c0_i32_0, %c0_i32_1 : i32, i32, i32, i32
  }
  func.func @transform_8(%arg0: i32) -> (i32, i32, i32, i32) {
    %c0_i32 = arith.constant 0 : i32
    %c0_i32_0 = arith.constant 0 : i32
    %c0_i32_1 = arith.constant 0 : i32
    %c0_i32_2 = arith.constant 0 : i32
    return %arg0, %c0_i32, %c0_i32_0, %c0_i32_1 : i32, i32, i32, i32
  }
  func.func @transform_9(%arg0: i32) -> (i32, i32, i32, i32) {
    %c0_i32 = arith.constant 0 : i32
    %c0_i32_0 = arith.constant 0 : i32
    %c0_i32_1 = arith.constant 0 : i32
    %c0_i32_2 = arith.constant 0 : i32
    return %arg0, %c0_i32, %c0_i32_0, %c0_i32_1 : i32, i32, i32, i32
  }
  func.func @transform_10(%arg0: i32) -> (i32, i32, i32, i32) {
    %c0_i32 = arith.constant 0 : i32
    %c0_i32_0 = arith.constant 0 : i32
    %c0_i32_1 = arith.constant 0 : i32
    %c0_i32_2 = arith.constant 0 : i32
    return %arg0, %c0_i32, %c0_i32_0, %c0_i32_1 : i32, i32, i32, i32
  }
  func.func @transform_11(%arg0: i32) -> (i32, i32, i32, i32) {
    %c0_i32 = arith.constant 0 : i32
    %c0_i32_0 = arith.constant 0 : i32
    %c0_i32_1 = arith.constant 0 : i32
    %c0_i32_2 = arith.constant 0 : i32
    return %arg0, %c0_i32, %c0_i32_0, %c0_i32_1 : i32, i32, i32, i32
  }
  func.func @transform_12(%arg0: i32) -> (i32, i32, i32, i32) {
    %c0_i32 = arith.constant 0 : i32
    %c0_i32_0 = arith.constant 0 : i32
    %c0_i32_1 = arith.constant 0 : i32
    %c0_i32_2 = arith.constant 0 : i32
    return %arg0, %c0_i32, %c0_i32_0, %c0_i32_1 : i32, i32, i32, i32
  }
  func.func @transform_13(%arg0: i32) -> (i32, i32, i32, i32) {
    %c0_i32 = arith.constant 0 : i32
    %c0_i32_0 = arith.constant 0 : i32
    %c0_i32_1 = arith.constant 0 : i32
    %c0_i32_2 = arith.constant 0 : i32
    return %arg0, %c0_i32, %c0_i32_0, %c0_i32_1 : i32, i32, i32, i32
  }
  func.func @transform_14(%arg0: i32) -> (i32, i32, i32, i32) {
    %c0_i32 = arith.constant 0 : i32
    %c0_i32_0 = arith.constant 0 : i32
    %c0_i32_1 = arith.constant 0 : i32
    %c0_i32_2 = arith.constant 0 : i32
    return %arg0, %c0_i32, %c0_i32_0, %c0_i32_1 : i32, i32, i32, i32
  }
  func.func @transform_15(%arg0: i32) -> (i32, i32, i32, i32) {
    %c0_i32 = arith.constant 0 : i32
    %c0_i32_0 = arith.constant 0 : i32
    %c0_i32_1 = arith.constant 0 : i32
    %c0_i32_2 = arith.constant 0 : i32
    return %arg0, %c0_i32, %c0_i32_0, %c0_i32_1 : i32, i32, i32, i32
  }
  func.func @transform_16(%arg0: i32) -> (i32, i32, i32, i32) {
    %c0_i32 = arith.constant 0 : i32
    %c0_i32_0 = arith.constant 0 : i32
    %c0_i32_1 = arith.constant 0 : i32
    %c0_i32_2 = arith.constant 0 : i32
    return %arg0, %c0_i32, %c0_i32_0, %c0_i32_1 : i32, i32, i32, i32
  }
  func.func @transform_17(%arg0: i32) -> (i32, i32, i32) {
    %c0_i32 = arith.constant 0 : i32
    %c0_i32_0 = arith.constant 0 : i32
    %c0_i32_1 = arith.constant 0 : i32
    return %arg0, %c0_i32, %c0_i32_0 : i32, i32, i32
  }
  func.func @transform_18(%arg0: i32) -> (i32, i32, i32) {
    %c0_i32 = arith.constant 0 : i32
    %c0_i32_0 = arith.constant 0 : i32
    %c0_i32_1 = arith.constant 0 : i32
    return %arg0, %c0_i32, %c0_i32_0 : i32, i32, i32
  }
  func.func @transform_19(%arg0: i32) -> (i32, i32) {
    %c0_i32 = arith.constant 0 : i32
    %c0_i32_0 = arith.constant 0 : i32
    %c0_i32_1 = arith.constant 0 : i32
    return %c0_i32, %c0_i32_0 : i32, i32
  }
  func.func @transform_20(%arg0: i32) -> (i32, i32) {
    %c0_i32 = arith.constant 0 : i32
    %c0_i32_0 = arith.constant 0 : i32
    %c0_i32_1 = arith.constant 0 : i32
    return %c0_i32, %c0_i32_0 : i32, i32
  }
  func.func @transform_21(%arg0: i32) -> (i32, i32) {
    %c0_i32 = arith.constant 0 : i32
    %c0_i32_0 = arith.constant 0 : i32
    %c0_i32_1 = arith.constant 0 : i32
    return %c0_i32, %c0_i32_0 : i32, i32
  }
  func.func @transform_22(%arg0: i32) -> (i32, i32) {
    %c0_i32 = arith.constant 0 : i32
    %c0_i32_0 = arith.constant 0 : i32
    %c0_i32_1 = arith.constant 0 : i32
    return %c0_i32, %c0_i32_0 : i32, i32
  }
  func.func @transform_23(%arg0: i32) -> (i32, i32) {
    %c0_i32 = arith.constant 0 : i32
    %c0_i32_0 = arith.constant 0 : i32
    %c0_i32_1 = arith.constant 0 : i32
    return %c0_i32, %c0_i32_0 : i32, i32
  }
}

</mosaic_0001>

<bundles_post_ra>
// kernel: _lambda_.1
= control target key start
LH: loop header
LB: loop body
LE: loop exit
PB: predicated region body
PF: predicated region fallthrough
CT: control target
= control target key end

     0   :  { %s7958_s0 = inlined_call_operand.vmem [shape: f32[2,8,192], index: 0, kind: input, shape index: {}]   ;;  %s7959_s1 = inlined_call_operand.vmem [shape: f32[2,192,32], index: 1, kind: input, shape index: {}]   ;;  %s7960_s2 = inlined_call_operand.vmem [shape: f32[2,1,32], index: 2, kind: input, shape index: {}]   ;;  %s7961_s3 = inlined_call_operand.vmem [shape: f32[2,1,32], index: 3, kind: input, shape index: {}]   ;;  %s7962_s4 = inlined_call_operand.vmem [shape: f32[2,5,32], index: 4, kind: input, shape index: {}]   ;;  %s7963_s5 = inlined_call_operand.vmem [shape: f32[2,2,1,32], index: 5, kind: input, shape index: {}]   ;;  %s7964_s6 = inlined_call_operand.vmem [shape: f32[2,2,1,32], index: 6, kind: input, shape index: {}]   ;;  %s7965_s7 = inlined_call_operand.vmem [shape: f32[2,2,32,96], index: 7, kind: input, shape index: {}]   ;;  %s7966_s8 = inlined_call_operand.vmem [shape: f32[2,2,1,96], index: 8, kind: input, shape index: {}]   ;;  %s7967_s9 = inlined_call_operand.vmem [shape: f32[2,2,32,32], index: 9, kind: input, shape index: {}]   ;;  %s7968_s10 = inlined_call_operand.vmem [shape: f32[2,2,1,32], index: 10, kind: input, shape index: {}]   ;;  %s7969_s11 = inlined_call_operand.vmem [shape: f32[2,2,1,32], index: 11, kind: input, shape index: {}]   ;;  %s7970_s12 = inlined_call_operand.vmem [shape: f32[2,2,1,32], index: 12, kind: input, shape index: {}]   ;;  %s7971_s13 = inlined_call_operand.vmem [shape: f32[2,2,32,128], index: 13, kind: input, shape index: {}]   ;;  %s7972_s14 = inlined_call_operand.vmem [shape: f32[2,2,1,128], index: 14, kind: input, shape index: {}]   ;;  %s7973_s15 = inlined_call_operand.vmem [shape: f32[2,2,128,32], index: 15, kind: input, shape index: {}]   ;;  %s7974_s16 = inlined_call_operand.vmem [shape: f32[2,2,1,32], index: 16, kind: input, shape index: {}]   ;;  %s7975_s17 = inlined_call_operand.vmem [shape: f32[2,1,32], index: 17, kind: input, shape index: {}]   ;;  %s7976_s18 = inlined_call_operand.vmem [shape: f32[2,1,32], index: 18, kind: input, shape index: {}]   ;;  %s7977_s19 = inlined_call_operand.vmem [shape: f32[64,512], index: 19, kind: input, shape index: {}]   ;;  %s7978_s20 = inlined_call_operand.vmem [shape: f32[1,512], index: 20, kind: input, shape index: {}]   ;;  %s7979_s21 = inlined_call_operand.vmem [shape: f32[512,2], index: 21, kind: input, shape index: {}]   ;;  %s7980_s22 = inlined_call_operand.vmem [shape: f32[1,2], index: 22, kind: input, shape index: {}]   ;;  %s7981_s23 = inlined_call_operand.hbm [shape: f32[2,2], index: 23, kind: output, shape index: {}]  }
   0x1   :  { %8012 = sst [smem:[#allocation7_spill]] %s7958_s0 }
   0x2   :  { %8013 = sst [smem:[#allocation8_spill]] %s7959_s1 }
   0x3   :  { %8014 = sst [smem:[#allocation9_spill]] %s7960_s2 }
   0x4   :  { %8015 = sst [smem:[#allocation10_spill]] %s7961_s3 }
   0x5   :  { %8016 = sst [smem:[#allocation11_spill]] %s7962_s4 }
   0x6   :  { %8017 = sst [smem:[#allocation12_spill]] %s7963_s5 }
   0x7   :  { %8018 = sst [smem:[#allocation13_spill]] %s7964_s6 }
   0x8   :  { %8019 = sst [smem:[#allocation14_spill]] %s7965_s7 }
   0x9   :  { %8020 = sst [smem:[#allocation15_spill]] %s7966_s8 }
   0xa   :  { %8021 = sst [smem:[#allocation16_spill]] %s7967_s9 }
   0xb   :  { %8022 = sst [smem:[#allocation17_spill]] %s7968_s10 }
   0xc   :  { %8023 = sst [smem:[#allocation18_spill]] %s7981_s23 }
   0xd   :  { %28 = vsyncpa [#allocation4], 0  ;;  %s6955_s4 = smov 0  }
   0xe LB: > { %8024 = sst [smem:[#allocation6_spill]] %s6814_s4  ;;  %s6961_s30 = sadd.s32 4294967295, %s6814_s4   ;;  %s6814_s4 = sphi %s6955_s4, %s34_s4  }
   0xf   : > { %p5735_p0 = scmp.ge.s32.totalorder %s6814_s4, 1  ;;  %p796_p1 = scmp.lt.s32.totalorder %s6814_s4, 3 }
  0x11   : > { %p797_p2 = pnand %p5735_p0, %p796_p1 }
  0x12   : > { %p928_p3 = scmp.lt.s32.totalorder (!%p797_p2), %s6961_s30, 1  ;;  %v6816_v0 = vmov (!%p797_p2), 0.0|0.0   ;;  %s8025_s26 = sld [smem:[#allocation8_spill]] (!%p797_p2)  ;;  %vm1039_vm0 = vcmask (!%p797_p2), 523264   ;;  %v1126_v39 = vlaneseq (!%p797_p2)  ;;  %vm1134_vm1 = vcmask (!%p797_p2), 1040384  }
  0x13   : > { %800 = sbr.rel (%p797_p2) target bundleno = 9362 (0x2492), region = 112  ;;  %6406 = vmatprep.subr.bf16.mxu0 (!%p797_p2), %v6816_v0  ;;  %s8026_s28 = sld [smem:[#allocation7_spill]] (!%p797_p2)  ;;  %vm1136_vm2 = vcmask (!%p797_p2), 1044480   ;;  %vm1138_vm3 = vcmask (!%p797_p2), 1045504   ;;  %vm1142_vm4 = vcmask (!%p797_p2), 261120   ;;  %vm1146_vm5 = vcmask (!%p797_p2), 254976  }
  0x14   : > { %s8027_s5 = sld [smem:[#allocation11_spill]] (!%p797_p2)  ;;  %s8028_s27 = sld [smem:[#allocation10_spill]] (!%p797_p2)  ;;  %v7031_v41 = vshrl.u32 (!%p797_p2), %v1126_v39, 7  ;;  %vm6818_vm6 = vmmov (!%p797_p2), 0   ;;  %vm1282_vm7 = vcmask (!%p797_p2), 64512   ;;  %vm1358_vm8 = vcmask (!%p797_p2), 36864  }
  0x15   : > { %s8033_s8 = sld [smem:[#allocation15_spill]] (!%p797_p2)  ;;  %vm1372_vm9 = vcmask (!%p797_p2), 39936   ;;  %s8000_s4 = smov (!%p797_p2), 80   ;;  %vm1967_vm10 = vcmask (!%p797_p2), 1042432   ;;  %vm1962_vm11 = vcmask (!%p797_p2), 130048   ;;  %vm1964_vm12 = vcmask (!%p797_p2), 195584  }
  0x16   : > { %v1128_v48 = vsub.s32 (!%p797_p2), 0, %v7031_v41  ;;  %s8036_s9 = sld [smem:[#allocation16_spill]] (!%p797_p2)  ;;  %s8037_s10 = sld [smem:[#allocation17_spill]] (!%p797_p2) }
  0x17   : > { %p5888_p4 = scmp.ne.s32.totalorder (!%p797_p2), %s6961_s30, 0 }
  0x1a   : > { %s6968_s24 = scalar_select %p928_p3, %s6961_s30, 1 }
  0x1c   : > { %s6654_s25 = smul.u32 192, %s6968_s24  ;;  %s5899_s6 = sshll.u32 %s6968_s24, 4 }
  0x1d   : > { %s6987_s29 = scalar_lea.vmem %s8026_s28, %s5899_s6  ;;  %s5739_s3 = sshll.u32 %s6968_s24, 3 }
  0x1e   : > { %s6974_s2 = scalar_lea.vmem %s8025_s26, %s6654_s25  ;;  %v1007_v12 = vld [vmem:[%s6987_s29 + $0x8] sm:$0xff]  ;;  %v1006_v38 = vld [vmem:[%s6987_s29] sm:$0xff]  ;;  %s947_s1 = scalar_lea.vmem %s8027_s5, %s5739_s3 }
  0x1f   : > { %v1008_v1 = vld [vmem:[%s6974_s2] sm:$0xff]  ;;  %v1009_v2 = vld [vmem:[%s6974_s2 + $0x8] sm:$0xff]  ;;  %v1010_v3 = vld [vmem:[%s6974_s2 + $0x10] sm:$0xff]  ;;  %5757 = vmatprep.mubr.msk.f32.mxu0 %vm1039_vm0, %v1007_v12  ;;  %s943_s7 = scalar_lea.vmem %s8028_s27, %s6968_s24  ;;  %s8030_s3 = sld [smem:[#allocation14_spill]] }
  0x20   : > { %v6407_v4 = vpack.c.bf16 %v1009_v2, %v1008_v1  ;;  %v1011_v5 = vld [vmem:[%s6974_s2 + $0x18] sm:$0xff]  ;;  %v1012_v7 = vld [vmem:[%s6974_s2 + $0x20] sm:$0xff]  ;;  %v1013_v8 = vld [vmem:[%s6974_s2 + $0x28] sm:$0xff]  ;;  %s7065_s25 = sshll.u32 %s6968_s24, 1  ;;  %s8031_s26 = sld [smem:[#allocation12_spill]] }
  0x21   : > { %v6410_v6 = vpack.c.bf16 %v1011_v5, %v1010_v3  ;;  %v6413_v9 = vpack.c.bf16 %v1013_v8, %v1012_v7  ;;  %v1014_v10 = vld [vmem:[%s6974_s2 + $0x30] sm:$0xff]  ;;  %v1015_v11 = vld [vmem:[%s6974_s2 + $0x38] sm:$0xff]  ;;  %v1016_v14 = vld [vmem:[%s6974_s2 + $0x40] sm:$0xff]  ;;  %s8032_s28 = sld [smem:[#allocation13_spill]]  ;;  %s7988_s5 = smov 96  }
  0x22   : > { %6408 = vmatpush1.bf16.msra.mxu0 %v6407_v4  ;;  %v6416_v13 = vpack.c.bf16 %v1015_v11, %v1014_v10  ;;  %v1017_v15 = vld [vmem:[%s6974_s2 + $0x48] sm:$0xff]  ;;  %v1018_v17 = vld [vmem:[%s6974_s2 + $0x50] sm:$0xff]  ;;  %v1019_v18 = vld [vmem:[%s6974_s2 + $0x58] sm:$0xff]  ;;  %s8008_s27 = smov 120   ;;  %s7994_s29 = smov 72  }
  0x23   : > { %6409 = vmatprep.subr.bf16.mxu0 %v6816_v0  ;;  %v6419_v16 = vpack.c.bf16 %v1017_v15, %v1016_v14  ;;  %v6422_v19 = vpack.c.bf16 %v1019_v18, %v1018_v17  ;;  %v1020_v20 = vld [vmem:[%s6974_s2 + $0x60] sm:$0xff]  ;;  %v1021_v21 = vld [vmem:[%s6974_s2 + $0x68] sm:$0xff]  ;;  %v1022_v23 = vld [vmem:[%s6974_s2 + $0x70] sm:$0xff] }
  0x24   : > { %v6425_v22 = vpack.c.bf16 %v1021_v21, %v1020_v20  ;;  %v1023_v24 = vld [vmem:[%s6974_s2 + $0x78] sm:$0xff]  ;;  %v1024_v26 = vld [vmem:[%s6974_s2 + $0x80] sm:$0xff]  ;;  %v1025_v27 = vld [vmem:[%s6974_s2 + $0x88] sm:$0xff] }
  0x25   : > { %v6428_v25 = vpack.c.bf16 %v1023_v24, %v1022_v23  ;;  %v6431_v28 = vpack.c.bf16 %v1025_v27, %v1024_v26  ;;  %v1026_v29 = vld [vmem:[%s6974_s2 + $0x90] sm:$0xff]  ;;  %v1027_v30 = vld [vmem:[%s6974_s2 + $0x98] sm:$0xff]  ;;  %v1028_v32 = vld [vmem:[%s6974_s2 + $0xa0] sm:$0xff] }
  0x26   : > { %6411 = vmatpush1.bf16.msra.mxu0 %v6410_v6  ;;  %v6434_v31 = vpack.c.bf16 %v1027_v30, %v1026_v29  ;;  %v1029_v33 = vld [vmem:[%s6974_s2 + $0xa8] sm:$0xff]  ;;  %v1030_v35 = vld [vmem:[%s6974_s2 + $0xb0] sm:$0xff]  ;;  %v1031_v36 = vld [vmem:[%s6974_s2 + $0xb8] sm:$0xff]  ;;  %s8029_s2 = sld [smem:[#allocation9_spill]]  ;;  %s7071_s6 = scalar_lea.vmem %s8031_s26, %s7065_s25  ;;  %v6817_v29 = vmov 0.0  }
  0x27   : > { %6412 = vmatprep.subr.bf16.mxu0 %v6816_v0  ;;  %v6437_v34 = vpack.c.bf16 %v1029_v33, %v1028_v32  ;;  %v6440_v37 = vpack.c.bf16 %v1031_v36, %v1030_v35  ;;  %v1116_v40 = vld [vmem:[%s947_s1 + $0x1] sm:$0xf]  ;;  %v1113_v42 = vld [vmem:[%s943_s7] sm:$0x1]  ;;  %s7984_s26 = smov 64   ;;  %s7986_s7 = smov 56  }
  0x28   : > { %v1114_v43 = vld [vmem:[%s947_s1] sm:$0x1]  ;;  %v1119_v45 = vrot.slane %v1116_v40, 4  ;;  %s8010_s1 = smov 88  }
  0x29   : > { %v1115_v47 = vadd.f32 %v1114_v43, %v1113_v42  ;;  %v5758_v20 = vld [vmem:[%s7071_s6] ss:$0 sm:$0xff] }
  0x2a   : > { %6414 = vmatpush1.bf16.msra.mxu0 %v6413_v9 }
  0x2b   : > { %6415 = vmatprep.subr.bf16.mxu0 %v6816_v0  ;;  %v1129_v53 = vrot.slane %v1115_v47, %v1128_v48 }
  0x2c   : > { %s940_s23 = scalar_lea.vmem %s8029_s2, %s6968_s24  ;;  %s7077_s2 = scalar_lea.vmem %s8032_s28, %s7065_s25 }
  0x2d   : > { %v5756_v44 = vld [vmem:[%s940_s23] ss:$0 sm:$0xff]  ;;  %s7052_s23 = sshll.u32 %s6968_s24, 6  ;;  %s7992_s28 = smov 112  }
  0x2e   : > { %6417 = vmatpush1.bf16.msra.mxu0 %v6416_v13  ;;  %s7058_s0 = scalar_lea.vmem %s8030_s3, %s7052_s23  ;;  %s7093_s3 = scalar_lea.vmem %s8033_s8, %s7065_s25 }
  0x2f   : > { %6418 = vmatprep.subr.bf16.mxu0 %v6816_v0  ;;  %v1187_v7 = vld [vmem:[%s7058_s0] sm:$0xff]  ;;  %v1188_v8 = vld [vmem:[%s7058_s0 + $0x8] sm:$0xff]  ;;  %v1189_v9 = vld [vmem:[%s7058_s0 + $0x10] sm:$0xff]  ;;  %s8044_s8 = smov 104  }
  0x30   : > { %v6442_v10 = vpack.c.bf16 %v1188_v8, %v1187_v7  ;;  %v1190_v11 = vld [vmem:[%s7058_s0 + $0x18] sm:$0xff]  ;;  %v5760_v30 = vld [vmem:[%s7093_s3] ss:$0 sm:$0xff] }
  0x31   : > { %v6446_v12 = vpack.c.bf16 %v1190_v11, %v1189_v9 }
  0x32   : > { %6420 = vmatpush1.bf16.msra.mxu0 %v6419_v16  ;;  %6443 = vmatprep.subr.bf16.mxu1 %v6442_v10 }
  0x33   : > { %6421 = vmatprep.subr.bf16.mxu0 %v6816_v0  ;;  %6445 = vmatpush3.bf16.msra.mxu1 %v6442_v10 }
  0x34   : > { %6447 = vmatprep.subr.bf16.mxu1 %v6446_v12 }
  0x36   : > { %6423 = vmatpush1.bf16.msra.mxu0 %v6422_v19 }
  0x37   : > { %6424 = vmatprep.subr.bf16.mxu0 %v6816_v0  ;;  %6449 = vmatpush3.bf16.msra.mxu1 %v6446_v12 }
  0x38   : > { %6121 = vmatprep.subr.mxu1 %v6817_v29 }
  0x3a   : > { %6426 = vmatpush1.bf16.msra.mxu0 %v6425_v22  ;;  %v5759_v22 = vld [vmem:[%s7077_s2] ss:$0 sm:$0xff] }
  0x3b   : > { %6427 = vmatprep.subr.bf16.mxu0 %v6816_v0 }
  0x3e   : > { %6429 = vmatpush1.bf16.msra.mxu0 %v6428_v25 }
  0x3f   : > { %6430 = vmatprep.subr.bf16.mxu0 %v6816_v0 }
  0x42   : > { %6432 = vmatpush1.bf16.msra.mxu0 %v6431_v28 }
  0x43   : > { %6433 = vmatprep.subr.bf16.mxu0 %v6816_v0 }
  0x46   : > { %6435 = vmatpush1.bf16.msra.mxu0 %v6434_v31 }
  0x47   : > { %6436 = vmatprep.subr.bf16.mxu0 %v6816_v0 }
  0x4a   : > { %6438 = vmatpush1.bf16.msra.mxu0 %v6437_v34 }
  0x4b   : > { %6439 = vmatprep.subr.bf16.mxu0 %v6816_v0 }
  0x4e   : > { %6441 = vmatpush1.bf16.msra.mxu0 %v6440_v37 }
  0x4f   : > { %6171 = vmatprep.subr.mxu0 %v6817_v29 }
  0x51   : > { %1108 = vmatmul.mubr.f32.vlgmr.msra.gmra.mrb[0].mxu0 %v1006_v38 }
  0x52   : > { %6173 = vmatprep.mubr.msk.f32.mxu0 %vm6818_vm6, %v6817_v29 }
 0x124   : > { %v1109_v46 = vpop.f32.mrb[0].mxu0 }
 0x125   : > { %v1110_v49 = vadd.f32 %v5756_v44, %v1109_v46  ;;  %v1111_v50 = vpop.f32.mrb[1].mxu0 }
 0x127   : > { %v1117_v51 = vadd.f32 %v1116_v40, %v1110_v49  ;;  %v1121_v52 = vadd.f32 %v1119_v45, %v1110_v49 }
 0x129   : > { %v1123_v54 = vrot.slane %v1117_v51, 7  ;;  %v7036_v55 = vrot.slane %v1121_v52, 6 }
 0x12b   : > { %v1135_v56 = vsel %vm1134_vm1, %v1115_v47, %v1123_v54  ;;  %v1147_v60 = vsel %vm1146_vm5, %v7036_v55, 0.0 }
 0x12c   : > { %v1137_v57 = vsel %vm1136_vm2, %v1135_v56, %v1129_v53 }
 0x12d   : > { %v7041_v58 = vsel %vm1138_vm3, %v1137_v57, %v7036_v55 }
 0x12e   : > { %v1143_v59 = vsel %vm1142_vm4, %v7041_v58, 0.0 }
 0x12f   : > { %1144 = vadd.xlane.f32.xlu0 %v1143_v59 }
 0x133   : > { %1148 = vadd.xlane.f32.xlu0 %v1147_v60 }
 0x1bc   : > { %v1145_v61 = vpop.xlane.xlu0 %1144 }
 0x1bd   : > { %v1151_v62 = vmul.f32 0.03125, %v1145_v61 }
 0x1bf   : > { %v1153_v63 = vsub.f32 %v7041_v58, %v1151_v62 }
 0x1c0   : > { %v1149_v0 = vpop.xlane.xlu0 %1148 }
 0x1c1   : > { %v1152_v1 = vmul.f32 0.03125, %v1149_v0  ;;  %v1155_v2 = vmul.f32 %v1153_v63, %v1153_v63 }
 0x1c3   : > { %v1154_v3 = vsub.f32 %v7036_v55, %v1152_v1  ;;  %v1157_v4 = vsel %vm1142_vm4, %v1155_v2, 0.0 }
 0x1c4   : > { %1158 = vadd.xlane.f32.xlu1 %v1157_v4 }
 0x1c5   : > { %v1156_v5 = vmul.f32 %v1154_v3, %v1154_v3 }
 0x1c7   : > { %v1160_v6 = vsel %vm1146_vm5, %v1156_v5, 0.0 }
 0x1c8   : > { %1161 = vadd.xlane.f32.xlu1 %v1160_v6 }
 0x251   : > { %v1159_v13 = vpop.xlane.xlu1 %1158 }
 0x252   : > { %v1163_v14 = vmul.f32 0.03125, %v1159_v13 }
 0x254   : > { %v1165_v15 = vadd.f32 1e-06, %v1163_v14 }
 0x255   : > { %v1162_v16 = vpop.xlane.xlu1 %1161 }
 0x256   : > { %6688 = vrsqrt.f32 %v1165_v15  ;;  %v1164_v17 = vmul.f32 0.03125, %v1162_v16 }
 0x258   : > { %v1166_v18 = vadd.f32 1e-06, %v1164_v17 }
 0x25a   : > { %6690 = vrsqrt.f32 %v1166_v18 }
 0x260   : > { %v6689_v19 = vpop.eup %6688 }
 0x261   : > { %v1169_v21 = vmul.f32 %v6689_v19, %v1153_v63 }
 0x263   : > { %v1177_v23 = vmul.f32 %v5758_v20, %v1169_v21 }
 0x264   : > { %v6691_v24 = vpop.eup %6690 }
 0x265   : > { %v1170_v25 = vmul.f32 %v6691_v24, %v1154_v3  ;;  %v1185_v26 = vadd.f32 %v5759_v22, %v1177_v23 }
 0x267   : > { %v1178_v27 = vmul.f32 %v5758_v20, %v1170_v25  ;;  %6118 = vmatprep.mubr.msk.f32.mxu1 %vm1142_vm4, %v1185_v26 }
 0x269   : > { %v1186_v28 = vadd.f32 %v5759_v22, %v1178_v27 }
 0x26b   : > { %6119 = vmatmul.mubr.msk.f32.vlgmr.msra.gmra.mrb[0].mxu1 %vm1142_vm4, %v1186_v28 }
 0x26c   : > { %6123 = vmatprep.mubr.msk.f32.mxu1 %vm6818_vm6, %v6817_v29 }
 0x33e   : > { %v6120_v31 = vpop.f32.mrb[0].mxu1 }
 0x33f   : > { %v7096_v32 = vadd.f32 %v6120_v31, %v5760_v30  ;;  %v1270_v33 = vpop.f32.mrb[1].mxu1 }
 0x340   : > { %v7098_v34 = vadd.f32 %v5760_v30, %v1270_v33 }
 0x341   : > { %v1969_v14 = vrot.slane %v7096_v32, 5 }
 0x342   : > { %1280 = vrot.lane.b32.xlu0 %v7098_v34, %s7988_s5  ;;  %v1968_v15 = vrot.slane %v7098_v34, 5 }
 0x344   : > { %v7156_v16 = vsel %vm1967_vm10, %v1968_v15, %v1969_v14 }
 0x346   : > { %1450 = vrot.lane.b32.xlu0 %v7098_v34, %s8010_s1 }
 0x3b4   : > { %v1281_v35 = vpop.permute.xlu0 %1280 }
 0x3b5   : > { %6122 = vmatpush3.xpose.msk.msra.mxu1 %vm1282_vm7, %v1281_v35 }
 0x3b6   : > { %6126 = vmatprep.subr.mxu1 %v6817_v29 }
 0x3b8   : > { %6124 = vmatmul.mubr.msk.f32.vlgmr.msra.gmra.mrb[2].mxu1 %vm1282_vm7, %v7098_v34  ;;  %v1451_v51 = vpop.permute.xlu0 %1450 }
 0x3b9   : > { %6128 = vmatprep.mubr.msk.f32.mxu1 %vm6818_vm6, %v6817_v29 }
 0x48b   : > { %v1353_v36 = vpop.f32.mrb[2].mxu1 }
 0x48c   : > { %v1357_v37 = vmul.f32 0.35355338, %v1353_v36  ;;  %v6125_v38 = vpop.f32.mrb[3].mxu1 }
 0x48e   : > { %v1359_v39 = vsel %vm1358_vm8, %v1357_v37, -inf }
 0x48f   : > { %1360 = vmax.xlane.f32.xlu1 %v1359_v39 }
 0x4a0   : > { %1370 = vrot.lane.b32.xlu1 %v7098_v34, %s7984_s26  ;;  %s7990_s26 = smov 104  }
 0x51c   : > { %v1361_v40 = vpop.xlane.xlu1 %1360 }
 0x51d   : > { %v1362_v42 = vsub.f32 %v1357_v37, %v1361_v40 }
 0x51f   : > { %v1363_v43 = vmul.f32 1.442695, %v1362_v42 }
 0x520   : > { %v1371_v44 = vpop.permute.xlu1 %1370 }
 0x521   : > { %6692 = vpow2.f32 %v1363_v43  ;;  %6127 = vmatpush3.msk.msra.mxu1 %vm1136_vm2, %v1371_v44 }
 0x522   : > { %6131 = vmatprep.subr.mxu1 %v6817_v29 }
 0x52b   : > { %v6693_v45 = vpop.eup %6692 }
 0x52c   : > { %v1365_v46 = vsel %vm1358_vm8, %v6693_v45, 0.0 }
 0x52d   : > { %1366 = vadd.xlane.f32.xlu1 %v1365_v46 }
 0x53e   : > { %1448 = vrot.lane.b32.xlu1 %v7098_v34, %s8008_s27 }
 0x5ba   : > { %v1367_v47 = vpop.xlane.xlu1 %1366 }
 0x5bb   : > { %6694 = vrcp.f32 %v1367_v47 }
 0x5be   : > { %v1449_v52 = vpop.permute.xlu1 %1448 }
 0x5c5   : > { %v6695_v49 = vpop.eup %6694 }
 0x5c6   : > { %v1369_v50 = vmul.f32 %v6695_v49, %v6693_v45 }
 0x5c8   : > { %6129 = vmatmul.mubr.msk.f32.vlgmr.msra.gmra.mrb[4].mxu1 %vm1372_vm9, %v1369_v50 }
 0x5c9   : > { %6132 = vmatpush3.xpose.msk.msra.mxu1 %vm1282_vm7, %v1451_v51  ;;  %6133 = vmatprep.mubr.msk.f32.mxu1 %vm6818_vm6, %v6817_v29 }
 0x5ca   : > { %6136 = vmatprep.subr.mxu1 %v6817_v29 }
 0x5cc   : > { %6134 = vmatmul.mubr.msk.f32.vlgmr.msra.gmra.mrb[6].mxu1 %vm1282_vm7, %v1449_v52 }
 0x5cd   : > { %6138 = vmatprep.mubr.msk.f32.mxu1 %vm6818_vm6, %v6817_v29 }
 0x69b   : > { %v7126_v53 = vpop.f32.mrb[4].mxu1 }
 0x69c   : > { %v6130_v54 = vpop.f32.mrb[5].mxu1 }
 0x69f   : > { %v1522_v56 = vpop.f32.mrb[6].mxu1 }
 0x6a0   : > { %v1526_v57 = vmul.f32 0.35355338, %v1522_v56  ;;  %v6135_v59 = vpop.f32.mrb[7].mxu1 }
 0x6a2   : > { %v1527_v60 = vsel %vm1358_vm8, %v1526_v57, -inf }
 0x6a3   : > { %1528 = vmax.xlane.f32.xlu0 %v1527_v60 }
 0x6b9   : > { %1538 = vrot.lane.b32.xlu0 %v7098_v34, %s7986_s7  ;;  %s7996_s7 = smov 48  }
 0x6bd   : > { %1615 = vrot.lane.b32.xlu0 %v7098_v34, %s7992_s28 }
 0x730   : > { %v1529_v61 = vpop.xlane.xlu0 %1528 }
 0x731   : > { %v1530_v62 = vsub.f32 %v1526_v57, %v1529_v61 }
 0x733   : > { %v1531_v63 = vmul.f32 1.442695, %v1530_v62 }
 0x734   : > { %v1539_v0 = vpop.permute.xlu0 %1538 }
 0x735   : > { %6696 = vpow2.f32 %v1531_v63  ;;  %6137 = vmatpush3.msk.msra.mxu1 %vm1136_vm2, %v1539_v0 }
 0x736   : > { %6141 = vmatprep.subr.mxu1 %v6817_v29 }
 0x738   : > { %v1616_v7 = vpop.permute.xlu0 %1615 }
 0x73f   : > { %v6697_v1 = vpop.eup %6696 }
 0x740   : > { %v1533_v2 = vsel %vm1358_vm8, %v6697_v1, 0.0 }
 0x741   : > { %1534 = vadd.xlane.f32.xlu1 %v1533_v2 }
 0x752   : > { %1617 = vrot.lane.b32.xlu1 %v7098_v34, %s8000_s4 }
 0x7ce   : > { %v1535_v3 = vpop.xlane.xlu1 %1534 }
 0x7cf   : > { %6698 = vrcp.f32 %v1535_v3 }
 0x7d2   : > { %v1618_v6 = vpop.permute.xlu1 %1617 }
 0x7d9   : > { %v6699_v4 = vpop.eup %6698 }
 0x7da   : > { %v1537_v5 = vmul.f32 %v6699_v4, %v6697_v1 }
 0x7dc   : > { %6139 = vmatmul.mubr.msk.f32.vlgmr.msra.gmra.mrb[8].mxu1 %vm1372_vm9, %v1537_v5 }
 0x7dd   : > { %6142 = vmatpush3.xpose.msk.msra.mxu1 %vm1282_vm7, %v1618_v6  ;;  %6143 = vmatprep.mubr.msk.f32.mxu1 %vm6818_vm6, %v6817_v29 }
 0x7de   : > { %6146 = vmatprep.subr.mxu1 %v6817_v29 }
 0x7e0   : > { %6144 = vmatmul.mubr.msk.f32.vlgmr.msra.gmra.mrb[10].mxu1 %vm1282_vm7, %v1616_v7 }
 0x7e1   : > { %6148 = vmatprep.mubr.msk.f32.mxu1 %vm6818_vm6, %v6817_v29 }
 0x8af   : > { %v7146_v8 = vpop.f32.mrb[8].mxu1 }
 0x8b0   : > { %v6140_v9 = vpop.f32.mrb[9].mxu1 }
 0x8b3   : > { %v1689_v10 = vpop.f32.mrb[10].mxu1 }
 0x8b4   : > { %v1693_v11 = vmul.f32 0.35355338, %v1689_v10  ;;  %v6145_v12 = vpop.f32.mrb[11].mxu1 }
 0x8b6   : > { %v1694_v13 = vsel %vm1358_vm8, %v1693_v11, -inf }
 0x8b7   : > { %1695 = vmax.xlane.f32.xlu1 %v1694_v13 }
 0x8c8   : > { %1784 = vrot.lane.b32.xlu1 %v7098_v34, %s7994_s29 }
 0x8cc   : > { %1782 = vrot.lane.b32.xlu1 %v7098_v34, %s7990_s26 }
 0x8d0   : > { %1971 = vrot.lane.b32.xlu1 %v7156_v16, %s7988_s5  ;;  %s7998_s5 = smov 40  }
 0x944   : > { %v1696_v17 = vpop.xlane.xlu1 %1695 }
 0x945   : > { %v1697_v18 = vsub.f32 %v1693_v11, %v1696_v17 }
 0x947   : > { %v1698_v19 = vmul.f32 1.442695, %v1697_v18 }
 0x948   : > { %v1785_v25 = vpop.permute.xlu1 %1784 }
 0x949   : > { %6700 = vpow2.f32 %v1698_v19 }
 0x94c   : > { %v1783_v27 = vpop.permute.xlu1 %1782 }
 0x950   : > { %v1972_v43 = vpop.permute.xlu1 %1971 }
 0x953   : > { %v6701_v20 = vpop.eup %6700 }
 0x954   : > { %v1700_v21 = vsel %vm1358_vm8, %v6701_v20, 0.0 }
 0x955   : > { %1701 = vadd.xlane.f32.xlu0 %v1700_v21 }
 0x96b   : > { %1705 = vrot.lane.b32.xlu0 %v7098_v34, %s7996_s7 }
 0x9e2   : > { %v1702_v22 = vpop.xlane.xlu0 %1701 }
 0x9e3   : > { %6702 = vrcp.f32 %v1702_v22 }
 0x9e6   : > { %v1706_v23 = vpop.permute.xlu0 %1705 }
 0x9e7   : > { %6147 = vmatpush3.msk.msra.mxu1 %vm1136_vm2, %v1706_v23 }
 0x9e8   : > { %6151 = vmatprep.subr.mxu1 %v6817_v29 }
 0x9ed   : > { %v6703_v24 = vpop.eup %6702 }
 0x9ee   : > { %v1704_v26 = vmul.f32 %v6703_v24, %v6701_v20 }
 0x9f0   : > { %6149 = vmatmul.mubr.msk.f32.vlgmr.msra.gmra.mrb[12].mxu1 %vm1372_vm9, %v1704_v26 }
 0x9f1   : > { %6152 = vmatpush3.xpose.msk.msra.mxu1 %vm1282_vm7, %v1785_v25  ;;  %6153 = vmatprep.mubr.msk.f32.mxu1 %vm6818_vm6, %v6817_v29 }
 0x9f2   : > { %6156 = vmatprep.subr.mxu1 %v6817_v29 }
 0x9f4   : > { %6154 = vmatmul.mubr.msk.f32.vlgmr.msra.gmra.mrb[14].mxu1 %vm1282_vm7, %v1783_v27 }
 0x9f5   : > { %6158 = vmatprep.mubr.msk.f32.mxu1 %vm6818_vm6, %v6817_v29 }
 0xac3   : > { %v7173_v28 = vpop.f32.mrb[12].mxu1 }
 0xac4   : > { %v6150_v30 = vpop.f32.mrb[13].mxu1 }
 0xac7   : > { %v1856_v31 = vpop.f32.mrb[14].mxu1 }
 0xac8   : > { %v1860_v32 = vmul.f32 0.35355338, %v1856_v31  ;;  %v6155_v33 = vpop.f32.mrb[15].mxu1 }
 0xaca   : > { %v1861_v35 = vsel %vm1358_vm8, %v1860_v32, -inf }
 0xacb   : > { %1862 = vmax.xlane.f32.xlu0 %v1861_v35 }
 0xae1   : > { %1872 = vrot.lane.b32.xlu0 %v7098_v34, %s7998_s5 }
 0xae5   : > { %2138 = vrot.lane.b32.xlu0 %v7156_v16, %s8010_s1  ;;  %s5903_s1 = sshll.u32 %s6968_s24, 8 }
 0xae9   : > { %2305 = vrot.lane.b32.xlu0 %v7156_v16, %s8000_s4  ;;  %s7255_s4 = scalar_lea.vmem %s8036_s9, %s7052_s23  ;;  %s7361_s9 = scalar_lea.vmem %s7974_s16, %s7065_s25 }
 0xaed   : > { %2472 = vrot.lane.b32.xlu0 %v7156_v16, %s7994_s29  ;;  %s8006_s29 = smov 8  }
 0xb58   : > { %v1863_v36 = vpop.xlane.xlu0 %1862 }
 0xb59   : > { %v1864_v37 = vsub.f32 %v1860_v32, %v1863_v36 }
 0xb5b   : > { %v1865_v38 = vmul.f32 1.442695, %v1864_v37 }
 0xb5c   : > { %v1873_v39 = vpop.permute.xlu0 %1872 }
 0xb5d   : > { %6704 = vpow2.f32 %v1865_v38  ;;  %6157 = vmatpush3.msk.msra.mxu1 %vm1136_vm2, %v1873_v39 }
 0xb5e   : > { %6161 = vmatprep.subr.mxu1 %v6817_v29 }
 0xb60   : > { %v2139_v40 = vpop.permute.xlu0 %2138 }
 0xb61   : > { %6172 = vmatpush3.xpose.msk.msra.mxu0 %vm1282_vm7, %v2139_v40 }
 0xb62   : > { %6181 = vmatprep.subr.mxu0 %v6817_v29 }
 0xb64   : > { %v2306_v45 = vpop.permute.xlu0 %2305 }
 0xb67   : > { %v6705_v34 = vpop.eup %6704 }
 0xb68   : > { %v1867_v42 = vsel %vm1358_vm8, %v6705_v34, 0.0  ;;  %v2473_v49 = vpop.permute.xlu0 %2472 }
 0xb69   : > { %1868 = vadd.xlane.f32.xlu1 %v1867_v42 }
 0xb7a   : > { %2136 = vrot.lane.b32.xlu1 %v7156_v16, %s8008_s27  ;;  %s7303_s27 = scalar_lea.vmem %s7971_s13, %s7052_s23  ;;  %s7321_s23 = scalar_lea.vmem %s7969_s11, %s7065_s25 }
 0xb7e   : > { %2303 = vrot.lane.b32.xlu1 %v7156_v16, %s7992_s28  ;;  %s8035_s28 = smov 64  }
 0xb82   : > { %2470 = vrot.lane.b32.xlu1 %v7156_v16, %s7990_s26  ;;  %s8034_s26 = smov 56  }
 0xbf6   : > { %v1869_v44 = vpop.xlane.xlu1 %1868 }
 0xbf7   : > { %6706 = vrcp.f32 %v1869_v44 }
 0xbfa   : > { %v2137_v46 = vpop.permute.xlu1 %2136 }
 0xbfb   : > { %6174 = vmatmul.mubr.msk.f32.vlgmr.msra.gmra.mrb[2].mxu0 %vm1282_vm7, %v2137_v46 }
 0xbfc   : > { %6182 = vmatpush3.xpose.msk.msra.mxu0 %vm1282_vm7, %v2306_v45  ;;  %6183 = vmatprep.mubr.msk.f32.mxu0 %vm6818_vm6, %v6817_v29 }
 0xbfd   : > { %6191 = vmatprep.subr.mxu0 %v6817_v29 }
 0xbfe   : > { %v2304_v47 = vpop.permute.xlu1 %2303 }
 0xbff   : > { %6184 = vmatmul.mubr.msk.f32.vlgmr.msra.gmra.mrb[4].mxu0 %vm1282_vm7, %v2304_v47 }
 0xc00   : > { %6192 = vmatpush3.xpose.msk.msra.mxu0 %vm1282_vm7, %v2473_v49  ;;  %6193 = vmatprep.mubr.msk.f32.mxu0 %vm6818_vm6, %v6817_v29 }
 0xc01   : > { %v6707_v50 = vpop.eup %6706 }
 0xc02   : > { %v1871_v51 = vmul.f32 %v6707_v50, %v6705_v34  ;;  %v2471_v52 = vpop.permute.xlu1 %2470  ;;  %v2656_v50 = vld [vmem:[%s7255_s4] sm:$0xff] }
 0xc03   : > { %6194 = vmatmul.mubr.msk.f32.vlgmr.msra.gmra.mrb[6].mxu0 %vm1282_vm7, %v2471_v52 }
 0xc04   : > { %6159 = vmatmul.mubr.msk.f32.vlgmr.msra.gmra.mrb[16].mxu1 %vm1372_vm9, %v1871_v51  ;;  %v2657_v51 = vld [vmem:[%s7255_s4 + $0x8] sm:$0xff] }
 0xc05   : > { %6162 = vmatpush3.xpose.msk.msra.mxu1 %vm1282_vm7, %v1972_v43  ;;  %6163 = vmatprep.mubr.msk.f32.mxu1 %vm6818_vm6, %v6817_v29  ;;  %v6450_v52 = vpack.c.bf16 %v2657_v51, %v2656_v50 }
 0xc06   : > { %6166 = vmatprep.subr.mxu1 %v6817_v29 }
 0xc08   : > { %6164 = vmatmul.mubr.msk.f32.vlgmr.msra.gmra.mrb[18].mxu1 %vm1282_vm7, %v7156_v16 }
 0xc09   : > { %6168 = vmatprep.mubr.msk.f32.mxu1 %vm6818_vm6, %v6817_v29 }
 0xcce   : > { %v2210_v54 = vpop.f32.mrb[2].mxu0 }
 0xccf   : > { %v2214_v56 = vmul.f32 0.35355338, %v2210_v54  ;;  %v6175_v57 = vpop.f32.mrb[3].mxu0 }
 0xcd0   : > { %v2658_v57 = vld [vmem:[%s7255_s4 + $0x10] sm:$0xff] }
 0xcd1   : > { %v2215_v59 = vsel %vm1358_vm8, %v2214_v56, -inf }
 0xcd2   : > { %2216 = vmax.xlane.f32.xlu1 %v2215_v59  ;;  %v2377_v60 = vpop.f32.mrb[4].mxu0  ;;  %v2659_v59 = vld [vmem:[%s7255_s4 + $0x18] sm:$0xff] }
 0xcd3   : > { %v6185_v61 = vpop.f32.mrb[5].mxu0  ;;  %v2381_v5 = vmul.f32 0.35355338, %v2377_v60  ;;  %v6454_v60 = vpack.c.bf16 %v2659_v59, %v2658_v57 }
 0xcd5   : > { %v2382_v9 = vsel %vm1358_vm8, %v2381_v5, -inf }
 0xcd6   : > { %v2544_v62 = vpop.f32.mrb[6].mxu0 }
 0xcd7   : > { %v7215_v63 = vpop.f32.mrb[16].mxu1  ;;  %v6195_v0 = vpop.f32.mrb[7].mxu0  ;;  %v2548_v7 = vmul.f32 0.35355338, %v2544_v62 }
 0xcd8   : > { %v6160_v1 = vpop.f32.mrb[17].mxu1 }
 0xcd9   : > { %v2549_v10 = vsel %vm1358_vm8, %v2548_v7, -inf }
 0xcdb   : > { %v2043_v2 = vpop.f32.mrb[18].mxu1 }
 0xcdc   : > { %v2047_v3 = vmul.f32 0.35355338, %v2043_v2  ;;  %v6165_v4 = vpop.f32.mrb[19].mxu1 }
 0xcde   : > { %v2048_v6 = vsel %vm1358_vm8, %v2047_v3, -inf }
 0xcdf   : > { %2049 = vmax.xlane.f32.xlu0 %v2048_v6 }
 0xce3   : > { %2383 = vmax.xlane.f32.xlu0 %v2382_v9 }
 0xce7   : > { %2550 = vmax.xlane.f32.xlu0 %v2549_v10 }
 0xd5f   : > { %v2217_v11 = vpop.xlane.xlu1 %2216 }
 0xd60   : > { %v2218_v12 = vsub.f32 %v2214_v56, %v2217_v11 }
 0xd62   : > { %v2219_v13 = vmul.f32 1.442695, %v2218_v12 }
 0xd64   : > { %6708 = vpow2.f32 %v2219_v13 }
 0xd6c   : > { %v2050_v14 = vpop.xlane.xlu0 %2049 }
 0xd6d   : > { %v2051_v17 = vsub.f32 %v2047_v3, %v2050_v14 }
 0xd6e   : > { %v6709_v15 = vpop.eup %6708 }
 0xd6f   : > { %v2221_v18 = vsel %vm1358_vm8, %v6709_v15, 0.0  ;;  %v2052_v21 = vmul.f32 1.442695, %v2051_v17 }
 0xd70   : > { %v2384_v19 = vpop.xlane.xlu0 %2383  ;;  %2222 = vadd.xlane.f32.xlu1 %v2221_v18 }
 0xd71   : > { %v2385_v20 = vsub.f32 %v2381_v5, %v2384_v19 }
 0xd73   : > { %v2386_v22 = vmul.f32 1.442695, %v2385_v20 }
 0xd74   : > { %v2551_v23 = vpop.xlane.xlu0 %2550 }
 0xd75   : > { %6710 = vpow2.f32 %v2386_v22  ;;  %v2552_v24 = vsub.f32 %v2548_v7, %v2551_v23 }
 0xd76   : > { %6712 = vpow2.f32 %v2052_v21 }
 0xd77   : > { %v2553_v25 = vmul.f32 1.442695, %v2552_v24 }
 0xd79   : > { %6714 = vpow2.f32 %v2553_v25 }
 0xd7f   : > { %v6711_v26 = vpop.eup %6710 }
 0xd80   : > { %v2388_v27 = vsel %vm1358_vm8, %v6711_v26, 0.0  ;;  %v6713_v30 = vpop.eup %6712 }
 0xd81   : > { %2389 = vadd.xlane.f32.xlu0 %v2388_v27  ;;  %v2054_v32 = vsel %vm1358_vm8, %v6713_v30, 0.0 }
 0xd83   : > { %v6715_v31 = vpop.eup %6714 }
 0xd84   : > { %v2555_v33 = vsel %vm1358_vm8, %v6715_v31, 0.0 }
 0xd85   : > { %2055 = vadd.xlane.f32.xlu0 %v2054_v32  ;;  %2556 = vadd.xlane.f32.xlu1 %v2555_v33 }
 0xd96   : > { %2226 = vrot.lane.b32.xlu1 %v7156_v16, %s8034_s26 }
 0xd9a   : > { %2393 = vrot.lane.b32.xlu1 %v7156_v16, %s7996_s7  ;;  %s8002_s7 = smov 24  }
 0xd9b   : > { %2059 = vrot.lane.b32.xlu0 %v7156_v16, %s8035_s28 }
 0xd9e   : > { %2560 = vrot.lane.b32.xlu1 %v7156_v16, %s7998_s5  ;;  %s8004_s5 = smov 16  }
 0xd9f   : > { %1950 = vrot.lane.b32.xlu0 %v7146_v8, %s8006_s29 }
 0xdfd   : > { %v2223_v36 = vpop.xlane.xlu1 %2222 }
 0xe0e   : > { %v2390_v35 = vpop.xlane.xlu0 %2389 }
 0xe12   : > { %v2056_v37 = vpop.xlane.xlu0 %2055  ;;  %v2557_v38 = vpop.xlane.xlu1 %2556 }
 0xe13   : > { %6716 = vrcp.f32 %v2056_v37  ;;  %v2795_v37 = vld [vmem:[%s7303_s27] sm:$0xff] }
 0xe14   : > { %6718 = vrcp.f32 %v2223_v36 }
 0xe15   : > { %6720 = vrcp.f32 %v2390_v35 }
 0xe16   : > { %v2060_v39 = vpop.permute.xlu0 %2059  ;;  %v2227_v40 = vpop.permute.xlu1 %2226  ;;  %6722 = vrcp.f32 %v2557_v38  ;;  %v2796_v38 = vld [vmem:[%s7303_s27 + $0x8] sm:$0xff] }
 0xe17   : > { %6167 = vmatpush3.msk.msra.mxu1 %vm1136_vm2, %v2060_v39  ;;  %v6458_v39 = vpack.c.bf16 %v2796_v38, %v2795_v37 }
 0xe18   : > { %6176 = vmatprep.subr.mxu1 %v6817_v29 }
 0xe1a   : > { %v2394_v43 = vpop.permute.xlu1 %2393  ;;  %v1951_v4 = vpop.permute.xlu0 %1950 }
 0xe1b   : > { %v1961_v12 = vsel %vm1282_vm7, %v7126_v53, %v1951_v4 }
 0xe1d   : > { %v6717_v34 = vpop.eup %6716 }
 0xe1e   : > { %v2058_v16 = vmul.f32 %v6717_v34, %v6713_v30  ;;  %v6719_v42 = vpop.eup %6718  ;;  %v2561_v47 = vpop.permute.xlu1 %2560  ;;  %v2798_v34 = vld [vmem:[%s7303_s27 + $0x18] sm:$0xff] }
 0xe1f   : > { %v2225_v8 = vmul.f32 %v6719_v42, %v6709_v15  ;;  %v6721_v44 = vpop.eup %6720 }
 0xe20   : > { %6169 = vmatmul.mubr.msk.f32.vlgmr.msra.gmra.mrb[20].mxu1 %vm1372_vm9, %v2058_v16  ;;  %v2392_v45 = vmul.f32 %v6721_v44, %v6711_v26  ;;  %v6723_v46 = vpop.eup %6722 }
 0xe21   : > { %6177 = vmatpush3.msk.msra.mxu1 %vm1136_vm2, %v2227_v40  ;;  %6178 = vmatprep.mubr.msk.f32.mxu1 %vm6818_vm6, %v6817_v29  ;;  %v2559_v49 = vmul.f32 %v6723_v46, %v6715_v31  ;;  %v2797_v40 = vld [vmem:[%s7303_s27 + $0x10] sm:$0xff] }
 0xe22   : > { %6186 = vmatprep.subr.mxu1 %v6817_v29  ;;  %v6462_v16 = vpack.c.bf16 %v2798_v34, %v2797_v40 }
 0xe24   : > { %6179 = vmatmul.mubr.msk.f32.vlgmr.msra.gmra.mrb[22].mxu1 %vm1372_vm9, %v2225_v8 }
 0xe25   : > { %6187 = vmatpush3.msk.msra.mxu1 %vm1136_vm2, %v2394_v43  ;;  %6188 = vmatprep.mubr.msk.f32.mxu1 %vm6818_vm6, %v6817_v29 }
 0xe26   : > { %6196 = vmatprep.subr.mxu1 %v6817_v29 }
 0xe28   : > { %6189 = vmatmul.mubr.msk.f32.vlgmr.msra.gmra.mrb[24].mxu1 %vm1372_vm9, %v2392_v45 }
 0xe29   : > { %6197 = vmatpush3.msk.msra.mxu1 %vm1136_vm2, %v2561_v47  ;;  %6198 = vmatprep.mubr.msk.f32.mxu1 %vm6818_vm6, %v6817_v29 }
 0xe2a   : > { %6451 = vmatprep.subr.bf16.mxu1 %v6450_v52 }
 0xe2c   : > { %6199 = vmatmul.mubr.msk.f32.vlgmr.msra.gmra.mrb[26].mxu1 %vm1372_vm9, %v2559_v49 }
 0xe2d   : > { %6453 = vmatpush3.bf16.msra.mxu1 %v6450_v52  ;;  %v5798_v52 = vld [vmem:[%s7321_s23] ss:$0 sm:$0xff] }
 0xe2e   : > { %6455 = vmatprep.subr.bf16.mxu1 %v6454_v60 }
 0xe31   : > { %6457 = vmatpush3.bf16.msra.mxu1 %v6454_v60 }
 0xe32   : > { %6459 = vmatprep.subr.bf16.mxu1 %v6458_v39 }
 0xef3   : > { %v2132_v54 = vpop.f32.mrb[20].mxu1 }
 0xef4   : > { %v6170_v56 = vpop.f32.mrb[21].mxu1 }
 0xef7   : > { %v2299_v61 = vpop.f32.mrb[22].mxu1 }
 0xef8   : > { %2638 = vrot.lane.b32.xlu0 %v2299_v61, %s8006_s29  ;;  %v6180_v62 = vpop.f32.mrb[23].mxu1  ;;  %s7282_s29 = scalar_lea.vmem %s8037_s10, %s7065_s25  ;;  %s7313_s10 = scalar_lea.vmem %s7973_s15, %s5903_s1 }
 0xef9   : > { %v5797_v53 = vld [vmem:[%s7282_s29] ss:$0 sm:$0xff]  ;;  %v2906_v8 = vld [vmem:[%s7313_s10 + $0x8] sm:$0xff]  ;;  %s7352_s1 = scalar_lea.vmem %s7972_s14, %s7065_s25 }
 0xefa   : > { %v2905_v42 = vld [vmem:[%s7313_s10] sm:$0xff] }
 0xefb   : > { %v2466_v0 = vpop.f32.mrb[24].mxu1  ;;  %v6466_v43 = vpack.c.bf16 %v2906_v8, %v2905_v42  ;;  %v2909_v4 = vld [vmem:[%s7313_s10 + $0x20] sm:$0xff] }
 0xefc   : > { %1954 = vrot.lane.b32.xlu0 %v7173_v28, %s8004_s5  ;;  %2642 = vrot.lane.b32.xlu1 %v2466_v0, %s8004_s5  ;;  %v6190_v1 = vpop.f32.mrb[25].mxu1  ;;  %s8043_s5 = smov 112  }
 0xefd   : > { %6467 = vmatprep.subr.bf16.mxu0 %v6466_v43  ;;  %v2907_v1 = vld [vmem:[%s7313_s10 + $0x10] sm:$0xff] }
 0xefe   : > { %6469 = vmatpush3.bf16.msra.mxu0 %v6466_v43 }
 0xeff   : > { %v2633_v2 = vpop.f32.mrb[26].mxu1 }
 0xf00   : > { %2646 = vrot.lane.b32.xlu1 %v2633_v2, %s8002_s7  ;;  %v6200_v3 = vpop.f32.mrb[27].mxu1  ;;  %v2908_v2 = vld [vmem:[%s7313_s10 + $0x18] sm:$0xff] }
 0xf01   : > { %v6470_v3 = vpack.c.bf16 %v2908_v2, %v2907_v1 }
 0xf03   : > { %6471 = vmatprep.subr.bf16.mxu0 %v6470_v3 }
 0xf04   : > { %1958 = vrot.lane.b32.xlu1 %v7215_v63, %s8002_s7  ;;  %s7327_s7 = scalar_lea.vmem %s7970_s12, %s7065_s25  ;;  %6473 = vmatpush3.bf16.msra.mxu0 %v6470_v3  ;;  %v5808_v3 = vld [vmem:[%s7058_s0 + $0x20] sm:$0xff]  ;;  %s8039_s25 = smov 88  }
 0xf05   : > { %v5799_v56 = vld [vmem:[%s7327_s7] ss:$0 sm:$0xff] }
 0xf6a   : > { %v2639_v5 = vpop.permute.xlu0 %2638 }
 0xf6b   : > { %v2649_v7 = vsel %vm1282_vm7, %v2132_v54, %v2639_v5  ;;  %v2910_v5 = vld [vmem:[%s7313_s10 + $0x28] sm:$0xff] }
 0xf6e   : > { %v2643_v6 = vpop.permute.xlu1 %2642  ;;  %v1955_v10 = vpop.permute.xlu0 %1954 }
 0xf6f   : > { %v2650_v28 = vsel %vm1962_vm11, %v2649_v7, %v2643_v6  ;;  %v1963_v13 = vsel %vm1962_vm11, %v1961_v12, %v1955_v10  ;;  %v6474_v6 = vpack.c.bf16 %v2910_v5, %v2909_v4  ;;  %v2911_v7 = vld [vmem:[%s7313_s10 + $0x30] sm:$0xff]  ;;  %v2913_v10 = vld [vmem:[%s7313_s10 + $0x40] sm:$0xff]  ;;  %v5809_v4 = vld [vmem:[%s7058_s0 + $0x28] sm:$0xff] }
 0xf70   : > { %v6498_v5 = vpack.c.bf16 %v5809_v4, %v5808_v3 }
 0xf71   : > { %6475 = vmatprep.subr.bf16.mxu0 %v6474_v6 }
 0xf72   : > { %v2647_v9 = vpop.permute.xlu1 %2646  ;;  %6477 = vmatpush3.bf16.msra.mxu0 %v6474_v6  ;;  %v5810_v6 = vld [vmem:[%s7058_s0 + $0x30] sm:$0xff] }
 0xf73   : > { %v2651_v11 = vsel %vm1964_vm12, %v2650_v28, %v2647_v9  ;;  %v2912_v28 = vld [vmem:[%s7313_s10 + $0x38] sm:$0xff] }
 0xf74   : > { %v2653_v63 = vrot.slane %v2651_v11, 3  ;;  %v6478_v9 = vpack.c.bf16 %v2912_v28, %v2911_v7  ;;  %v2914_v11 = vld [vmem:[%s7313_s10 + $0x48] sm:$0xff]  ;;  %v5811_v7 = vld [vmem:[%s7058_s0 + $0x38] sm:$0xff]  ;;  %s8038_s0 = smov 96  }
 0xf75   : > { %v6482_v12 = vpack.c.bf16 %v2914_v11, %v2913_v10  ;;  %v6502_v28 = vpack.c.bf16 %v5811_v7, %v5810_v6 }
 0xf76   : > { %v1959_v14 = vpop.permute.xlu1 %1958  ;;  %6479 = vmatprep.subr.bf16.mxu0 %v6478_v9 }
 0xf77   : > { %v1965_v15 = vsel %vm1964_vm12, %v1963_v13, %v1959_v14  ;;  %v2915_v13 = vld [vmem:[%s7313_s10 + $0x50] sm:$0xff]  ;;  %6481 = vmatpush3.bf16.msra.mxu0 %v6478_v9 }
 0xf78   : > { %v2655_v17 = vsel %vm1136_vm2, %v1965_v15, %v2653_v63  ;;  %6483 = vmatprep.subr.bf16.mxu0 %v6482_v12  ;;  %v2917_v15 = vld [vmem:[%s7313_s10 + $0x60] sm:$0xff] }
 0xf79   : > { %6209 = vmatprep.mubr.msk.f32.mxu1 %vm1142_vm4, %v2655_v17  ;;  %v2918_v17 = vld [vmem:[%s7313_s10 + $0x68] sm:$0xff] }
 0xf7a   : > { %6210 = vmatmul.mubr.msk.f32.vlgmr.msra.gmra.mrb[28].mxu1 %vm1142_vm4, %v2653_v63  ;;  %v2916_v63 = vld [vmem:[%s7313_s10 + $0x58] sm:$0xff] }
 0xf7b   : > { %6461 = vmatpush3.bf16.msra.mxu1 %v6458_v39  ;;  %v6486_v14 = vpack.c.bf16 %v2916_v63, %v2915_v13  ;;  %6485 = vmatpush3.bf16.msra.mxu0 %v6482_v12 }
 0xf7c   : > { %6463 = vmatprep.subr.bf16.mxu1 %v6462_v16 }
 0xf7d   : > { %6487 = vmatprep.subr.bf16.mxu0 %v6486_v14 }
 0xf7f   : > { %6465 = vmatpush3.bf16.msra.mxu1 %v6462_v16  ;;  %6489 = vmatpush3.bf16.msra.mxu0 %v6486_v14 }
 0xf80   : > { %6499 = vmatprep.subr.bf16.mxu1 %v6498_v5 }
0x104d   : > { %v6211_v18 = vpop.f32.mrb[28].mxu1 }
0x104e   : > { %v2741_v19 = vadd.f32 %v6211_v18, %v7036_v55  ;;  %v2731_v20 = vpop.f32.mrb[29].mxu1  ;;  %v6490_v18 = vpack.c.bf16 %v2918_v17, %v2917_v15  ;;  %v5806_v15 = vld [vmem:[%s7071_s6 + $0x1] ss:$0 sm:$0xff]  ;;  %s8040_s6 = smov 120  }
0x104f   : > { %v2740_v21 = vadd.f32 %v2731_v20, %v7041_v58 }
0x1050   : > { %v7287_v22 = vadd.f32 %v5797_v53, %v2741_v19  ;;  %v2920_v19 = vld [vmem:[%s7313_s10 + $0x78] sm:$0xff]  ;;  %6491 = vmatprep.subr.bf16.mxu0 %v6490_v18 }
0x1051   : > { %v7289_v23 = vadd.f32 %v5797_v53, %v2740_v21  ;;  %v2919_v53 = vld [vmem:[%s7313_s10 + $0x70] sm:$0xff]  ;;  %6493 = vmatpush3.bf16.msra.mxu0 %v6490_v18  ;;  %v5800_v21 = vld [vmem:[%s7352_s1] ss:$0 sm:$0xff] }
0x1052   : > { %v2756_v24 = vsel %vm1146_vm5, %v7287_v22, 0.0  ;;  %v6494_v20 = vpack.c.bf16 %v2920_v19, %v2919_v53  ;;  %v5807_v53 = vld [vmem:[%s7077_s2 + $0x1] ss:$0 sm:$0xff]  ;;  %s8041_s2 = smov 80  }
0x1053   : > { %2757 = vadd.xlane.f32.xlu1 %v2756_v24  ;;  %v2753_v25 = vsel %vm1142_vm4, %v7289_v23, 0.0 }
0x1054   : > { %2754 = vadd.xlane.f32.xlu0 %v2753_v25  ;;  %6495 = vmatprep.subr.bf16.mxu0 %v6494_v20 }
0x1055   : > { %6497 = vmatpush3.bf16.msra.mxu0 %v6494_v20 }
0x1056   : > { %6299 = vmatprep.subr.mxu0 %v6817_v29 }
0x10e0   : > { %v2758_v26 = vpop.xlane.xlu1 %2757 }
0x10e1   : > { %v2760_v27 = vmul.f32 0.03125, %v2758_v26  ;;  %v2755_v55 = vpop.xlane.xlu0 %2754 }
0x10e2   : > { %v2759_v30 = vmul.f32 0.03125, %v2755_v55 }
0x10e3   : > { %v2762_v58 = vsub.f32 %v7287_v22, %v2760_v27 }
0x10e4   : > { %v2761_v31 = vsub.f32 %v7289_v23, %v2759_v30 }
0x10e5   : > { %v2764_v35 = vmul.f32 %v2762_v58, %v2762_v58 }
0x10e6   : > { %v2763_v32 = vmul.f32 %v2761_v31, %v2761_v31 }
0x10e7   : > { %v2768_v36 = vsel %vm1146_vm5, %v2764_v35, 0.0 }
0x10e8   : > { %v2765_v33 = vsel %vm1142_vm4, %v2763_v32, 0.0 }
0x10e9   : > { %2766 = vadd.xlane.f32.xlu0 %v2765_v33 }
0x10ed   : > { %2769 = vadd.xlane.f32.xlu0 %v2768_v36 }
0x1176   : > { %v2767_v44 = vpop.xlane.xlu0 %2766 }
0x1177   : > { %v2771_v45 = vmul.f32 0.03125, %v2767_v44 }
0x1179   : > { %v2773_v46 = vadd.f32 1e-06, %v2771_v45 }
0x117a   : > { %v2770_v47 = vpop.xlane.xlu0 %2769 }
0x117b   : > { %6724 = vrsqrt.f32 %v2773_v46  ;;  %v2772_v49 = vmul.f32 0.03125, %v2770_v47  ;;  %v5803_v46 = vld [vmem:[%s7361_s9] ss:$0 sm:$0xff] }
0x117d   : > { %v2774_v50 = vadd.f32 1e-06, %v2772_v49 }
0x117f   : > { %6726 = vrsqrt.f32 %v2774_v50 }
0x1185   : > { %v6725_v51 = vpop.eup %6724 }
0x1186   : > { %v2777_v54 = vmul.f32 %v6725_v51, %v2761_v31 }
0x1188   : > { %v2785_v57 = vmul.f32 %v5798_v52, %v2777_v54 }
0x1189   : > { %v6727_v59 = vpop.eup %6726 }
0x118a   : > { %v2778_v60 = vmul.f32 %v6727_v59, %v2762_v58  ;;  %v2793_v61 = vadd.f32 %v5799_v56, %v2785_v57 }
0x118c   : > { %v2786_v62 = vmul.f32 %v5798_v52, %v2778_v60  ;;  %6220 = vmatprep.mubr.msk.f32.mxu1 %vm1142_vm4, %v2793_v61 }
0x118e   : > { %v2794_v0 = vadd.f32 %v5799_v56, %v2786_v62 }
0x1190   : > { %6221 = vmatmul.mubr.msk.f32.vlgmr.msra.gmra.mrb[30].mxu1 %vm1142_vm4, %v2794_v0 }
0x1191   : > { %6501 = vmatpush3.bf16.msra.mxu1 %v6498_v5 }
0x1192   : > { %6503 = vmatprep.subr.bf16.mxu1 %v6502_v28 }
0x1195   : > { %6505 = vmatpush3.bf16.msra.mxu1 %v6502_v28 }
0x1196   : > { %6269 = vmatprep.subr.mxu1 %v6817_v29 }
0x1263   : > { %v6222_v24 = vpop.f32.mrb[30].mxu1 }
0x1264   : > { %v2884_v25 = vadd.f32 %v6222_v24, %v5800_v21  ;;  %v2878_v26 = vpop.f32.mrb[31].mxu1 }
0x1265   : > { %v2879_v27 = vadd.f32 %v5800_v21, %v2878_v26  ;;  %v5813_v26 = vld [vmem:[%s7093_s3 + $0x1] ss:$0 sm:$0xff]  ;;  %s8042_s3 = smov 72  }
0x1266   : > { %v2890_v55 = vmul.f32 0.044715, %v2884_v25  ;;  %v2888_v8 = vmul.f32 0.5, %v2884_v25 }
0x1267   : > { %v2889_v30 = vmul.f32 0.044715, %v2879_v27  ;;  %v2887_v16 = vmul.f32 0.5, %v2879_v27 }
0x1268   : > { %v2892_v58 = vmul.f32 %v2890_v55, %v2884_v25 }
0x1269   : > { %v2891_v31 = vmul.f32 %v2889_v30, %v2879_v27 }
0x126a   : > { %v2894_v32 = vmul.f32 %v2892_v58, %v2884_v25 }
0x126b   : > { %v2893_v33 = vmul.f32 %v2891_v31, %v2879_v27 }
0x126c   : > { %v2896_v35 = vadd.f32 %v2894_v32, %v2884_v25 }
0x126d   : > { %v2895_v36 = vadd.f32 %v2893_v33, %v2879_v27 }
0x126e   : > { %v2898_v37 = vmul.f32 0.7978846, %v2896_v35 }
0x126f   : > { %v2897_v38 = vmul.f32 0.7978846, %v2895_v36 }
0x1270   : > { %6728 = vtanh.f32 %v2898_v37 }
0x1271   : > { %6730 = vtanh.f32 %v2897_v38 }
0x127a   : > { %v6729_v39 = vpop.eup %6728 }
0x127b   : > { %v6731_v40 = vpop.eup %6730  ;;  %v2902_v34 = vadd.f32 1.0, %v6729_v39 }
0x127c   : > { %v2901_v42 = vadd.f32 1.0, %v6731_v40 }
0x127d   : > { %v2904_v44 = vmul.f32 %v2902_v34, %v2888_v8 }
0x127e   : > { %v2903_v43 = vmul.f32 %v2901_v42, %v2887_v16 }
0x1280   : > { %6255 = vmatprep.mubr.f32.mxu0 %v2903_v43 }
0x1281   : > { %6256 = vmatmul.mubr.f32.vlgmr.msra.gmra.mrb[8].mxu0 %v2904_v44 }
0x1282   : > { %6301 = vmatprep.mubr.msk.f32.mxu0 %vm6818_vm6, %v6817_v29 }
0x1354   : > { %v6257_v45 = vpop.f32.mrb[8].mxu0 }
0x1355   : > { %v2997_v47 = vadd.f32 %v6257_v45, %v7287_v22  ;;  %v2987_v49 = vpop.f32.mrb[9].mxu0 }
0x1356   : > { %v2996_v50 = vadd.f32 %v2987_v49, %v7289_v23 }
0x1357   : > { %v7366_v51 = vadd.f32 %v5803_v46, %v2997_v47 }
0x1358   : > { %v7368_v52 = vadd.f32 %v5803_v46, %v2996_v50 }
0x1359   : > { %v3014_v54 = vsel %vm1146_vm5, %v7366_v51, 0.0 }
0x135a   : > { %3015 = vadd.xlane.f32.xlu1 %v3014_v54  ;;  %v3011_v56 = vsel %vm1142_vm4, %v7368_v52, 0.0 }
0x135b   : > { %3012 = vadd.xlane.f32.xlu0 %v3011_v56 }
0x13e7   : > { %v3016_v57 = vpop.xlane.xlu1 %3015 }
0x13e8   : > { %v3018_v22 = vmul.f32 0.03125, %v3016_v57  ;;  %v3013_v59 = vpop.xlane.xlu0 %3012 }
0x13e9   : > { %v3017_v23 = vmul.f32 0.03125, %v3013_v59 }
0x13ea   : > { %v3020_v60 = vsub.f32 %v7366_v51, %v3018_v22 }
0x13eb   : > { %v3019_v61 = vsub.f32 %v7368_v52, %v3017_v23 }
0x13ec   : > { %v3022_v62 = vmul.f32 %v3020_v60, %v3020_v60 }
0x13ed   : > { %v3021_v0 = vmul.f32 %v3019_v61, %v3019_v61 }
0x13ee   : > { %v3026_v1 = vsel %vm1146_vm5, %v3022_v62, 0.0 }
0x13ef   : > { %3027 = vadd.xlane.f32.xlu1 %v3026_v1  ;;  %v3023_v2 = vsel %vm1142_vm4, %v3021_v0, 0.0 }
0x13f0   : > { %3024 = vadd.xlane.f32.xlu0 %v3023_v2 }
0x147c   : > { %v3028_v9 = vpop.xlane.xlu1 %3027 }
0x147d   : > { %v3030_v10 = vmul.f32 0.03125, %v3028_v9  ;;  %v3025_v11 = vpop.xlane.xlu0 %3024 }
0x147e   : > { %v3029_v12 = vmul.f32 0.03125, %v3025_v11 }
0x147f   : > { %v3032_v13 = vadd.f32 1e-06, %v3030_v10 }
0x1480   : > { %v3031_v63 = vadd.f32 1e-06, %v3029_v12 }
0x1481   : > { %6732 = vrsqrt.f32 %v3032_v13 }
0x1482   : > { %6734 = vrsqrt.f32 %v3031_v63 }
0x148b   : > { %v6733_v14 = vpop.eup %6732 }
0x148c   : > { %v6735_v17 = vpop.eup %6734  ;;  %v3036_v18 = vmul.f32 %v6733_v14, %v3020_v60 }
0x148d   : > { %v3035_v19 = vmul.f32 %v6735_v17, %v3019_v61 }
0x148e   : > { %v3044_v20 = vmul.f32 %v5806_v15, %v3036_v18 }
0x148f   : > { %v3043_v21 = vmul.f32 %v5806_v15, %v3035_v19 }
0x1490   : > { %v3052_v24 = vadd.f32 %v5807_v53, %v3044_v20 }
0x1491   : > { %v3051_v25 = vadd.f32 %v5807_v53, %v3043_v21 }
0x1493   : > { %6266 = vmatprep.mubr.msk.f32.mxu1 %vm1142_vm4, %v3051_v25 }
0x1494   : > { %6267 = vmatmul.mubr.msk.f32.vlgmr.msra.gmra.mrb[32].mxu1 %vm1142_vm4, %v3052_v24 }
0x1495   : > { %6271 = vmatprep.mubr.msk.f32.mxu1 %vm6818_vm6, %v6817_v29 }
0x1567   : > { %v6268_v27 = vpop.f32.mrb[32].mxu1 }
0x1568   : > { %v3144_v55 = vadd.f32 %v6268_v27, %v5813_v26  ;;  %v3138_v30 = vpop.f32.mrb[33].mxu1 }
0x1569   : > { %v7390_v58 = vadd.f32 %v5813_v26, %v3138_v30 }
0x156a   : > { %v3831_v59 = vrot.slane %v3144_v55, 5 }
0x156b   : > { %3148 = vrot.lane.b32.xlu0 %v7390_v58, %s8038_s0  ;;  %v3830_v23 = vrot.slane %v7390_v58, 5 }
0x156d   : > { %v7437_v60 = vsel %vm1967_vm10, %v3830_v23, %v3831_v59 }
0x156f   : > { %3315 = vrot.lane.b32.xlu0 %v7390_v58, %s8039_s25 }
0x15dd   : > { %v3149_v31 = vpop.permute.xlu0 %3148 }
0x15de   : > { %6270 = vmatpush3.xpose.msk.msra.mxu1 %vm1282_vm7, %v3149_v31 }
0x15df   : > { %6274 = vmatprep.subr.mxu1 %v6817_v29 }
0x15e1   : > { %6272 = vmatmul.mubr.msk.f32.vlgmr.msra.gmra.mrb[34].mxu1 %vm1282_vm7, %v7390_v58  ;;  %v3316_v47 = vpop.permute.xlu0 %3315 }
0x15e2   : > { %6276 = vmatprep.mubr.msk.f32.mxu1 %vm6818_vm6, %v6817_v29 }
0x16b4   : > { %v3220_v32 = vpop.f32.mrb[34].mxu1 }
0x16b5   : > { %v3224_v33 = vmul.f32 0.35355338, %v3220_v32  ;;  %v6273_v35 = vpop.f32.mrb[35].mxu1 }
0x16b7   : > { %v3225_v36 = vsel %vm1358_vm8, %v3224_v33, -inf }
0x16b8   : > { %3226 = vmax.xlane.f32.xlu1 %v3225_v36 }
0x16c9   : > { %3236 = vrot.lane.b32.xlu1 %v7390_v58, %s8035_s28 }
0x1745   : > { %v3227_v37 = vpop.xlane.xlu1 %3226 }
0x1746   : > { %v3228_v38 = vsub.f32 %v3224_v33, %v3227_v37 }
0x1748   : > { %v3229_v39 = vmul.f32 1.442695, %v3228_v38 }
0x1749   : > { %v3237_v40 = vpop.permute.xlu1 %3236 }
0x174a   : > { %6736 = vpow2.f32 %v3229_v39  ;;  %6275 = vmatpush3.msk.msra.mxu1 %vm1136_vm2, %v3237_v40 }
0x174b   : > { %6279 = vmatprep.subr.mxu1 %v6817_v29 }
0x1754   : > { %v6737_v34 = vpop.eup %6736 }
0x1755   : > { %v3231_v16 = vsel %vm1358_vm8, %v6737_v34, 0.0 }
0x1756   : > { %3232 = vadd.xlane.f32.xlu1 %v3231_v16 }
0x1767   : > { %3313 = vrot.lane.b32.xlu1 %v7390_v58, %s8040_s6 }
0x176b   : > { %3482 = vrot.lane.b32.xlu1 %v7390_v58, %s8041_s2 }
0x176f   : > { %3649 = vrot.lane.b32.xlu1 %v7390_v58, %s8042_s3 }
0x17e3   : > { %v3233_v42 = vpop.xlane.xlu1 %3232 }
0x17e4   : > { %6738 = vrcp.f32 %v3233_v42 }
0x17e7   : > { %v3314_v8 = vpop.permute.xlu1 %3313 }
0x17eb   : > { %v7414_v43 = vpop.permute.xlu1 %3482 }
0x17ee   : > { %v6739_v44 = vpop.eup %6738 }
0x17ef   : > { %v3235_v45 = vmul.f32 %v6739_v44, %v6737_v34  ;;  %v3650_v46 = vpop.permute.xlu1 %3649 }
0x17f0   : > { %6300 = vmatpush3.xpose.msk.msra.mxu0 %vm1282_vm7, %v3650_v46 }
0x17f1   : > { %6277 = vmatmul.mubr.msk.f32.vlgmr.msra.gmra.mrb[36].mxu1 %vm1372_vm9, %v3235_v45  ;;  %6309 = vmatprep.subr.mxu0 %v6817_v29 }
0x17f2   : > { %6280 = vmatpush3.xpose.msk.msra.mxu1 %vm1282_vm7, %v3316_v47  ;;  %6281 = vmatprep.mubr.msk.f32.mxu1 %vm6818_vm6, %v6817_v29 }
0x17f3   : > { %6284 = vmatprep.subr.mxu1 %v6817_v29 }
0x17f5   : > { %6282 = vmatmul.mubr.msk.f32.vlgmr.msra.gmra.mrb[38].mxu1 %vm1282_vm7, %v3314_v8 }
0x17f6   : > { %6286 = vmatprep.mubr.msk.f32.mxu1 %vm6818_vm6, %v6817_v29 }
0x18c4   : > { %v7426_v49 = vpop.f32.mrb[36].mxu1 }
0x18c5   : > { %v6278_v50 = vpop.f32.mrb[37].mxu1 }
0x18c8   : > { %v3387_v54 = vpop.f32.mrb[38].mxu1 }
0x18c9   : > { %v3391_v56 = vmul.f32 0.35355338, %v3387_v54  ;;  %v6283_v57 = vpop.f32.mrb[39].mxu1 }
0x18cb   : > { %v3392_v22 = vsel %vm1358_vm8, %v3391_v56, -inf }
0x18cc   : > { %3393 = vmax.xlane.f32.xlu0 %v3392_v22 }
0x18e2   : > { %3403 = vrot.lane.b32.xlu0 %v7390_v58, %s8034_s26 }
0x18e6   : > { %3480 = vrot.lane.b32.xlu0 %v7390_v58, %s8043_s5 }
0x18ea   : > { %3647 = vrot.lane.b32.xlu0 %v7390_v58, %s8044_s8 }
0x18ee   : > { %4000 = vrot.lane.b32.xlu0 %v7437_v60, %s8039_s25  ;;  %s8046_s25 = smov 48  }
0x18f2   : > { %4167 = vrot.lane.b32.xlu0 %v7437_v60, %s8041_s2 }
0x18f6   : > { %4334 = vrot.lane.b32.xlu0 %v7437_v60, %s8042_s3 }
0x1959   : > { %v3394_v61 = vpop.xlane.xlu0 %3393 }
0x195a   : > { %v3395_v62 = vsub.f32 %v3391_v56, %v3394_v61 }
0x195c   : > { %v3396_v0 = vmul.f32 1.442695, %v3395_v62 }
0x195d   : > { %v3404_v1 = vpop.permute.xlu0 %3403 }
0x195e   : > { %6740 = vpow2.f32 %v3396_v0  ;;  %6285 = vmatpush3.msk.msra.mxu1 %vm1136_vm2, %v3404_v1 }
0x195f   : > { %6289 = vmatprep.subr.mxu1 %v6817_v29 }
0x1961   : > { %v3481_v2 = vpop.permute.xlu0 %3480 }
0x1965   : > { %v3648_v3 = vpop.permute.xlu0 %3647 }
0x1966   : > { %6302 = vmatmul.mubr.msk.f32.vlgmr.msra.gmra.mrb[10].mxu0 %vm1282_vm7, %v3648_v3 }
0x1967   : > { %6311 = vmatprep.mubr.msk.f32.mxu0 %vm6818_vm6, %v6817_v29 }
0x1968   : > { %v6741_v4 = vpop.eup %6740 }
0x1969   : > { %v3398_v5 = vsel %vm1358_vm8, %v6741_v4, 0.0  ;;  %v4001_v7 = vpop.permute.xlu0 %4000 }
0x196a   : > { %3399 = vadd.xlane.f32.xlu1 %v3398_v5 }
0x196d   : > { %v4168_v10 = vpop.permute.xlu0 %4167 }
0x1971   : > { %v4335_v63 = vpop.permute.xlu0 %4334 }
0x197b   : > { %3833 = vrot.lane.b32.xlu1 %v7437_v60, %s8038_s0  ;;  %s8045_s0 = smov 40  }
0x197f   : > { %3998 = vrot.lane.b32.xlu1 %v7437_v60, %s8040_s6  ;;  %s8047_s6 = smov 8  }
0x1983   : > { %4165 = vrot.lane.b32.xlu1 %v7437_v60, %s8043_s5 }
0x1987   : > { %4332 = vrot.lane.b32.xlu1 %v7437_v60, %s8044_s8 }
0x19f7   : > { %v3400_v6 = vpop.xlane.xlu1 %3399 }
0x19f8   : > { %6742 = vrcp.f32 %v3400_v6 }
0x19fb   : > { %v3834_v28 = vpop.permute.xlu1 %3833 }
0x19fc   : > { %6310 = vmatpush3.xpose.msk.msra.mxu0 %vm1282_vm7, %v3834_v28 }
0x19fd   : > { %6319 = vmatprep.subr.mxu0 %v6817_v29 }
0x19ff   : > { %6312 = vmatmul.mubr.msk.f32.vlgmr.msra.gmra.mrb[12].mxu0 %vm1282_vm7, %v7437_v60  ;;  %v3999_v9 = vpop.permute.xlu1 %3998 }
0x1a00   : > { %6320 = vmatpush3.xpose.msk.msra.mxu0 %vm1282_vm7, %v4001_v7  ;;  %6321 = vmatprep.mubr.msk.f32.mxu0 %vm6818_vm6, %v6817_v29 }
0x1a01   : > { %6329 = vmatprep.subr.mxu0 %v6817_v29 }
0x1a02   : > { %v6743_v11 = vpop.eup %6742 }
0x1a03   : > { %v3402_v12 = vmul.f32 %v6743_v11, %v6741_v4  ;;  %6322 = vmatmul.mubr.msk.f32.vlgmr.msra.gmra.mrb[14].mxu0 %vm1282_vm7, %v3999_v9  ;;  %v4166_v13 = vpop.permute.xlu1 %4165 }
0x1a04   : > { %6330 = vmatpush3.xpose.msk.msra.mxu0 %vm1282_vm7, %v4168_v10  ;;  %6331 = vmatprep.mubr.msk.f32.mxu0 %vm6818_vm6, %v6817_v29 }
0x1a05   : > { %6287 = vmatmul.mubr.msk.f32.vlgmr.msra.gmra.mrb[40].mxu1 %vm1372_vm9, %v3402_v12  ;;  %6339 = vmatprep.subr.mxu0 %v6817_v29 }
0x1a06   : > { %6290 = vmatpush3.xpose.msk.msra.mxu1 %vm1282_vm7, %v7414_v43  ;;  %6291 = vmatprep.mubr.msk.f32.mxu1 %vm6818_vm6, %v6817_v29 }
0x1a07   : > { %6332 = vmatmul.mubr.msk.f32.vlgmr.msra.gmra.mrb[16].mxu0 %vm1282_vm7, %v4166_v13  ;;  %6294 = vmatprep.subr.mxu1 %v6817_v29  ;;  %v4333_v14 = vpop.permute.xlu1 %4332 }
0x1a08   : > { %6340 = vmatpush3.xpose.msk.msra.mxu0 %vm1282_vm7, %v4335_v63  ;;  %6341 = vmatprep.mubr.msk.f32.mxu0 %vm6818_vm6, %v6817_v29 }
0x1a09   : > { %6292 = vmatmul.mubr.msk.f32.vlgmr.msra.gmra.mrb[42].mxu1 %vm1282_vm7, %v3481_v2 }
0x1a0a   : > { %6296 = vmatprep.mubr.msk.f32.mxu1 %vm6818_vm6, %v6817_v29 }
0x1a0b   : > { %6342 = vmatmul.mubr.msk.f32.vlgmr.msra.gmra.mrb[18].mxu0 %vm1282_vm7, %v4333_v14 }
0x1a39   : > { %v3721_v15 = vpop.f32.mrb[10].mxu0 }
0x1a3a   : > { %v3725_v17 = vmul.f32 0.35355338, %v3721_v15  ;;  %v6303_v18 = vpop.f32.mrb[11].mxu0 }
0x1a3c   : > { %v3726_v53 = vsel %vm1358_vm8, %v3725_v17, -inf }
0x1a3d   : > { %3727 = vmax.xlane.f32.xlu1 %v3726_v53 }
0x1aca   : > { %v3728_v19 = vpop.xlane.xlu1 %3727 }
0x1acb   : > { %v3729_v20 = vsub.f32 %v3725_v17, %v3728_v19 }
0x1acd   : > { %v3730_v25 = vmul.f32 1.442695, %v3729_v20 }
0x1acf   : > { %6744 = vpow2.f32 %v3730_v25 }
0x1ad2   : > { %v3905_v21 = vpop.f32.mrb[12].mxu0 }
0x1ad3   : > { %v6313_v24 = vpop.f32.mrb[13].mxu0  ;;  %v3909_v38 = vmul.f32 0.35355338, %v3905_v21 }
0x1ad5   : > { %v3910_v43 = vsel %vm1358_vm8, %v3909_v38, -inf }
0x1ad6   : > { %v4072_v26 = vpop.f32.mrb[14].mxu0 }
0x1ad7   : > { %v6323_v27 = vpop.f32.mrb[15].mxu0  ;;  %v4076_v8 = vmul.f32 0.35355338, %v4072_v26 }
0x1ad8   : > { %v7487_v55 = vpop.f32.mrb[40].mxu1 }
0x1ad9   : > { %v6288_v30 = vpop.f32.mrb[41].mxu1  ;;  %v7491_v42 = vpop.eup %6744  ;;  %v4077_v46 = vsel %vm1358_vm8, %v4076_v8, -inf }
0x1ada   : > { %v4239_v31 = vpop.f32.mrb[16].mxu0  ;;  %v3732_v44 = vsel %vm1358_vm8, %v7491_v42, 0.0 }
0x1adb   : > { %v6333_v32 = vpop.f32.mrb[17].mxu0  ;;  %v4243_v45 = vmul.f32 0.35355338, %v4239_v31 }
0x1adc   : > { %v3554_v33 = vpop.f32.mrb[42].mxu1 }
0x1add   : > { %v3558_v35 = vmul.f32 0.35355338, %v3554_v33  ;;  %v6293_v36 = vpop.f32.mrb[43].mxu1  ;;  %v4244_v47 = vsel %vm1358_vm8, %v4243_v45, -inf }
0x1ade   : > { %v4406_v37 = vpop.f32.mrb[18].mxu0 }
0x1adf   : > { %v4410_v39 = vmul.f32 0.35355338, %v4406_v37  ;;  %v6343_v40 = vpop.f32.mrb[19].mxu0  ;;  %v3559_v34 = vsel %vm1358_vm8, %v3558_v35, -inf }
0x1ae0   : > { %3560 = vmax.xlane.f32.xlu0 %v3559_v34 }
0x1ae1   : > { %v4411_v16 = vsel %vm1358_vm8, %v4410_v39, -inf }
0x1ae2   : > { %4412 = vmax.xlane.f32.xlu1 %v4411_v16 }
0x1ae4   : > { %3911 = vmax.xlane.f32.xlu0 %v3910_v43  ;;  %v5849_v43 = vld [vmem:[%s7255_s4 + $0x28] sm:$0xff] }
0x1ae6   : > { %3733 = vadd.xlane.f32.xlu1 %v3732_v44 }
0x1ae8   : > { %4078 = vmax.xlane.f32.xlu0 %v4077_v46 }
0x1aec   : > { %4245 = vmax.xlane.f32.xlu0 %v4244_v47 }
0x1b6d   : > { %v3561_v50 = vpop.xlane.xlu0 %3560 }
0x1b6e   : > { %v3562_v62 = vsub.f32 %v3558_v35, %v3561_v50  ;;  %v5850_v50 = vld [vmem:[%s7255_s4 + $0x30] sm:$0xff] }
0x1b6f   : > { %v4413_v54 = vpop.xlane.xlu1 %4412 }
0x1b70   : > { %v4414_v22 = vsub.f32 %v4410_v39, %v4413_v54  ;;  %v3563_v4 = vmul.f32 1.442695, %v3562_v62  ;;  %v5851_v54 = vld [vmem:[%s7255_s4 + $0x38] sm:$0xff] }
0x1b71   : > { %v3912_v56 = vpop.xlane.xlu0 %3911 }
0x1b72   : > { %v3913_v57 = vsub.f32 %v3909_v38, %v3912_v56  ;;  %v4415_v0 = vmul.f32 1.442695, %v4414_v22  ;;  %v6510_v56 = vpack.c.bf16 %v5851_v54, %v5850_v50 }
0x1b73   : > { %v3734_v17 = vpop.xlane.xlu1 %3733 }
0x1b74   : > { %v3914_v59 = vmul.f32 1.442695, %v3913_v57 }
0x1b75   : > { %v4079_v23 = vpop.xlane.xlu0 %4078 }
0x1b76   : > { %6746 = vpow2.f32 %v3914_v59  ;;  %v4080_v61 = vsub.f32 %v4076_v8, %v4079_v23  ;;  %v5848_v8 = vld [vmem:[%s7255_s4 + $0x20] sm:$0xff]  ;;  %s1002_s4 = scalar_lea.vmem %s7975_s17, %s6968_s24 }
0x1b78   : > { %v4081_v1 = vmul.f32 1.442695, %v4080_v61 }
0x1b79   : > { %v4246_v2 = vpop.xlane.xlu0 %4245 }
0x1b7a   : > { %6748 = vpow2.f32 %v4081_v1  ;;  %v4247_v3 = vsub.f32 %v4243_v45, %v4246_v2  ;;  %v6506_v45 = vpack.c.bf16 %v5849_v43, %v5848_v8 }
0x1b7b   : > { %6750 = vpow2.f32 %v4415_v0 }
0x1b7c   : > { %v4248_v5 = vmul.f32 1.442695, %v4247_v3 }
0x1b7e   : > { %6752 = vpow2.f32 %v4248_v5 }
0x1b7f   : > { %6754 = vpow2.f32 %v3563_v4 }
0x1b80   : > { %v6747_v6 = vpop.eup %6746 }
0x1b81   : > { %v3916_v7 = vsel %vm1358_vm8, %v6747_v6, 0.0 }
0x1b82   : > { %3917 = vadd.xlane.f32.xlu0 %v3916_v7 }
0x1b84   : > { %v6749_v28 = vpop.eup %6748 }
0x1b85   : > { %v4083_v9 = vsel %vm1358_vm8, %v6749_v28, 0.0  ;;  %v7500_v10 = vpop.eup %6750 }
0x1b86   : > { %4084 = vadd.xlane.f32.xlu1 %v4083_v9  ;;  %v4417_v13 = vsel %vm1358_vm8, %v7500_v10, 0.0 }
0x1b88   : > { %v6753_v11 = vpop.eup %6752 }
0x1b89   : > { %v4250_v12 = vsel %vm1358_vm8, %v6753_v11, 0.0  ;;  %v6755_v63 = vpop.eup %6754 }
0x1b8a   : > { %4251 = vadd.xlane.f32.xlu0 %v4250_v12  ;;  %4418 = vadd.xlane.f32.xlu1 %v4417_v13  ;;  %v3565_v14 = vsel %vm1358_vm8, %v6755_v63, 0.0 }
0x1b8e   : > { %3566 = vadd.xlane.f32.xlu0 %v3565_v14 }
0x1b9b   : > { %3737 = vrot.lane.b32.xlu1 %v7390_v58, %s8045_s0 }
0x1b9f   : > { %3921 = vrot.lane.b32.xlu1 %v7437_v60, %s8035_s28  ;;  %s8049_s28 = smov 24  }
0x1ba3   : > { %4088 = vrot.lane.b32.xlu1 %v7437_v60, %s8034_s26  ;;  %s8048_s26 = smov 16  }
0x1ba4   : > { %3570 = vrot.lane.b32.xlu0 %v7390_v58, %s8046_s25 }
0x1ba7   : > { %4422 = vrot.lane.b32.xlu1 %v7437_v60, %s8045_s0 }
0x1ba8   : > { %4255 = vrot.lane.b32.xlu0 %v7437_v60, %s8046_s25 }
0x1bac   : > { %3815 = vrot.lane.b32.xlu0 %v7487_v55, %s8047_s6 }
0x1c0f   : > { %v3918_v15 = vpop.xlane.xlu0 %3917 }
0x1c13   : > { %v4085_v53 = vpop.xlane.xlu1 %4084 }
0x1c17   : > { %v4252_v18 = vpop.xlane.xlu0 %4251  ;;  %v4419_v20 = vpop.xlane.xlu1 %4418 }
0x1c1b   : > { %v3567_v19 = vpop.xlane.xlu0 %3566  ;;  %v3738_v58 = vpop.permute.xlu1 %3737 }
0x1c1c   : > { %6756 = vrcp.f32 %v3567_v19 }
0x1c1d   : > { %6758 = vrcp.f32 %v3734_v17 }
0x1c1e   : > { %6760 = vrcp.f32 %v3918_v15 }
0x1c1f   : > { %v3571_v21 = vpop.permute.xlu0 %3570  ;;  %6762 = vrcp.f32 %v4085_v53  ;;  %v3922_v27 = vpop.permute.xlu1 %3921 }
0x1c20   : > { %6295 = vmatpush3.msk.msra.mxu1 %vm1136_vm2, %v3571_v21  ;;  %6764 = vrcp.f32 %v4252_v18 }
0x1c21   : > { %6304 = vmatprep.subr.mxu1 %v6817_v29  ;;  %6766 = vrcp.f32 %v4419_v20 }
0x1c23   : > { %v4089_v32 = vpop.permute.xlu1 %4088  ;;  %v4256_v36 = vpop.permute.xlu0 %4255 }
0x1c26   : > { %v6757_v24 = vpop.eup %6756 }
0x1c27   : > { %v3569_v60 = vmul.f32 %v6757_v24, %v6755_v63  ;;  %v6759_v25 = vpop.eup %6758  ;;  %v4423_v39 = vpop.permute.xlu1 %4422  ;;  %v5855_v63 = vld [vmem:[%s7282_s29 + $0x1] ss:$0 sm:$0xff] }
0x1c28   : > { %v3736_v26 = vmul.f32 %v6759_v25, %v7491_v42  ;;  %v6761_v55 = vpop.eup %6760  ;;  %v3816_v62 = vpop.permute.xlu0 %3815 }
0x1c29   : > { %6297 = vmatmul.mubr.msk.f32.vlgmr.msra.gmra.mrb[44].mxu1 %vm1372_vm9, %v3569_v60  ;;  %v3920_v30 = vmul.f32 %v6761_v55, %v6747_v6  ;;  %v6763_v31 = vpop.eup %6762  ;;  %v3826_v7 = vsel %vm1282_vm7, %v7426_v49, %v3816_v62  ;;  %v5860_v55 = vld [vmem:[%s7303_s27 + $0x20] sm:$0xff]  ;;  %v5873_v62 = vld [vmem:[%s7313_s10 + $0xa8] sm:$0xff] }
0x1c2a   : > { %6305 = vmatpush3.msk.msra.mxu1 %vm1136_vm2, %v3738_v58  ;;  %6306 = vmatprep.mubr.msk.f32.mxu1 %vm6818_vm6, %v6817_v29  ;;  %v4087_v33 = vmul.f32 %v6763_v31, %v6749_v28  ;;  %v6765_v35 = vpop.eup %6764 }
0x1c2b   : > { %6314 = vmatprep.subr.mxu1 %v6817_v29  ;;  %v4254_v37 = vmul.f32 %v6765_v35, %v6753_v11  ;;  %v6767_v38 = vpop.eup %6766 }
0x1c2c   : > { %v4421_v40 = vmul.f32 %v6767_v38, %v7500_v10 }
0x1c2d   : > { %6307 = vmatmul.mubr.msk.f32.vlgmr.msra.gmra.mrb[46].mxu1 %vm1372_vm9, %v3736_v26 }
0x1c2e   : > { %6315 = vmatpush3.msk.msra.mxu1 %vm1136_vm2, %v3922_v27  ;;  %6316 = vmatprep.mubr.msk.f32.mxu1 %vm6818_vm6, %v6817_v29 }
0x1c2f   : > { %6324 = vmatprep.subr.mxu1 %v6817_v29 }
0x1c31   : > { %6317 = vmatmul.mubr.msk.f32.vlgmr.msra.gmra.mrb[48].mxu1 %vm1372_vm9, %v3920_v30  ;;  %v5861_v30 = vld [vmem:[%s7303_s27 + $0x28] sm:$0xff] }
0x1c32   : > { %6325 = vmatpush3.msk.msra.mxu1 %vm1136_vm2, %v4089_v32  ;;  %6326 = vmatprep.mubr.msk.f32.mxu1 %vm6818_vm6, %v6817_v29  ;;  %v6514_v31 = vpack.c.bf16 %v5861_v30, %v5860_v55  ;;  %v5862_v32 = vld [vmem:[%s7303_s27 + $0x30] sm:$0xff] }
0x1c33   : > { %6334 = vmatprep.subr.mxu1 %v6817_v29 }
0x1c35   : > { %6327 = vmatmul.mubr.msk.f32.vlgmr.msra.gmra.mrb[50].mxu1 %vm1372_vm9, %v4087_v33  ;;  %v5863_v33 = vld [vmem:[%s7303_s27 + $0x38] sm:$0xff] }
0x1c36   : > { %6335 = vmatpush3.msk.msra.mxu1 %vm1136_vm2, %v4256_v36  ;;  %6336 = vmatprep.mubr.msk.f32.mxu1 %vm6818_vm6, %v6817_v29  ;;  %v6518_v35 = vpack.c.bf16 %v5863_v33, %v5862_v32  ;;  %v5868_v36 = vld [vmem:[%s7313_s10 + $0x80] sm:$0xff] }
0x1c37   : > { %6344 = vmatprep.subr.mxu1 %v6817_v29 }
0x1c39   : > { %6337 = vmatmul.mubr.msk.f32.vlgmr.msra.gmra.mrb[52].mxu1 %vm1372_vm9, %v4254_v37  ;;  %v5869_v37 = vld [vmem:[%s7313_s10 + $0x88] sm:$0xff] }
0x1c3a   : > { %6345 = vmatpush3.msk.msra.mxu1 %vm1136_vm2, %v4423_v39  ;;  %6346 = vmatprep.mubr.msk.f32.mxu1 %vm6818_vm6, %v6817_v29  ;;  %v6522_v38 = vpack.c.bf16 %v5869_v37, %v5868_v36 }
0x1c3b   : > { %6507 = vmatprep.subr.bf16.mxu1 %v6506_v45 }
0x1c3c   : > { %6523 = vmatprep.subr.bf16.mxu0 %v6522_v38 }
0x1c3d   : > { %6347 = vmatmul.mubr.msk.f32.vlgmr.msra.gmra.mrb[54].mxu1 %vm1372_vm9, %v4421_v40  ;;  %6525 = vmatpush3.bf16.msra.mxu0 %v6522_v38 }
0x1c3e   : > { %6509 = vmatpush3.bf16.msra.mxu1 %v6506_v45 }
0x1c3f   : > { %6511 = vmatprep.subr.bf16.mxu1 %v6510_v56 }
0x1c42   : > { %6513 = vmatpush3.bf16.msra.mxu1 %v6510_v56 }
0x1c43   : > { %6515 = vmatprep.subr.bf16.mxu1 %v6514_v31 }
0x1cfc   : > { %v3643_v34 = vpop.f32.mrb[44].mxu1 }
0x1cfd   : > { %v6298_v16 = vpop.f32.mrb[45].mxu1 }
0x1d00   : > { %v3810_v42 = vpop.f32.mrb[46].mxu1 }
0x1d01   : > { %v6308_v44 = vpop.f32.mrb[47].mxu1 }
0x1d02   : > { %v5858_v44 = vld [vmem:[%s7321_s23 + $0x1] ss:$0 sm:$0xff] }
0x1d04   : > { %v3994_v46 = vpop.f32.mrb[48].mxu1 }
0x1d05   : > { %v6318_v47 = vpop.f32.mrb[49].mxu1 }
0x1d08   : > { %v4161_v57 = vpop.f32.mrb[50].mxu1 }
0x1d09   : > { %4500 = vrot.lane.b32.xlu0 %v4161_v57, %s8047_s6  ;;  %v6328_v29 = vpop.f32.mrb[51].mxu1 }
0x1d0c   : > { %v4328_v22 = vpop.f32.mrb[52].mxu1 }
0x1d0d   : > { %3819 = vrot.lane.b32.xlu0 %v3643_v34, %s8048_s26  ;;  %4504 = vrot.lane.b32.xlu1 %v4328_v22, %s8048_s26  ;;  %v6338_v59 = vpop.f32.mrb[53].mxu1  ;;  %v5870_v22 = vld [vmem:[%s7313_s10 + $0x90] sm:$0xff] }
0x1d0e   : > { %v5871_v59 = vld [vmem:[%s7313_s10 + $0x98] sm:$0xff] }
0x1d10   : > { %v4495_v23 = vpop.f32.mrb[54].mxu1 }
0x1d11   : > { %4508 = vrot.lane.b32.xlu1 %v4495_v23, %s8049_s28  ;;  %v6348_v61 = vpop.f32.mrb[55].mxu1  ;;  %v6526_v23 = vpack.c.bf16 %v5871_v59, %v5870_v22 }
0x1d12   : > { %v5872_v61 = vld [vmem:[%s7313_s10 + $0xa0] sm:$0xff] }
0x1d13   : > { %6527 = vmatprep.subr.bf16.mxu0 %v6526_v23 }
0x1d14   : > { %6529 = vmatpush3.bf16.msra.mxu0 %v6526_v23 }
0x1d15   : > { %3823 = vrot.lane.b32.xlu1 %v3810_v42, %s8049_s28 }
0x1d7b   : > { %v4501_v0 = vpop.permute.xlu0 %4500 }
0x1d7c   : > { %v4511_v2 = vsel %vm1282_vm7, %v3994_v46, %v4501_v0  ;;  %v5859_v46 = vld [vmem:[%s7327_s7 + $0x1] ss:$0 sm:$0xff]  ;;  %v6530_v0 = vpack.c.bf16 %v5873_v62, %v5872_v61  ;;  %s1005_s7 = scalar_lea.vmem %s7976_s18, %s6968_s24 }
0x1d7d   : > { %v5887_v59 = vld [vmem:[%s1005_s7] ss:$0 sm:$0xff] }
0x1d7e   : > { %6531 = vmatprep.subr.bf16.mxu0 %v6530_v0 }
0x1d7f   : > { %v4505_v1 = vpop.permute.xlu1 %4504  ;;  %v3820_v5 = vpop.permute.xlu0 %3819  ;;  %6533 = vmatpush3.bf16.msra.mxu0 %v6530_v0 }
0x1d80   : > { %v4512_v3 = vsel %vm1962_vm11, %v4511_v2, %v4505_v1  ;;  %v3827_v28 = vsel %vm1962_vm11, %v3826_v7, %v3820_v5  ;;  %v5874_v1 = vld [vmem:[%s7313_s10 + $0xb0] sm:$0xff]  ;;  %v5875_v2 = vld [vmem:[%s7313_s10 + $0xb8] sm:$0xff]  ;;  %v5877_v5 = vld [vmem:[%s7313_s10 + $0xc8] sm:$0xff] }
0x1d81   : > { %v5878_v7 = vld [vmem:[%s7313_s10 + $0xd0] sm:$0xff] }
0x1d83   : > { %v4509_v4 = vpop.permute.xlu1 %4508 }
0x1d84   : > { %v4513_v6 = vsel %vm1964_vm12, %v4512_v3, %v4509_v4  ;;  %v6534_v3 = vpack.c.bf16 %v5875_v2, %v5874_v1  ;;  %v5876_v4 = vld [vmem:[%s7313_s10 + $0xc0] sm:$0xff] }
0x1d85   : > { %v4515_v9 = vrot.slane %v4513_v6, 3  ;;  %v6538_v6 = vpack.c.bf16 %v5877_v5, %v5876_v4 }
0x1d86   : > { %6535 = vmatprep.subr.bf16.mxu0 %v6534_v3 }
0x1d87   : > { %v3824_v10 = vpop.permute.xlu1 %3823  ;;  %6537 = vmatpush3.bf16.msra.mxu0 %v6534_v3 }
0x1d88   : > { %v3828_v11 = vsel %vm1964_vm12, %v3827_v28, %v3824_v10  ;;  %v5879_v28 = vld [vmem:[%s7313_s10 + $0xd8] sm:$0xff]  ;;  %6539 = vmatprep.subr.bf16.mxu0 %v6538_v6  ;;  %v5880_v10 = vld [vmem:[%s7313_s10 + $0xe0] sm:$0xff] }
0x1d89   : > { %v4517_v12 = vsel %vm1136_vm2, %v3828_v11, %v4515_v9  ;;  %v5881_v11 = vld [vmem:[%s7313_s10 + $0xe8] sm:$0xff] }
0x1d8a   : > { %6357 = vmatprep.mubr.msk.f32.mxu1 %vm1142_vm4, %v4517_v12  ;;  %v6546_v12 = vpack.c.bf16 %v5881_v11, %v5880_v10 }
0x1d8b   : > { %6358 = vmatmul.mubr.msk.f32.vlgmr.msra.gmra.mrb[56].mxu1 %vm1142_vm4, %v4515_v9  ;;  %v6542_v9 = vpack.c.bf16 %v5879_v28, %v5878_v7  ;;  %6541 = vmatpush3.bf16.msra.mxu0 %v6538_v6 }
0x1d8c   : > { %6517 = vmatpush3.bf16.msra.mxu1 %v6514_v31 }
0x1d8d   : > { %6519 = vmatprep.subr.bf16.mxu1 %v6518_v35  ;;  %6543 = vmatprep.subr.bf16.mxu0 %v6542_v9 }
0x1d8f   : > { %6545 = vmatpush3.bf16.msra.mxu0 %v6542_v9 }
0x1d90   : > { %6521 = vmatpush3.bf16.msra.mxu1 %v6518_v35  ;;  %6547 = vmatprep.subr.bf16.mxu0 %v6546_v12 }
0x1d93   : > { %6549 = vmatpush3.bf16.msra.mxu0 %v6546_v12 }
0x1e5e   : > { %v6359_v13 = vpop.f32.mrb[56].mxu1 }
0x1e5f   : > { %v4604_v14 = vadd.f32 %v6359_v13, %v7366_v51  ;;  %v4594_v15 = vpop.f32.mrb[57].mxu1  ;;  %v5882_v13 = vld [vmem:[%s7313_s10 + $0xf0] sm:$0xff] }
0x1e60   : > { %v4603_v17 = vadd.f32 %v4594_v15, %v7368_v52  ;;  %v5865_v15 = vld [vmem:[%s7352_s1 + $0x1] ss:$0 sm:$0xff] }
0x1e61   : > { %v4614_v49 = vadd.f32 %v5855_v63, %v4604_v14 }
0x1e62   : > { %v7571_v18 = vadd.f32 %v5855_v63, %v4603_v17  ;;  %v5883_v63 = vld [vmem:[%s7313_s10 + $0xf8] sm:$0xff] }
0x1e63   : > { %v4622_v53 = vsel %vm1146_vm5, %v4614_v49, 0.0  ;;  %v6550_v14 = vpack.c.bf16 %v5883_v63, %v5882_v13 }
0x1e64   : > { %4623 = vadd.xlane.f32.xlu1 %v4622_v53  ;;  %v4619_v19 = vsel %vm1142_vm4, %v7571_v18, 0.0 }
0x1e65   : > { %4620 = vadd.xlane.f32.xlu0 %v4619_v19  ;;  %6551 = vmatprep.subr.bf16.mxu0 %v6550_v14 }
0x1e66   : > { %6553 = vmatpush3.bf16.msra.mxu0 %v6550_v14 }
0x1ef1   : > { %v4624_v20 = vpop.xlane.xlu1 %4623 }
0x1ef2   : > { %v4626_v21 = vmul.f32 0.03125, %v4624_v20  ;;  %v4621_v58 = vpop.xlane.xlu0 %4620 }
0x1ef3   : > { %v4625_v51 = vmul.f32 0.03125, %v4621_v58 }
0x1ef4   : > { %v4628_v24 = vsub.f32 %v4614_v49, %v4626_v21 }
0x1ef5   : > { %v4627_v52 = vsub.f32 %v7571_v18, %v4625_v51 }
0x1ef6   : > { %v4630_v26 = vmul.f32 %v4628_v24, %v4628_v24 }
0x1ef7   : > { %v4629_v60 = vmul.f32 %v4627_v52, %v4627_v52 }
0x1ef8   : > { %v4634_v27 = vsel %vm1146_vm5, %v4630_v26, 0.0 }
0x1ef9   : > { %v4631_v25 = vsel %vm1142_vm4, %v4629_v60, 0.0 }
0x1efa   : > { %4632 = vadd.xlane.f32.xlu0 %v4631_v25 }
0x1efe   : > { %4635 = vadd.xlane.f32.xlu0 %v4634_v27 }
0x1f87   : > { %v4633_v39 = vpop.xlane.xlu0 %4632 }
0x1f88   : > { %v4637_v40 = vmul.f32 0.03125, %v4633_v39 }
0x1f8a   : > { %v4639_v34 = vadd.f32 1e-06, %v4637_v40  ;;  %v5885_v40 = vld [vmem:[%s7361_s9 + $0x1] ss:$0 sm:$0xff] }
0x1f8b   : > { %v4636_v16 = vpop.xlane.xlu0 %4635 }
0x1f8c   : > { %6768 = vrsqrt.f32 %v4639_v34  ;;  %v4638_v42 = vmul.f32 0.03125, %v4636_v16 }
0x1f8e   : > { %v4640_v8 = vadd.f32 1e-06, %v4638_v42 }
0x1f90   : > { %6770 = vrsqrt.f32 %v4640_v8 }
0x1f96   : > { %v6769_v43 = vpop.eup %6768 }
0x1f97   : > { %v4643_v45 = vmul.f32 %v6769_v43, %v4627_v52 }
0x1f99   : > { %v4651_v47 = vmul.f32 %v5858_v44, %v4643_v45 }
0x1f9a   : > { %v6771_v50 = vpop.eup %6770 }
0x1f9b   : > { %v4644_v54 = vmul.f32 %v6771_v50, %v4628_v24  ;;  %v4659_v56 = vadd.f32 %v5859_v46, %v4651_v47 }
0x1f9d   : > { %v4652_v57 = vmul.f32 %v5858_v44, %v4644_v54  ;;  %6368 = vmatprep.mubr.msk.f32.mxu1 %vm1142_vm4, %v4659_v56 }
0x1f9f   : > { %v4660_v29 = vadd.f32 %v5859_v46, %v4652_v57 }
0x1fa1   : > { %6369 = vmatmul.mubr.msk.f32.vlgmr.msra.gmra.mrb[58].mxu1 %vm1142_vm4, %v4660_v29  ;;  %v5886_v29 = vld [vmem:[%s1002_s4] ss:$0 sm:$0xff] }
0x2074   : > { %v6370_v17 = vpop.f32.mrb[58].mxu1 }
0x2075   : > { %v4752_v49 = vadd.f32 %v6370_v17, %v5865_v15  ;;  %v4746_v53 = vpop.f32.mrb[59].mxu1 }
0x2076   : > { %v4747_v19 = vadd.f32 %v5865_v15, %v4746_v53 }
0x2077   : > { %v4758_v20 = vmul.f32 0.044715, %v4752_v49  ;;  %v4756_v35 = vmul.f32 0.5, %v4752_v49 }
0x2078   : > { %v4757_v21 = vmul.f32 0.044715, %v4747_v19  ;;  %v4755_v32 = vmul.f32 0.5, %v4747_v19 }
0x2079   : > { %v4760_v58 = vmul.f32 %v4758_v20, %v4752_v49 }
0x207a   : > { %v4759_v51 = vmul.f32 %v4757_v21, %v4747_v19 }
0x207b   : > { %v4762_v24 = vmul.f32 %v4760_v58, %v4752_v49 }
0x207c   : > { %v4761_v52 = vmul.f32 %v4759_v51, %v4747_v19 }
0x207d   : > { %v4764_v60 = vadd.f32 %v4762_v24, %v4752_v49 }
0x207e   : > { %v4763_v25 = vadd.f32 %v4761_v52, %v4747_v19 }
0x207f   : > { %v4766_v26 = vmul.f32 0.7978846, %v4764_v60 }
0x2080   : > { %v4765_v27 = vmul.f32 0.7978846, %v4763_v25 }
0x2081   : > { %6772 = vtanh.f32 %v4766_v26 }
0x2082   : > { %6774 = vtanh.f32 %v4765_v27 }
0x208b   : > { %v6773_v55 = vpop.eup %6772 }
0x208c   : > { %v6775_v30 = vpop.eup %6774  ;;  %v4770_v31 = vadd.f32 1.0, %v6773_v55 }
0x208d   : > { %v4769_v33 = vadd.f32 1.0, %v6775_v30 }
0x208e   : > { %v4772_v37 = vmul.f32 %v4770_v31, %v4756_v35 }
0x208f   : > { %v4771_v36 = vmul.f32 %v4769_v33, %v4755_v32 }
0x2091   : > { %6403 = vmatprep.mubr.f32.mxu0 %v4771_v36 }
0x2092   : > { %6404 = vmatmul.mubr.f32.vlgmr.msra.gmra.mrb[20].mxu0 %v4772_v37 }
0x2165   : > { %v6405_v38 = vpop.f32.mrb[20].mxu0 }
0x2166   : > { %v4856_v39 = vpop.f32.mrb[21].mxu0 }
0x2167   : > { %v4864_v34 = vadd.f32 %v4856_v39, %v7571_v18 }
0x2169   : > { %v4873_v16 = vadd.f32 %v5885_v40, %v4864_v34 }
0x216b   : > { %v4875_v42 = vrot.slane %v4873_v16, 4 }
0x216d   : > { %v4877_v8 = vsel %vm1134_vm1, %v4873_v16, %v4875_v42 }
0x216e   : > { %v4880_v43 = vsel %vm1146_vm5, %v4877_v8, 0.0 }
0x216f   : > { %4881 = vadd.xlane.f32.xlu0 %v4880_v43 }
0x21fc   : > { %v4882_v44 = vpop.xlane.xlu0 %4881 }
0x21fd   : > { %v4883_v45 = vmul.f32 0.03125, %v4882_v44 }
0x21ff   : > { %v4884_v46 = vsub.f32 %v4877_v8, %v4883_v45 }
0x2201   : > { %v4885_v47 = vmul.f32 %v4884_v46, %v4884_v46 }
0x2203   : > { %v4886_v50 = vsel %vm1146_vm5, %v4885_v47, 0.0 }
0x2204   : > { %4887 = vadd.xlane.f32.xlu1 %v4886_v50 }
0x2291   : > { %v4888_v54 = vpop.xlane.xlu1 %4887 }
0x2292   : > { %v4889_v56 = vmul.f32 0.03125, %v4888_v54 }
0x2294   : > { %v4890_v57 = vadd.f32 1e-06, %v4889_v56 }
0x2296   : > { %6776 = vrsqrt.f32 %v4890_v57 }
0x229f   : > { %4910 = sbr.rel (%p5888_p4) target bundleno = 8872 (0x22a8), region = 116 }
0x22a0   : > { %v6777_v18 = vpop.eup %6776 }
0x22a1   : > { %v4892_v22 = vmul.f32 %v6777_v18, %v4884_v46 }
0x22a3   : > { %v4899_v23 = vmul.f32 %v5886_v29, %v4892_v22 }
0x22a5   : > { %v7617_v61 = vadd.f32 %v5887_v59, %v4899_v23 }
0x22a7   : > { %4911 = vst.msk [vmem:[#allocation2] sm:$0x3] %vm1146_vm5, %v7617_v61 }
0x22a8 PF: > { %p5889_p5 = scmp.ne.s32.totalorder %s6961_s30, 1 }
0x22a9   : > { %v4934_v62 = vld [vmem:[%s7977_s19 + $0x88] sm:$0xff] (!%p5889_p5)  ;;  %v4936_v1 = vld [vmem:[%s7977_s19 + $0x98] sm:$0xff] (!%p5889_p5)  ;;  %v4933_v4 = vld [vmem:[%s7977_s19 + $0x80] sm:$0xff] (!%p5889_p5)  ;;  %v6833_v6 = vmov (!%p5889_p5), 0.0   ;;  %vm5480_vm13 = vcmask (!%p5889_p5), 9216  }
0x22aa   : > { %4915 = sbr.rel (%p5889_p5) target bundleno = 9331 (0x2473), region = 120  ;;  %v4938_v0 = vld [vmem:[%s7977_s19 + $0xa8] sm:$0xff] (!%p5889_p5)  ;;  %v4940_v3 = vld [vmem:[%s7977_s19 + $0xb8] sm:$0xff] (!%p5889_p5)  ;;  %v4937_v5 = vld [vmem:[%s7977_s19 + $0xa0] sm:$0xff] (!%p5889_p5)  ;;  %5016 = vmatprep.mubr.f32.mxu0 (!%p5889_p5), %v6833_v6  ;;  %5087 = vmatprep.mubr.f32.mxu1 (!%p5889_p5), %v6833_v6 }
0x22ab   : > { %v6554_v2 = vpack.c.bf16 (!%p5889_p5), %v4938_v0, %v4934_v62  ;;  %v6562_v7 = vpack.c.bf16 (!%p5889_p5), %v4940_v3, %v4936_v1  ;;  %v6556_v28 = vpack.c.bf16 (!%p5889_p5), %v4937_v5, %v4933_v4  ;;  %v4935_v9 = vld [vmem:[%s7977_s19 + $0x90] sm:$0xff] (!%p5889_p5)  ;;  %v4942_v11 = vld [vmem:[%s7977_s19 + $0xc8] sm:$0xff] (!%p5889_p5)  ;;  %v4944_v63 = vld [vmem:[%s7977_s19 + $0xd8] sm:$0xff] (!%p5889_p5) }
0x22ac   : > { %v4939_v10 = vld [vmem:[%s7977_s19 + $0xb0] sm:$0xff] (!%p5889_p5)  ;;  %v4946_v13 = vld [vmem:[%s7977_s19 + $0xe8] sm:$0xff] (!%p5889_p5)  ;;  %v4948_v14 = vld [vmem:[%s7977_s19 + $0xf8] sm:$0xff] (!%p5889_p5) }
0x22ad   : > { %6555 = vmatprep.subr.bf16.mxu0 (!%p5889_p5), %v6554_v2  ;;  %v6564_v12 = vpack.c.bf16 (!%p5889_p5), %v4939_v10, %v4935_v9  ;;  %6563 = vmatprep.subr.bf16.mxu1 (!%p5889_p5), %v6562_v7  ;;  %v6558_v15 = vpack.c.bf16 (!%p5889_p5), %v4946_v13, %v4942_v11  ;;  %v6566_v17 = vpack.c.bf16 (!%p5889_p5), %v4948_v14, %v4944_v63  ;;  %v4941_v49 = vld [vmem:[%s7977_s19 + $0xc0] sm:$0xff] (!%p5889_p5)  ;;  %v4943_v19 = vld [vmem:[%s7977_s19 + $0xd0] sm:$0xff] (!%p5889_p5)  ;;  %v4918_v58 = vld [vmem:[%s7977_s19 + $0x8] sm:$0xff] (!%p5889_p5) }
0x22ae   : > { %6557 = vmatpush1.bf16.msra.mxu0 (!%p5889_p5), %v6556_v28  ;;  %v4945_v53 = vld [vmem:[%s7977_s19 + $0xe0] sm:$0xff] (!%p5889_p5)  ;;  %v4947_v21 = vld [vmem:[%s7977_s19 + $0xf0] sm:$0xff] (!%p5889_p5)  ;;  %v4922_v51 = vld [vmem:[%s7977_s19 + $0x28] sm:$0xff] (!%p5889_p5) }
0x22af   : > { %6565 = vmatpush1.bf16.msra.mxu1 (!%p5889_p5), %v6564_v12  ;;  %v6560_v20 = vpack.c.bf16 (!%p5889_p5), %v4945_v53, %v4941_v49  ;;  %6559 = vmatprep.subr.bf16.mxu0 (!%p5889_p5), %v6558_v15  ;;  %v6568_v24 = vpack.c.bf16 (!%p5889_p5), %v4947_v21, %v4943_v19  ;;  %v6570_v52 = vpack.c.bf16 (!%p5889_p5), %v4922_v51, %v4918_v58  ;;  %v4920_v60 = vld [vmem:[%s7977_s19 + $0x18] sm:$0xff] (!%p5889_p5)  ;;  %v4917_v26 = vld [vmem:[%s7977_s19] sm:$0xff] (!%p5889_p5)  ;;  %v4919_v30 = vld [vmem:[%s7977_s19 + $0x10] sm:$0xff] (!%p5889_p5) }
0x22b0   : > { %6567 = vmatprep.subr.bf16.mxu1 (!%p5889_p5), %v6566_v17  ;;  %v4924_v25 = vld [vmem:[%s7977_s19 + $0x38] sm:$0xff] (!%p5889_p5)  ;;  %v4921_v55 = vld [vmem:[%s7977_s19 + $0x20] sm:$0xff] (!%p5889_p5)  ;;  %v4923_v31 = vld [vmem:[%s7977_s19 + $0x30] sm:$0xff] (!%p5889_p5) }
0x22b1   : > { %v6578_v27 = vpack.c.bf16 %v4924_v25, %v4920_v60  ;;  %v6572_v32 = vpack.c.bf16 %v4921_v55, %v4917_v26  ;;  %v4926_v33 = vld [vmem:[%s7977_s19 + $0x48] sm:$0xff]  ;;  %v4928_v36 = vld [vmem:[%s7977_s19 + $0x58] sm:$0xff]  ;;  %v6580_v37 = vpack.c.bf16 %v4923_v31, %v4919_v30  ;;  %v4925_v40 = vld [vmem:[%s7977_s19 + $0x40] sm:$0xff] }
0x22b2   : > { %6561 = vmatpush1.bf16.msra.mxu0 %v6560_v20  ;;  %v4930_v35 = vld [vmem:[%s7977_s19 + $0x68] sm:$0xff]  ;;  %v4932_v39 = vld [vmem:[%s7977_s19 + $0x78] sm:$0xff]  ;;  %v4929_v34 = vld [vmem:[%s7977_s19 + $0x60] sm:$0xff] }
0x22b3   : > { %6569 = vmatpush1.bf16.msra.mxu1 %v6568_v24  ;;  %6571 = vmatprep.subr.bf16.mxu0 %v6570_v52  ;;  %v6574_v38 = vpack.c.bf16 %v4930_v35, %v4926_v33  ;;  %v6582_v16 = vpack.c.bf16 %v4932_v39, %v4928_v36  ;;  %v4927_v42 = vld [vmem:[%s7977_s19 + $0x50] sm:$0xff]  ;;  %v5285_v43 = vld [vmem:[%s7979_s21 + $0x80] sm:$0xff]  ;;  %v5286_v44 = vld [vmem:[%s7979_s21 + $0x88] sm:$0xff]  ;;  %v6576_v46 = vpack.c.bf16 %v4929_v34, %v4925_v40 }
0x22b4   : > { %6579 = vmatprep.subr.bf16.mxu1 %v6578_v27  ;;  %v4931_v8 = vld [vmem:[%s7977_s19 + $0x70] sm:$0xff]  ;;  %v5317_v45 = vld [vmem:[%s7979_s21 + $0x180] sm:$0xff]  ;;  %v5318_v47 = vld [vmem:[%s7979_s21 + $0x188] sm:$0xff]  ;;  %v6586_v54 = vpack.c.bf16 %v5286_v44, %v5285_v43 }
0x22b5   : > { %5890 = vmatmul.mubr.msk.f32.vlgmr.msra.gmra.mrb[0].mxu0 %vm1142_vm4, %v7617_v61  ;;  %v6584_v50 = vpack.c.bf16 %v4931_v8, %v4927_v42  ;;  %v5269_v56 = vld [vmem:[%s7979_s21] sm:$0xff]  ;;  %v5270_v57 = vld [vmem:[%s7979_s21 + $0x8] sm:$0xff]  ;;  %v6618_v29 = vpack.c.bf16 %v5318_v47, %v5317_v45  ;;  %v5287_v59 = vld [vmem:[%s7979_s21 + $0x90] sm:$0xff] }
0x22b6   : > { %5891 = vmatmul.mubr.msk.f32.vlgmr.msra.gmra.mrb[0].mxu1 %vm1142_vm4, %v7617_v61  ;;  %6573 = vmatpush1.bf16.msra.mxu0 %v6572_v32  ;;  %v5301_v18 = vld [vmem:[%s7979_s21 + $0x100] sm:$0xff]  ;;  %v5302_v22 = vld [vmem:[%s7979_s21 + $0x108] sm:$0xff]  ;;  %v5288_v23 = vld [vmem:[%s7979_s21 + $0x98] sm:$0xff]  ;;  %v6588_v1 = vpack.c.bf16 %v5270_v57, %v5269_v56 }
0x22b7   : > { %6581 = vmatpush1.bf16.msra.mxu1 %v6580_v37  ;;  %6575 = vmatprep.subr.bf16.mxu0 %v6574_v38  ;;  %v5319_v61 = vld [vmem:[%s7979_s21 + $0x190] sm:$0xff]  ;;  %v5320_v62 = vld [vmem:[%s7979_s21 + $0x198] sm:$0xff]  ;;  %v4916_v0 = vld [vmem:[#allocation2] sm:$0x3]  ;;  %v6620_v2 = vpack.c.bf16 %v5302_v22, %v5301_v18  ;;  %v6590_v3 = vpack.c.bf16 %v5288_v23, %v5287_v59 }
0x22b8   : > { %6583 = vmatprep.subr.bf16.mxu1 %v6582_v16  ;;  %5161 = vmatprep.mubr.f32.mxu0 %v6833_v6  ;;  %v5271_v4 = vld [vmem:[%s7979_s21 + $0x10] sm:$0xff]  ;;  %v5272_v5 = vld [vmem:[%s7979_s21 + $0x18] sm:$0xff]  ;;  %v6622_v7 = vpack.c.bf16 %v5320_v62, %v5319_v61  ;;  %v5289_v9 = vld [vmem:[%s7979_s21 + $0xa0] sm:$0xff] }
0x22b9   : > { %5232 = vmatprep.mubr.f32.mxu1 %v6833_v6  ;;  %v5303_v6 = vld [vmem:[%s7979_s21 + $0x110] sm:$0xff]  ;;  %v5304_v28 = vld [vmem:[%s7979_s21 + $0x118] sm:$0xff]  ;;  %v5290_v10 = vld [vmem:[%s7979_s21 + $0xa8] sm:$0xff]  ;;  %v6592_v13 = vpack.c.bf16 %v5272_v5, %v5271_v4 }
0x22ba   : > { %6577 = vmatpush1.bf16.msra.mxu0 %v6576_v46  ;;  %v5321_v11 = vld [vmem:[%s7979_s21 + $0x1a0] sm:$0xff]  ;;  %v5322_v12 = vld [vmem:[%s7979_s21 + $0x1a8] sm:$0xff]  ;;  %v6624_v63 = vpack.c.bf16 %v5304_v28, %v5303_v6  ;;  %v6594_v14 = vpack.c.bf16 %v5290_v10, %v5289_v9  ;;  %v5291_v20 = vld [vmem:[%s7979_s21 + $0xb0] sm:$0xff] }
0x22bb   : > { %6585 = vmatpush1.bf16.msra.mxu1 %v6584_v50  ;;  %6587 = vmatprep.subr.bf16.mxu0 %v6586_v54  ;;  %v5273_v15 = vld [vmem:[%s7979_s21 + $0x20] sm:$0xff]  ;;  %v5274_v17 = vld [vmem:[%s7979_s21 + $0x28] sm:$0xff]  ;;  %v6626_v53 = vpack.c.bf16 %v5322_v12, %v5321_v11  ;;  %v5292_v21 = vld [vmem:[%s7979_s21 + $0xb8] sm:$0xff] }
0x22bc   : > { %6619 = vmatprep.subr.bf16.mxu1 %v6618_v29  ;;  %v5305_v49 = vld [vmem:[%s7979_s21 + $0x120] sm:$0xff]  ;;  %v5306_v19 = vld [vmem:[%s7979_s21 + $0x128] sm:$0xff]  ;;  %v5323_v58 = vld [vmem:[%s7979_s21 + $0x1b0] sm:$0xff]  ;;  %v6596_v24 = vpack.c.bf16 %v5274_v17, %v5273_v15  ;;  %v6598_v60 = vpack.c.bf16 %v5292_v21, %v5291_v20  ;;  %v5251_v21 = vsub.s32 2, %v7031_v41 }
0x22bd   : > { %5892 = vmatmul.mubr.msk.f32.vlgmr.msra.gmra.mrb[0].mxu0 %vm1142_vm4, %v4916_v0  ;;  %v5324_v51 = vld [vmem:[%s7979_s21 + $0x1b8] sm:$0xff]  ;;  %v6628_v52 = vpack.c.bf16 %v5306_v19, %v5305_v49  ;;  %v5275_v25 = vld [vmem:[%s7979_s21 + $0x30] sm:$0xff]  ;;  %v5293_v31 = vld [vmem:[%s7979_s21 + $0xc0] sm:$0xff] }
0x22be   : > { %5893 = vmatmul.mubr.msk.f32.vlgmr.msra.gmra.mrb[0].mxu1 %vm1142_vm4, %v4916_v0  ;;  %6589 = vmatpush3.bf16.msra.mxu0 %v6588_v1  ;;  %v5276_v26 = vld [vmem:[%s7979_s21 + $0x38] sm:$0xff]  ;;  %v5307_v27 = vld [vmem:[%s7979_s21 + $0x130] sm:$0xff]  ;;  %v6630_v55 = vpack.c.bf16 %v5324_v51, %v5323_v58  ;;  %v5294_v32 = vld [vmem:[%s7979_s21 + $0xc8] sm:$0xff]  ;;  %v5247_v58 = vsub.s32 1, %v7031_v41  ;;  %v5255_v51 = vsub.s32 3, %v7031_v41 }
0x22bf   : > { %6621 = vmatpush3.bf16.msra.mxu1 %v6620_v2  ;;  %6591 = vmatprep.subr.bf16.mxu0 %v6590_v3  ;;  %v5308_v30 = vld [vmem:[%s7979_s21 + $0x138] sm:$0xff]  ;;  %v5325_v33 = vld [vmem:[%s7979_s21 + $0x1c0] sm:$0xff]  ;;  %v5326_v35 = vld [vmem:[%s7979_s21 + $0x1c8] sm:$0xff]  ;;  %v6600_v36 = vpack.c.bf16 %v5276_v26, %v5275_v25  ;;  %v6602_v38 = vpack.c.bf16 %v5294_v32, %v5293_v31 }
0x22c0   : > { %6623 = vmatprep.subr.bf16.mxu1 %v6622_v7  ;;  %v6632_v37 = vpack.c.bf16 %v5308_v30, %v5307_v27  ;;  %v5277_v39 = vld [vmem:[%s7979_s21 + $0x40] sm:$0xff]  ;;  %v5278_v40 = vld [vmem:[%s7979_s21 + $0x48] sm:$0xff]  ;;  %v6634_v16 = vpack.c.bf16 %v5326_v35, %v5325_v33  ;;  %v5295_v8 = vld [vmem:[%s7979_s21 + $0xd0] sm:$0xff] }
0x22c1   : > { %v5309_v34 = vld [vmem:[%s7979_s21 + $0x140] sm:$0xff]  ;;  %v5310_v42 = vld [vmem:[%s7979_s21 + $0x148] sm:$0xff]  ;;  %v5296_v43 = vld [vmem:[%s7979_s21 + $0xd8] sm:$0xff]  ;;  %v6604_v46 = vpack.c.bf16 %v5278_v40, %v5277_v39 }
0x22c2   : > { %6593 = vmatpush3.bf16.msra.mxu0 %v6592_v13  ;;  %v5327_v44 = vld [vmem:[%s7979_s21 + $0x1d0] sm:$0xff]  ;;  %v5328_v45 = vld [vmem:[%s7979_s21 + $0x1d8] sm:$0xff]  ;;  %v6636_v47 = vpack.c.bf16 %v5310_v42, %v5309_v34  ;;  %v6606_v50 = vpack.c.bf16 %v5296_v43, %v5295_v8  ;;  %v5297_v22 = vld [vmem:[%s7979_s21 + $0xe0] sm:$0xff] }
0x22c3   : > { %6625 = vmatpush3.bf16.msra.mxu1 %v6624_v63  ;;  %6595 = vmatprep.subr.bf16.mxu0 %v6594_v14  ;;  %v5279_v54 = vld [vmem:[%s7979_s21 + $0x50] sm:$0xff]  ;;  %v5280_v56 = vld [vmem:[%s7979_s21 + $0x58] sm:$0xff]  ;;  %v6638_v18 = vpack.c.bf16 %v5328_v45, %v5327_v44  ;;  %v5298_v59 = vld [vmem:[%s7979_s21 + $0xe8] sm:$0xff] }
0x22c4   : > { %6627 = vmatprep.subr.bf16.mxu1 %v6626_v53  ;;  %v5311_v57 = vld [vmem:[%s7979_s21 + $0x150] sm:$0xff]  ;;  %v5312_v29 = vld [vmem:[%s7979_s21 + $0x158] sm:$0xff]  ;;  %v5329_v23 = vld [vmem:[%s7979_s21 + $0x1e0] sm:$0xff]  ;;  %v6608_v62 = vpack.c.bf16 %v5280_v56, %v5279_v54  ;;  %v6610_v1 = vpack.c.bf16 %v5298_v59, %v5297_v22 }
0x22c5   : > { %v5330_v61 = vld [vmem:[%s7979_s21 + $0x1e8] sm:$0xff]  ;;  %v6640_v0 = vpack.c.bf16 %v5312_v29, %v5311_v57  ;;  %v5281_v3 = vld [vmem:[%s7979_s21 + $0x60] sm:$0xff]  ;;  %v5299_v9 = vld [vmem:[%s7979_s21 + $0xf0] sm:$0xff] }
0x22c6   : > { %6597 = vmatpush3.bf16.msra.mxu0 %v6596_v24  ;;  %v6642_v2 = vpack.c.bf16 %v5330_v61, %v5329_v23  ;;  %v5282_v4 = vld [vmem:[%s7979_s21 + $0x68] sm:$0xff]  ;;  %v5313_v5 = vld [vmem:[%s7979_s21 + $0x160] sm:$0xff]  ;;  %v5300_v10 = vld [vmem:[%s7979_s21 + $0xf8] sm:$0xff] }
0x22c7   : > { %6629 = vmatpush3.bf16.msra.mxu1 %v6628_v52  ;;  %6599 = vmatprep.subr.bf16.mxu0 %v6598_v60  ;;  %v6612_v6 = vpack.c.bf16 %v5282_v4, %v5281_v3  ;;  %v5314_v7 = vld [vmem:[%s7979_s21 + $0x168] sm:$0xff]  ;;  %v5331_v11 = vld [vmem:[%s7979_s21 + $0x1f0] sm:$0xff]  ;;  %v6614_v12 = vpack.c.bf16 %v5300_v10, %v5299_v9  ;;  %v5332_v13 = vld [vmem:[%s7979_s21 + $0x1f8] sm:$0xff] }
0x22c8   : > { %6631 = vmatprep.subr.bf16.mxu1 %v6630_v55  ;;  %v6644_v28 = vpack.c.bf16 %v5314_v7, %v5313_v5  ;;  %v5283_v63 = vld [vmem:[%s7979_s21 + $0x70] sm:$0xff]  ;;  %v5284_v14 = vld [vmem:[%s7979_s21 + $0x78] sm:$0xff]  ;;  %v6646_v15 = vpack.c.bf16 %v5332_v13, %v5331_v11  ;;  %v5239_v20 = vld [vmem:[%s7978_s20] sm:$0xf] }
0x22c9   : > { %v6616_v17 = vpack.c.bf16 %v5284_v14, %v5283_v63  ;;  %v5315_v49 = vld [vmem:[%s7979_s21 + $0x170] sm:$0xff]  ;;  %v5316_v53 = vld [vmem:[%s7979_s21 + $0x178] sm:$0xff]  ;;  %v5244_v24 = vrot.slane %v5239_v20, %v1128_v48  ;;  %v5252_v52 = vrot.slane %v5239_v20, %v5251_v21  ;;  %v5248_v60 = vrot.slane %v5239_v20, %v5247_v58  ;;  %v5894_v40 = vld [vmem:[%s7980_s22] ss:$0 sm:$0xff] }
0x22ca   : > { %6601 = vmatpush3.bf16.msra.mxu0 %v6600_v36  ;;  %v6648_v19 = vpack.c.bf16 %v5316_v53, %v5315_v49  ;;  %v5256_v25 = vrot.slane %v5239_v20, %v5255_v51 }
0x22cb   : > { %6633 = vmatpush3.bf16.msra.mxu1 %v6632_v37  ;;  %6603 = vmatprep.subr.bf16.mxu0 %v6602_v38 }
0x22cc   : > { %6635 = vmatprep.subr.bf16.mxu1 %v6634_v16 }
0x22ce   : > { %6605 = vmatpush3.bf16.msra.mxu0 %v6604_v46 }
0x22cf   : > { %6637 = vmatpush3.bf16.msra.mxu1 %v6636_v47  ;;  %6607 = vmatprep.subr.bf16.mxu0 %v6606_v50 }
0x22d0   : > { %6639 = vmatprep.subr.bf16.mxu1 %v6638_v18 }
0x22d2   : > { %6609 = vmatpush3.bf16.msra.mxu0 %v6608_v62 }
0x22d3   : > { %6641 = vmatpush3.bf16.msra.mxu1 %v6640_v0  ;;  %6611 = vmatprep.subr.bf16.mxu0 %v6610_v1 }
0x22d4   : > { %6643 = vmatprep.subr.bf16.mxu1 %v6642_v2 }
0x22d6   : > { %6613 = vmatpush3.bf16.msra.mxu0 %v6612_v6 }
0x22d7   : > { %6645 = vmatpush3.bf16.msra.mxu1 %v6644_v28  ;;  %6615 = vmatprep.subr.bf16.mxu0 %v6614_v12 }
0x22d8   : > { %6647 = vmatprep.subr.bf16.mxu1 %v6646_v15 }
0x22da   : > { %6617 = vmatpush3.bf16.msra.mxu0 %v6616_v17 }
0x22db   : > { %6649 = vmatpush3.bf16.msra.mxu1 %v6648_v19 }
0x2390   : > { %v5163_v26 = vpop.f32.mrb[0].mxu0 }
0x2391   : > { %v5261_v27 = vadd.f32 %v5244_v24, %v5163_v26  ;;  %v5234_v55 = vpop.f32.mrb[0].mxu1  ;;  %v5165_v30 = vpop.f32.mrb[1].mxu0 }
0x2392   : > { %v5263_v31 = vadd.f32 %v5252_v52, %v5234_v55  ;;  %v5262_v32 = vadd.f32 %v5248_v60, %v5165_v30  ;;  %v5236_v33 = vpop.f32.mrb[1].mxu1 }
0x2393   : > { %v5264_v35 = vadd.f32 %v5256_v25, %v5236_v33  ;;  %v5265_v37 = vmax.f32 %v5261_v27, 0.0 }
0x2394   : > { %v5266_v36 = vmax.f32 %v5262_v32, 0.0  ;;  %v5267_v39 = vmax.f32 %v5263_v31, 0.0 }
0x2395   : > { %v5268_v38 = vmax.f32 %v5264_v35, 0.0 }
0x2396   : > { %5404 = vmatprep.mubr.f32.mxu0 %v5266_v36 }
0x2397   : > { %5474 = vmatprep.mubr.f32.mxu1 %v5268_v38  ;;  %5405 = vmatmul.mubr.f32.vlgmr.msra.gmra.mrb[2].mxu0 %v5265_v37 }
0x2398   : > { %5475 = vmatmul.mubr.f32.vlgmr.msra.gmra.mrb[2].mxu1 %v5267_v39 }
0x246a   : > { %v6072_v41 = vpop.f32.mrb[2].mxu0 }
0x246b   : > { %v6107_v48 = vpop.f32.mrb[2].mxu1  ;;  %v6073_v34 = vpop.f32.mrb[3].mxu0 }
0x246c   : > { %v6074_v16 = vadd.f32 %v6073_v34, %v6072_v41  ;;  %v6108_v42 = vpop.f32.mrb[3].mxu1 }
0x246d   : > { %v6109_v8 = vadd.f32 %v6108_v42, %v6107_v48 }
0x246e   : > { %v5407_v43 = vadd.f32 %v6074_v16, %v5894_v40 }
0x2470   : > { %v5477_v44 = vadd.f32 %v6109_v8, %v5407_v43 }
0x2472   : > { %5481 = vst.msk [vmem:[#allocation3] sm:$0x3] %vm5480_vm13, %v5477_v44 }
0x2473 PF: > { %p6659_p6 = scmp.eq.s32.totalorder %s6961_s30, 1  ;;  %s6834_s23 = smov [#allocation3]  }
0x2474   : > { %s5489_s7 = sshll.u32 %s6834_s23, 4  ;;  %s5490_s7 = int_to_ptr.vmem [resolvable:$true] %s5489_s7 }
0x2475   : > { %s6778_s1 = scalar_lea.vmem %s5490_s7, 32  ;;  %p6785_p10 = scmp.lt.s32.totalorder %s5490_s7, %s5490_s7 }
0x2476   : > { %p6779_p7 = scmp.ne.s32.totalorder %s5490_s7, %s6778_s1  ;;  %p6786_p11 = scmp.lt.s32.totalorder %s6778_s1, %s6778_s1 }
0x2478   : > { %p6780_p8 = pnand %p6779_p7, %p6659_p6  ;;  %p6787_p12 = por %p6786_p11, %p6785_p10 }
0x247a   : > { %p6781_p9 = pneg %p6780_p8 }
0x247c   : > { %p6788_p13 = pnand %p6787_p12, %p6781_p9 }
0x247e   : > { %6791 = shalt.err (!%p6788_p13)
}
0x247f   : > { %s8050_s2 = sld [smem:[#allocation18_spill]] }
0x2485   : > { %s6792_s3 = scalar_lea.hbm %s8050_s2, 32 }
0x2486   : > { %p6793_p0 = scmp.ne.s32.totalorder %s8050_s2, %s6792_s3  ;;  %p6798_p3 = scmp.lt.u32.totalorder %s6792_s3, %s8050_s2 }
0x2488   : > { %p6794_p1 = pnand %p6793_p0, %p6659_p6 }
0x248a   : > { %p6795_p2 = pneg %p6794_p1 }
0x248c   : > { %p6800_p4 = pnand %p6798_p3, %p6795_p2 }
0x248e   : > { %6803 = shalt.err (!%p6800_p4)
}
0x248f   : > { %6656 = dma.vmem_to_hbm [thread:$0]  (%p6659_p6), %s5490_s7, 32, %s8050_s2, [#allocation4]  }
0x2490   : > { %6809 = dma.done.wait (%p6659_p6), [#allocation4], 32  }
0x2491   : > { %6811 = vsyncadd (%p6659_p6), [#allocation4], 4294967264 }
0x2492 PF: > { %s8051_s28 = sld [smem:[#allocation6_spill]] }
0x2498   : > { %s34_s4 = sadd.s32 1, %s8051_s28  }
0x2499   : > { %p31_p5 = scmp.ge.s32.totalorder %s34_s4, 4  }
0x249b   :  { %33 = sbr.rel (!%p31_p5) target bundleno = 14 (0xe), region = 213 }
0x24a2   :  { %5502 = vsyncpa [#allocation4], 1 }
0x24a3   :  { %5504 = vsyncpa [#allocation4 + $0x1], 1 }

</bundles_post_ra>
